<compile_context>
chip_gen: v7x
topology: tpu7x:2x2x1
jax: 0.10.0
libtpu: 0.0.40
codegen_flags: <defaults>
</compile_context>

<pallas_src>
import functools

import jax
import jax.numpy as jnp
from jax import lax
from jax.experimental import pallas as pl
from jax.experimental.pallas import tpu as pltpu

D_MODEL = 512
D_FF = 2048
LN_EPS = 1e-5


def _ffn_ln_kernel(x_ref, w1_ref, w2_ref, o_ref):
    # x_ref : (tm, d_model)   f32 token tile
    # w1_ref: (d_model, d_ff) bf16, VMEM-resident (single-buffered)
    # w2_ref: (d_ff, d_model) bf16, VMEM-resident (single-buffered)
    x = x_ref[...].astype(jnp.float32)

    # Linear(d_model -> d_ff, bias=False) + ReLU — bf16 MXU, f32 accumulation.
    h = jnp.dot(x.astype(jnp.bfloat16), w1_ref[...],
                preferred_element_type=jnp.float32)
    h = jnp.maximum(h, 0.0)

    # Linear(d_ff -> d_model, bias=False) + residual (residual kept in f32).
    y = jnp.dot(h.astype(jnp.bfloat16), w2_ref[...],
                preferred_element_type=jnp.float32) + x

    # LayerNorm over last dim (gamma=1, beta=0), single-pass statistics.
    inv_d = jnp.float32(1.0 / D_MODEL)
    mean = jnp.sum(y, axis=-1, keepdims=True) * inv_d
    mean_sq = jnp.sum(y * y, axis=-1, keepdims=True) * inv_d
    var = mean_sq - mean * mean
    o_ref[...] = ((y - mean) * lax.rsqrt(var + LN_EPS)).astype(o_ref.dtype)


def _round_up(v, m):
    return ((v + m - 1) // m) * m


@functools.partial(jax.jit, static_argnames=("tm",))
def poswise_ffn(x, w1, w2, *, tm=256):
    """x: (batch, seq, d_model) f32; w1: (d_model, d_ff); w2: (d_ff, d_model)."""
    b, s, d = x.shape
    assert d == D_MODEL
    m = b * s
    x2 = x.reshape(m, d)

    # Weights streamed/resident in bf16 (f32 accumulation inside the kernel).
    w1b = w1.astype(jnp.bfloat16)
    w2b = w2.astype(jnp.bfloat16)

    # Pick the effective token tile: as large as requested, but shrink for small
    # m so the (parallel) grid has at least 2 steps; keep a multiple of 8 rows.
    tm_eff = min(tm, max(8, _round_up((m + 1) // 2, 8)))
    grid = (pl.cdiv(m, tm_eff),)

    out = pl.pallas_call(
        _ffn_ln_kernel,
        out_shape=jax.ShapeDtypeStruct((m, d), x.dtype),
        grid_spec=pltpu.PrefetchScalarGridSpec(
            num_scalar_prefetch=0,
            grid=grid,
            in_specs=[
                # token tile (double-buffered by default — it changes per step)
                pl.BlockSpec((tm_eff, D_MODEL), lambda i: (i, 0)),
                # whole weights, constant index_map -> fetched once, 1 buffer
                pl.BlockSpec((D_MODEL, D_FF), lambda i: (0, 0),
                             pipeline_mode=pl.Buffered(1)),
                pl.BlockSpec((D_FF, D_MODEL), lambda i: (0, 0),
                             pipeline_mode=pl.Buffered(1)),
            ],
            out_specs=pl.BlockSpec((tm_eff, D_MODEL), lambda i: (i, 0)),
        ),
        compiler_params=pltpu.CompilerParams(
            dimension_semantics=("parallel",),
            vmem_limit_bytes=48 << 20,
        ),
    )(x2, w1b, w2b)
    return out.reshape(b, s, d)


def init_params(key):
    # nn.Linear default init: U(-1/sqrt(fan_in), 1/sqrt(fan_in)); stored as
    # (in, out) so the kernel computes x @ W directly.
    k1, k2 = jax.random.split(key)
    b1 = 1.0 / jnp.sqrt(jnp.float32(D_MODEL))
    b2 = 1.0 / jnp.sqrt(jnp.float32(D_FF))
    w1 = jax.random.uniform(k1, (D_MODEL, D_FF), jnp.float32, -b1, b1)
    w2 = jax.random.uniform(k2, (D_FF, D_MODEL), jnp.float32, -b2, b2)
    return w1, w2


def reference(x, w1, w2):
    y = jnp.maximum(x @ w1, 0.0) @ w2 + x
    mean = jnp.mean(y, axis=-1, keepdims=True)
    var = jnp.mean((y - mean) ** 2, axis=-1, keepdims=True)
    return (y - mean) * lax.rsqrt(var + LN_EPS)


if __name__ == "__main__":
    key = jax.random.PRNGKey(0)
    kx, kp = jax.random.split(key)

    batch, seq = 2, 8
    x = jax.random.normal(kx, (batch, seq, D_MODEL), jnp.float32)
    w1, w2 = init_params(kp)

    out = poswise_ffn(x, w1, w2)
    out = jax.block_until_ready(out)

    ref = reference(x, w1, w2)
    assert out.shape == (batch, seq, D_MODEL)
    # bf16 matmuls (f32 accumulation) vs. the pure-f32 reference: a few 1e-3
    # relative error is expected, so use a correspondingly loose tolerance.
    assert jnp.allclose(out, ref, atol=5e-2, rtol=5e-2), "mismatch vs reference"

    print("KERNEL_OK")
</pallas_src>

<mosaic_0001>
module attributes {stable_mosaic.version = 11 : i64} {
  func.func @_ffn_ln_kernel(%arg0: i32, %arg1: memref<8x512xf32, #tpu.memory_space<vmem>>, %arg2: memref<512x2048xbf16, #tpu.memory_space<vmem>>, %arg3: memref<2048x512xbf16, #tpu.memory_space<vmem>>, %arg4: memref<8x512xf32, #tpu.memory_space<vmem>>) attributes {dimension_semantics = [#tpu.dimension_semantics<parallel>], iteration_bounds = array<i64: 2>, scalar_prefetch = 0 : i64, scratch_operands = 0 : i64, tpu.core_type = #tpu.core_type<tc>, window_params = [{transform_indices = @transform_0, window_bounds = array<i64: 8, 512>}, {pipeline_mode = #tpu.pipeline_mode<synchronous>, transform_indices = @transform_1, window_bounds = array<i64: 512, 2048>}, {pipeline_mode = #tpu.pipeline_mode<synchronous>, transform_indices = @transform_2, window_bounds = array<i64: 2048, 512>}, {transform_indices = @transform_3, window_bounds = array<i64: 8, 512>}]} {
    %c0 = arith.constant 0 : index
    %c0_0 = arith.constant 0 : index
    %0 = vector.load %arg1[%c0, %c0_0] : memref<8x512xf32, #tpu.memory_space<vmem>>, vector<8x512xf32>
    %1 = arith.truncf %0 : vector<8x512xf32> to vector<8x512xbf16>
    %c0_1 = arith.constant 0 : index
    %c0_2 = arith.constant 0 : index
    %2 = vector.load %arg2[%c0_1, %c0_2] : memref<512x2048xbf16, #tpu.memory_space<vmem>>, vector<512x2048xbf16>
    %cst = arith.constant dense<0.000000e+00> : vector<8x2048xf32>
    %3 = tpu.matmul %1, %2, %cst {dimension_numbers = #tpu.dot_dimension_numbers<[1], [0], [0], [1], [0, 0, 1, 1], [], []>} : vector<8x512xbf16>, vector<512x2048xbf16>, vector<8x2048xf32> -> vector<8x2048xf32>
    %cst_3 = arith.constant 0.000000e+00 : f32
    %4 = vector.broadcast %cst_3 : f32 to vector<8x2048xf32>
    %5 = arith.maximumf %3, %4 : vector<8x2048xf32>
    %6 = arith.truncf %5 : vector<8x2048xf32> to vector<8x2048xbf16>
    %c0_4 = arith.constant 0 : index
    %c0_5 = arith.constant 0 : index
    %7 = vector.load %arg3[%c0_4, %c0_5] : memref<2048x512xbf16, #tpu.memory_space<vmem>>, vector<2048x512xbf16>
    %cst_6 = arith.constant dense<0.000000e+00> : vector<8x512xf32>
    %8 = tpu.matmul %6, %7, %cst_6 {dimension_numbers = #tpu.dot_dimension_numbers<[1], [0], [0], [1], [0, 0, 1, 1], [], []>} : vector<8x2048xbf16>, vector<2048x512xbf16>, vector<8x512xf32> -> vector<8x512xf32>
    %9 = arith.addf %8, %0 : vector<8x512xf32>
    %cst_7 = arith.constant dense<0.000000e+00> : vector<8xf32>
    %10 = vector.multi_reduction <add>, %9, %cst_7 [1] : vector<8x512xf32> to vector<8xf32>
    %11 = vector.shape_cast %10 : vector<8xf32> to vector<8x1xf32>
    %cst_8 = arith.constant 0.001953125 : f32
    %12 = vector.broadcast %cst_8 : f32 to vector<8x1xf32>
    %13 = arith.mulf %11, %12 : vector<8x1xf32>
    %14 = arith.mulf %9, %9 : vector<8x512xf32>
    %cst_9 = arith.constant dense<0.000000e+00> : vector<8xf32>
    %15 = vector.multi_reduction <add>, %14, %cst_9 [1] : vector<8x512xf32> to vector<8xf32>
    %16 = vector.shape_cast %15 : vector<8xf32> to vector<8x1xf32>
    %cst_10 = arith.constant 0.001953125 : f32
    %17 = vector.broadcast %cst_10 : f32 to vector<8x1xf32>
    %18 = arith.mulf %16, %17 : vector<8x1xf32>
    %19 = arith.mulf %13, %13 : vector<8x1xf32>
    %20 = arith.subf %18, %19 : vector<8x1xf32>
    %21 = vector.broadcast %13 : vector<8x1xf32> to vector<8x512xf32>
    %22 = arith.subf %9, %21 : vector<8x512xf32>
    %cst_11 = arith.constant 9.99999974E-6 : f32
    %23 = vector.broadcast %cst_11 : f32 to vector<8x1xf32>
    %24 = arith.addf %20, %23 : vector<8x1xf32>
    %25 = math.rsqrt %24 : vector<8x1xf32>
    %26 = vector.broadcast %25 : vector<8x1xf32> to vector<8x512xf32>
    %27 = arith.mulf %22, %26 : vector<8x512xf32>
    %c0_12 = arith.constant 0 : index
    %c0_13 = arith.constant 0 : index
    %28 = vector.load %arg4[%c0_12, %c0_13] : memref<8x512xf32, #tpu.memory_space<vmem>>, vector<8x512xf32>
    tpu.vector_store %arg4[%c0_12, %c0_13], %27 {strides = array<i32>} : memref<8x512xf32, #tpu.memory_space<vmem>>, vector<8x512xf32>,
    return
  }
  func.func @transform_0(%arg0: i32) -> (i32, i32) {
    %c0_i32 = arith.constant 0 : i32
    %c0_i32_0 = arith.constant 0 : i32
    return %arg0, %c0_i32 : i32, i32
  }
  func.func @transform_1(%arg0: i32) -> (i32, i32) {
    %c0_i32 = arith.constant 0 : i32
    %c0_i32_0 = arith.constant 0 : i32
    %c0_i32_1 = arith.constant 0 : i32
    return %c0_i32, %c0_i32_0 : i32, i32
  }
  func.func @transform_2(%arg0: i32) -> (i32, i32) {
    %c0_i32 = arith.constant 0 : i32
    %c0_i32_0 = arith.constant 0 : i32
    %c0_i32_1 = arith.constant 0 : i32
    return %c0_i32, %c0_i32_0 : i32, i32
  }
  func.func @transform_3(%arg0: i32) -> (i32, i32) {
    %c0_i32 = arith.constant 0 : i32
    %c0_i32_0 = arith.constant 0 : i32
    return %arg0, %c0_i32 : i32, i32
  }
}

</mosaic_0001>

<bundles_post_ra>
// kernel: poswise_ffn.1
= control target key start
LH: loop header
LB: loop body
LE: loop exit
PB: predicated region body
PF: predicated region fallthrough
CT: control target
= control target key end

     0   :  { %8 = vsyncpa [#allocation3], 0  ;;  %s13069_s0 = inlined_call_operand.vmem [shape: f32[16,512], index: 0, kind: input, shape index: {}]   ;;  %s13070_s1 = inlined_call_operand.vmem [shape: bf16[512,2048], index: 1, kind: input, shape index: {}]   ;;  %s13071_s2 = inlined_call_operand.vmem [shape: bf16[2048,512], index: 2, kind: input, shape index: {}]   ;;  %s13072_s3 = inlined_call_operand.hbm [shape: f32[16,512], index: 3, kind: output, shape index: {}]  }
   0x1   :  { %10 = vsyncpa [#allocation3 + $0x1], 0  ;;  %s9799_s12 = smov 0   ;;  %s9801_s13 = smov 0  }
   0x2   :  { %s9803_s14 = smov 0   ;;  %s9805_s15 = smov 0  }
   0x3 LB: > { %s9820_s16 = sadd.s32 4294967295, %s9776_s15   ;;  %s7771_s17 = sadd.s32 4294967294, %s9776_s15   ;;  %s9776_s15 = sphi %s9805_s15, %s13078_s15   ;;  %s9772_s14 = sphi %s9803_s14, %s13077_s14   ;;  %s9768_s13 = sphi %s9801_s13, %s13076_s13   ;;  %s9764_s12 = sphi %s9799_s12, %s13075_s12  }
   0x4   : > { %s9824_s18 = sadd.s32 1, %s9776_s15   ;;  %s91_s19 = sadd.s32 1, %s9772_s14 }
   0x5   : > { %s88_s20 = ssub.s32 %s9776_s15, %s9824_s18  ;;  %p101_p0 = scmp.ne.s32.totalorder %s9772_s14, %s9768_s13 }
   0x6   : > { %p89_p1 = scmp.eq.s32.totalorder %s88_s20, 0  ;;  %p102_p2 = scmp.eq.s32.totalorder %s9820_s16, 1 }
   0x7   : > { %p107_p3 = scmp.ne.s32.totalorder %s9768_s13, %s9764_s12  ;;  %p108_p4 = scmp.eq.s32.totalorder %s7771_s17, 1 }
   0x8   : > { %s9835_s21 = scalar_select %p89_p1, %s9772_s14, %s91_s19  }
   0x9   : > { %p9837_p5 = por %p102_p2, %p101_p0  ;;  %p9841_p6 = por %p108_p4, %p107_p3 }
   0xa   : > { %p7774_p7 = scmp.ge.s32.totalorder %s9776_s15, 1  ;;  %p140_p8 = scmp.lt.s32.totalorder %s9776_s15, 3 }
   0xc   : > { %p141_p9 = pnand %p7774_p7, %p140_p8 }
   0xd   : > { %v177_v0 = vld [vmem:[%s13070_s1] sm:$0xff] (!%p141_p9)  ;;  %v178_v2 = vld [vmem:[%s13070_s1 + $0x8] sm:$0xff] (!%p141_p9)  ;;  %p164_p10 = scmp.lt.s32.totalorder (!%p141_p9), %s9820_s16, 1  ;;  %s161_s7 = sand.u32 (!%p141_p9), 1, %s9768_s13  }
   0xe   : > { %144 = sbr.rel (%p141_p9) target bundleno = 1442 (0x5a2), region = 32  ;;  %v185_v1 = vld [vmem:[%s13070_s1 + $0x40] sm:$0xff] (!%p141_p9)  ;;  %v186_v4 = vld [vmem:[%s13070_s1 + $0x48] sm:$0xff] (!%p141_p9)  ;;  %s8808_s8 = sshll.u32 (!%p141_p9), %s9820_s16, 9 }
   0xf   : > { %v7779_v3 = vcombine.high (!%p141_p9), %v177_v0, %v185_v1  ;;  %v7778_v5 = vcombine.low (!%p141_p9), %v177_v0, %v185_v1  ;;  %v193_v6 = vld [vmem:[%s13070_s1 + $0x80] sm:$0xff] (!%p141_p9)  ;;  %v7781_v8 = vcombine.high (!%p141_p9), %v178_v2, %v186_v4  ;;  %v7780_v9 = vcombine.low (!%p141_p9), %v178_v2, %v186_v4  ;;  %v194_v11 = vld [vmem:[%s13070_s1 + $0x88] sm:$0xff] (!%p141_p9)  ;;  %s13027_s19 = scalar_lea.hbm (!%p141_p9), %s13072_s3, %s8808_s8  ;;  %s9778_s24 = smov (!%p141_p9), [#allocation2]  }
  0x10   : > { %v201_v7 = vld [vmem:[%s13070_s1 + $0xc0] sm:$0xff] (!%p141_p9)  ;;  %v202_v12 = vld [vmem:[%s13070_s1 + $0xc8] sm:$0xff] (!%p141_p9)  ;;  %s9718_s25 = sshll.u32 (!%p141_p9), %s9778_s24, 4  ;;  %s9719_s25 = int_to_ptr.vmem [resolvable:$false] %s9718_s25 }
  0x11   : > { %v7795_v10 = vcombine.high (!%p141_p9), %v193_v6, %v201_v7  ;;  %v209_v13 = vld [vmem:[%s13070_s1 + $0x100] sm:$0xff] (!%p141_p9)  ;;  %3249 = vmatprep.subr.bf16.mxu0 (!%p141_p9), %v7779_v3  ;;  %v7797_v14 = vcombine.high (!%p141_p9), %v194_v11, %v202_v12  ;;  %v210_v16 = vld [vmem:[%s13070_s1 + $0x108] sm:$0xff] (!%p141_p9)  ;;  %3331 = vmatprep.subr.bf16.mxu1 (!%p141_p9), %v7781_v8  ;;  %v7794_v18 = vcombine.low (!%p141_p9), %v193_v6, %v201_v7  ;;  %s9720_s27 = scalar_lea.vmem (!%p141_p9), %s9719_s25, 1024 }
  0x12   : > { %v217_v15 = vld [vmem:[%s13070_s1 + $0x140] sm:$0xff] (!%p141_p9)  ;;  %v218_v17 = vld [vmem:[%s13070_s1 + $0x148] sm:$0xff] (!%p141_p9)  ;;  %3250 = vmatpush1.bf16.msra.mxu0 (!%p141_p9), %v7778_v5  ;;  %3332 = vmatpush1.bf16.msra.mxu1 (!%p141_p9), %v7780_v9  ;;  %v7796_v19 = vcombine.low (!%p141_p9), %v194_v11, %v202_v12 }
  0x13   : > { %3251 = vmatprep.subr.bf16.mxu0 (!%p141_p9), %v7795_v10  ;;  %v7811_v20 = vcombine.high (!%p141_p9), %v209_v13, %v217_v15  ;;  %3333 = vmatprep.subr.bf16.mxu1 (!%p141_p9), %v7797_v14  ;;  %v7813_v21 = vcombine.high (!%p141_p9), %v210_v16, %v218_v17  ;;  %v225_v22 = vld [vmem:[%s13070_s1 + $0x180] sm:$0xff] (!%p141_p9)  ;;  %v226_v24 = vld [vmem:[%s13070_s1 + $0x188] sm:$0xff] (!%p141_p9)  ;;  %v7810_v26 = vcombine.low (!%p141_p9), %v209_v13, %v217_v15 }
  0x14   : > { %v233_v23 = vld [vmem:[%s13070_s1 + $0x1c0] sm:$0xff] (!%p141_p9)  ;;  %v234_v25 = vld [vmem:[%s13070_s1 + $0x1c8] sm:$0xff] (!%p141_p9)  ;;  %v7812_v27 = vcombine.low (!%p141_p9), %v210_v16, %v218_v17 }
  0x15   : > { %v7827_v28 = vcombine.high %v225_v22, %v233_v23  ;;  %v7829_v29 = vcombine.high %v226_v24, %v234_v25  ;;  %v241_v30 = vld [vmem:[%s13070_s1 + $0x200] sm:$0xff]  ;;  %v242_v32 = vld [vmem:[%s13070_s1 + $0x208] sm:$0xff]  ;;  %s165_s28 = scalar_select %p164_p10, %s9820_s16, 1  ;;  %v7826_v34 = vcombine.low %v225_v22, %v233_v23  ;;  %v7828_v35 = vcombine.low %v226_v24, %v234_v25 }
  0x16   : > { %3252 = vmatpush1.bf16.msra.mxu0 %v7794_v18  ;;  %3334 = vmatpush1.bf16.msra.mxu1 %v7796_v19  ;;  %v249_v31 = vld [vmem:[%s13070_s1 + $0x240] sm:$0xff]  ;;  %v250_v33 = vld [vmem:[%s13070_s1 + $0x248] sm:$0xff]  ;;  %s7698_s16 = scalar_lea.sflag [#allocation3], %s161_s7 }
  0x17   : > { %3253 = vmatprep.subr.bf16.mxu0 %v7811_v20  ;;  %3335 = vmatprep.subr.bf16.mxu1 %v7813_v21  ;;  %v7843_v36 = vcombine.high %v241_v30, %v249_v31  ;;  %v7845_v37 = vcombine.high %v242_v32, %v250_v33  ;;  %v257_v38 = vld [vmem:[%s13070_s1 + $0x280] sm:$0xff]  ;;  %v258_v40 = vld [vmem:[%s13070_s1 + $0x288] sm:$0xff]  ;;  %s8807_s10 = sshll.u32 %s165_s28, 5  ;;  %v7842_v42 = vcombine.low %v241_v30, %v249_v31 }
  0x18   : > { %v265_v39 = vld [vmem:[%s13070_s1 + $0x2c0] sm:$0xff]  ;;  %v266_v41 = vld [vmem:[%s13070_s1 + $0x2c8] sm:$0xff]  ;;  %v7844_v43 = vcombine.low %v242_v32, %v250_v33  ;;  %s9930_s26 = scalar_lea.vmem %s13069_s0, %s8807_s10 }
  0x19   : > { %v7859_v44 = vcombine.high %v257_v38, %v265_v39  ;;  %v7861_v45 = vcombine.high %v258_v40, %v266_v41  ;;  %v273_v46 = vld [vmem:[%s13070_s1 + $0x300] sm:$0xff]  ;;  %v274_v48 = vld [vmem:[%s13070_s1 + $0x308] sm:$0xff]  ;;  %v7858_v50 = vcombine.low %v257_v38, %v265_v39  ;;  %v7860_v51 = vcombine.low %v258_v40, %v266_v41 }
  0x1a   : > { %3254 = vmatpush1.bf16.msra.mxu0 %v7810_v26  ;;  %3336 = vmatpush1.bf16.msra.mxu1 %v7812_v27  ;;  %v281_v47 = vld [vmem:[%s13070_s1 + $0x340] sm:$0xff]  ;;  %v282_v49 = vld [vmem:[%s13070_s1 + $0x348] sm:$0xff] }
  0x1b   : > { %3255 = vmatprep.subr.bf16.mxu0 %v7827_v28  ;;  %3337 = vmatprep.subr.bf16.mxu1 %v7829_v29  ;;  %v7875_v52 = vcombine.high %v273_v46, %v281_v47  ;;  %v170_v53 = vld [vmem:[%s9930_s26 + $0x8] sm:$0xff]  ;;  %v7877_v54 = vcombine.high %v274_v48, %v282_v49  ;;  %v289_v55 = vld [vmem:[%s13070_s1 + $0x380] sm:$0xff]  ;;  %v7874_v60 = vcombine.low %v273_v46, %v281_v47 }
  0x1c   : > { %v297_v56 = vld [vmem:[%s13070_s1 + $0x3c0] sm:$0xff]  ;;  %v9945_v57 = vpack.c.bf16 %v170_v53, %v170_v53  ;;  %v290_v58 = vld [vmem:[%s13070_s1 + $0x388] sm:$0xff]  ;;  %v7876_v61 = vcombine.low %v274_v48, %v282_v49 }
  0x1d   : > { %v298_v59 = vld [vmem:[%s13070_s1 + $0x3c8] sm:$0xff]  ;;  %v7891_v62 = vcombine.high %v289_v55, %v297_v56  ;;  %v305_v0 = vld [vmem:[%s13070_s1 + $0x400] sm:$0xff]  ;;  %v7890_v4 = vcombine.low %v289_v55, %v297_v56 }
  0x1e   : > { %3256 = vmatpush1.bf16.msra.mxu0 %v7826_v34  ;;  %3338 = vmatpush1.bf16.msra.mxu1 %v7828_v35  ;;  %v7893_v63 = vcombine.high %v290_v58, %v298_v59  ;;  %v313_v1 = vld [vmem:[%s13070_s1 + $0x440] sm:$0xff]  ;;  %v306_v2 = vld [vmem:[%s13070_s1 + $0x408] sm:$0xff]  ;;  %v7892_v5 = vcombine.low %v290_v58, %v298_v59 }
  0x1f   : > { %3257 = vmatprep.subr.bf16.mxu0 %v7843_v36  ;;  %3339 = vmatprep.subr.bf16.mxu1 %v7845_v37  ;;  %v314_v3 = vld [vmem:[%s13070_s1 + $0x448] sm:$0xff]  ;;  %v7907_v6 = vcombine.high %v305_v0, %v313_v1  ;;  %v321_v8 = vld [vmem:[%s13070_s1 + $0x480] sm:$0xff]  ;;  %v7906_v12 = vcombine.low %v305_v0, %v313_v1 }
  0x20   : > { %3281 = vmatprep.mubr.bf16.mxu0 %v9945_v57  ;;  %3363 = vmatprep.mubr.bf16.mxu1 %v9945_v57  ;;  %v7909_v7 = vcombine.high %v306_v2, %v314_v3  ;;  %v329_v9 = vld [vmem:[%s13070_s1 + $0x4c0] sm:$0xff]  ;;  %v322_v10 = vld [vmem:[%s13070_s1 + $0x488] sm:$0xff]  ;;  %v7908_v13 = vcombine.low %v306_v2, %v314_v3 }
  0x21   : > { %v330_v11 = vld [vmem:[%s13070_s1 + $0x4c8] sm:$0xff]  ;;  %v7923_v14 = vcombine.high %v321_v8, %v329_v9  ;;  %v337_v16 = vld [vmem:[%s13070_s1 + $0x500] sm:$0xff]  ;;  %v7922_v20 = vcombine.low %v321_v8, %v329_v9 }
  0x22   : > { %3258 = vmatpush1.bf16.msra.mxu0 %v7842_v42  ;;  %3340 = vmatpush1.bf16.msra.mxu1 %v7844_v43  ;;  %v7925_v15 = vcombine.high %v322_v10, %v330_v11  ;;  %v345_v17 = vld [vmem:[%s13070_s1 + $0x540] sm:$0xff]  ;;  %v338_v18 = vld [vmem:[%s13070_s1 + $0x508] sm:$0xff]  ;;  %v7924_v21 = vcombine.low %v322_v10, %v330_v11 }
  0x23   : > { %3259 = vmatprep.subr.bf16.mxu0 %v7859_v44  ;;  %3341 = vmatprep.subr.bf16.mxu1 %v7861_v45  ;;  %v346_v19 = vld [vmem:[%s13070_s1 + $0x548] sm:$0xff]  ;;  %v7939_v22 = vcombine.high %v337_v16, %v345_v17  ;;  %v353_v24 = vld [vmem:[%s13070_s1 + $0x580] sm:$0xff]  ;;  %v7938_v28 = vcombine.low %v337_v16, %v345_v17 }
  0x24   : > { %v7941_v23 = vcombine.high %v338_v18, %v346_v19  ;;  %v361_v25 = vld [vmem:[%s13070_s1 + $0x5c0] sm:$0xff]  ;;  %v354_v26 = vld [vmem:[%s13070_s1 + $0x588] sm:$0xff]  ;;  %v7940_v29 = vcombine.low %v338_v18, %v346_v19 }
  0x25   : > { %v362_v27 = vld [vmem:[%s13070_s1 + $0x5c8] sm:$0xff]  ;;  %v7955_v30 = vcombine.high %v353_v24, %v361_v25  ;;  %v369_v32 = vld [vmem:[%s13070_s1 + $0x600] sm:$0xff]  ;;  %v7954_v36 = vcombine.low %v353_v24, %v361_v25 }
  0x26   : > { %3260 = vmatpush1.bf16.msra.mxu0 %v7858_v50  ;;  %3342 = vmatpush1.bf16.msra.mxu1 %v7860_v51  ;;  %v7957_v31 = vcombine.high %v354_v26, %v362_v27  ;;  %v377_v33 = vld [vmem:[%s13070_s1 + $0x640] sm:$0xff]  ;;  %v370_v34 = vld [vmem:[%s13070_s1 + $0x608] sm:$0xff]  ;;  %v7956_v37 = vcombine.low %v354_v26, %v362_v27 }
  0x27   : > { %3261 = vmatprep.subr.bf16.mxu0 %v7875_v52  ;;  %3343 = vmatprep.subr.bf16.mxu1 %v7877_v54  ;;  %v378_v35 = vld [vmem:[%s13070_s1 + $0x648] sm:$0xff]  ;;  %v7971_v38 = vcombine.high %v369_v32, %v377_v33  ;;  %v385_v40 = vld [vmem:[%s13070_s1 + $0x680] sm:$0xff]  ;;  %v7970_v44 = vcombine.low %v369_v32, %v377_v33 }
  0x28   : > { %v7973_v39 = vcombine.high %v370_v34, %v378_v35  ;;  %v393_v41 = vld [vmem:[%s13070_s1 + $0x6c0] sm:$0xff]  ;;  %v386_v42 = vld [vmem:[%s13070_s1 + $0x688] sm:$0xff]  ;;  %v7972_v45 = vcombine.low %v370_v34, %v378_v35 }
  0x29   : > { %v394_v43 = vld [vmem:[%s13070_s1 + $0x6c8] sm:$0xff]  ;;  %v7987_v46 = vcombine.high %v385_v40, %v393_v41  ;;  %v401_v48 = vld [vmem:[%s13070_s1 + $0x700] sm:$0xff]  ;;  %v7986_v52 = vcombine.low %v385_v40, %v393_v41 }
  0x2a   : > { %3262 = vmatpush1.bf16.msra.mxu0 %v7874_v60  ;;  %3344 = vmatpush1.bf16.msra.mxu1 %v7876_v61  ;;  %v7989_v47 = vcombine.high %v386_v42, %v394_v43  ;;  %v409_v49 = vld [vmem:[%s13070_s1 + $0x740] sm:$0xff]  ;;  %v402_v50 = vld [vmem:[%s13070_s1 + $0x708] sm:$0xff]  ;;  %v7988_v53 = vcombine.low %v386_v42, %v394_v43 }
  0x2b   : > { %3263 = vmatprep.subr.bf16.mxu0 %v7891_v62  ;;  %3345 = vmatprep.subr.bf16.mxu1 %v7893_v63  ;;  %v410_v51 = vld [vmem:[%s13070_s1 + $0x748] sm:$0xff]  ;;  %v8003_v54 = vcombine.high %v401_v48, %v409_v49  ;;  %v417_v56 = vld [vmem:[%s13070_s1 + $0x780] sm:$0xff]  ;;  %v8002_v61 = vcombine.low %v401_v48, %v409_v49 }
  0x2c   : > { %v8005_v55 = vcombine.high %v402_v50, %v410_v51  ;;  %v425_v58 = vld [vmem:[%s13070_s1 + $0x7c0] sm:$0xff]  ;;  %v418_v59 = vld [vmem:[%s13070_s1 + $0x788] sm:$0xff]  ;;  %v8004_v62 = vcombine.low %v402_v50, %v410_v51 }
  0x2d   : > { %v426_v60 = vld [vmem:[%s13070_s1 + $0x7c8] sm:$0xff]  ;;  %v8019_v63 = vcombine.high %v417_v56, %v425_v58  ;;  %v433_v1 = vld [vmem:[%s13070_s1 + $0x800] sm:$0xff] }
  0x2e   : > { %3264 = vmatpush1.bf16.msra.mxu0 %v7890_v4  ;;  %3346 = vmatpush1.bf16.msra.mxu1 %v7892_v5  ;;  %v8021_v0 = vcombine.high %v418_v59, %v426_v60  ;;  %v441_v2 = vld [vmem:[%s13070_s1 + $0x840] sm:$0xff]  ;;  %v434_v3 = vld [vmem:[%s13070_s1 + $0x808] sm:$0xff]  ;;  %v8018_v5 = vcombine.low %v417_v56, %v425_v58 }
  0x2f   : > { %3265 = vmatprep.subr.bf16.mxu0 %v7907_v6  ;;  %3347 = vmatprep.subr.bf16.mxu1 %v7909_v7  ;;  %v442_v4 = vld [vmem:[%s13070_s1 + $0x848] sm:$0xff]  ;;  %v169_v6 = vld [vmem:[%s9930_s26] sm:$0xff]  ;;  %v8020_v7 = vcombine.low %v418_v59, %v426_v60  ;;  %v8035_v8 = vcombine.high %v433_v1, %v441_v2  ;;  %v8034_v16 = vcombine.low %v433_v1, %v441_v2 }
  0x30   : > { %v8037_v9 = vcombine.high %v434_v3, %v442_v4  ;;  %v449_v10 = vld [vmem:[%s13070_s1 + $0x880] sm:$0xff]  ;;  %v8036_v17 = vcombine.low %v434_v3, %v442_v4  ;;  %v490_v32 = vld [vmem:[%s13070_s1 + $0x9c8] sm:$0xff] }
  0x31   : > { %v457_v11 = vld [vmem:[%s13070_s1 + $0x8c0] sm:$0xff]  ;;  %v506_v40 = vld [vmem:[%s13070_s1 + $0xa48] sm:$0xff] }
  0x32   : > { %3266 = vmatpush1.bf16.msra.mxu0 %v7906_v12  ;;  %3348 = vmatpush1.bf16.msra.mxu1 %v7908_v13  ;;  %v10070_v12 = vpack.c.bf16 %v169_v6, %v169_v6  ;;  %v450_v13 = vld [vmem:[%s13070_s1 + $0x888] sm:$0xff]  ;;  %v8051_v18 = vcombine.high %v449_v10, %v457_v11  ;;  %v465_v19 = vld [vmem:[%s13070_s1 + $0x900] sm:$0xff]  ;;  %v8050_v25 = vcombine.low %v449_v10, %v457_v11 }
  0x33   : > { %3267 = vmatprep.subr.bf16.mxu0 %v7923_v14  ;;  %3349 = vmatprep.subr.bf16.mxu1 %v7925_v15  ;;  %v458_v14 = vld [vmem:[%s13070_s1 + $0x8c8] sm:$0xff]  ;;  %v172_v15 = vld [vmem:[%s9930_s26 + $0x18] sm:$0xff]  ;;  %v569_v6 = vld [vmem:[%s13070_s1 + $0xc40] sm:$0xff] }
  0x34   : > { %v10091_v24 = vpack.c.bf16 %v172_v15, %v172_v15  ;;  %v8052_v26 = vcombine.low %v450_v13, %v458_v14  ;;  %v522_v48 = vld [vmem:[%s13070_s1 + $0xac8] sm:$0xff]  ;;  %v585_v15 = vld [vmem:[%s13070_s1 + $0xcc0] sm:$0xff] }
  0x35   : > { %v538_v56 = vld [vmem:[%s13070_s1 + $0xb48] sm:$0xff] }
  0x36   : > { %3268 = vmatpush1.bf16.msra.mxu0 %v7922_v20  ;;  %3350 = vmatpush1.bf16.msra.mxu1 %v7924_v21  ;;  %v473_v20 = vld [vmem:[%s13070_s1 + $0x940] sm:$0xff]  ;;  %v8053_v21 = vcombine.high %v450_v13, %v458_v14  ;;  %v554_v1 = vld [vmem:[%s13070_s1 + $0xbc8] sm:$0xff] }
  0x37   : > { %3269 = vmatprep.subr.bf16.mxu0 %v7939_v22  ;;  %3351 = vmatprep.subr.bf16.mxu1 %v7941_v23  ;;  %v466_v22 = vld [vmem:[%s13070_s1 + $0x908] sm:$0xff]  ;;  %v8067_v27 = vcombine.high %v465_v19, %v473_v20  ;;  %v8066_v33 = vcombine.low %v465_v19, %v473_v20  ;;  %v577_v14 = vld [vmem:[%s13070_s1 + $0xc80] sm:$0xff] }
  0x38   : > { %v474_v23 = vld [vmem:[%s13070_s1 + $0x948] sm:$0xff] }
  0x39   : > { %v8068_v34 = vcombine.low %v466_v22, %v474_v23 }
  0x3a   : > { %3270 = vmatpush1.bf16.msra.mxu0 %v7938_v28  ;;  %3352 = vmatpush1.bf16.msra.mxu1 %v7940_v29  ;;  %v481_v28 = vld [vmem:[%s13070_s1 + $0x980] sm:$0xff] }
  0x3b   : > { %3271 = vmatprep.subr.bf16.mxu0 %v7955_v30  ;;  %3353 = vmatprep.subr.bf16.mxu1 %v7957_v31  ;;  %v489_v29 = vld [vmem:[%s13070_s1 + $0x9c0] sm:$0xff]  ;;  %v482_v30 = vld [vmem:[%s13070_s1 + $0x988] sm:$0xff]  ;;  %v8069_v31 = vcombine.high %v466_v22, %v474_v23 }
  0x3c   : > { %v8083_v35 = vcombine.high %v481_v28, %v489_v29  ;;  %v8082_v41 = vcombine.low %v481_v28, %v489_v29  ;;  %v8084_v42 = vcombine.low %v482_v30, %v490_v32  ;;  %v593_v22 = vld [vmem:[%s13070_s1 + $0xd00] sm:$0xff]  ;;  %v8178_v28 = vcombine.low %v577_v14, %v585_v15 }
  0x3d   : > { %v601_v23 = vld [vmem:[%s13070_s1 + $0xd40] sm:$0xff] }
  0x3e   : > { %3272 = vmatpush1.bf16.msra.mxu0 %v7954_v36  ;;  %3354 = vmatpush1.bf16.msra.mxu1 %v7956_v37  ;;  %v497_v36 = vld [vmem:[%s13070_s1 + $0xa00] sm:$0xff] }
  0x3f   : > { %3273 = vmatprep.subr.bf16.mxu0 %v7971_v38  ;;  %3355 = vmatprep.subr.bf16.mxu1 %v7973_v39  ;;  %v505_v37 = vld [vmem:[%s13070_s1 + $0xa40] sm:$0xff]  ;;  %v498_v38 = vld [vmem:[%s13070_s1 + $0xa08] sm:$0xff]  ;;  %v8085_v39 = vcombine.high %v482_v30, %v490_v32  ;;  %v8195_v30 = vcombine.high %v593_v22, %v601_v23 }
  0x40   : > { %v8099_v43 = vcombine.high %v497_v36, %v505_v37  ;;  %v8098_v49 = vcombine.low %v497_v36, %v505_v37  ;;  %v8100_v50 = vcombine.low %v498_v38, %v506_v40  ;;  %v617_v32 = vld [vmem:[%s13070_s1 + $0xdc0] sm:$0xff]  ;;  %v8194_v36 = vcombine.low %v593_v22, %v601_v23  ;;  %v204_v22 = vld [vmem:[%s13070_s1 + $0xd8] sm:$0xff] }
  0x42   : > { %3274 = vmatpush1.bf16.msra.mxu0 %v7970_v44  ;;  %3356 = vmatpush1.bf16.msra.mxu1 %v7972_v45  ;;  %v513_v44 = vld [vmem:[%s13070_s1 + $0xa80] sm:$0xff] }
  0x43   : > { %3275 = vmatprep.subr.bf16.mxu0 %v7987_v46  ;;  %3357 = vmatprep.subr.bf16.mxu1 %v7989_v47  ;;  %v521_v45 = vld [vmem:[%s13070_s1 + $0xac0] sm:$0xff]  ;;  %v514_v46 = vld [vmem:[%s13070_s1 + $0xa88] sm:$0xff]  ;;  %v8101_v47 = vcombine.high %v498_v38, %v506_v40 }
  0x44   : > { %v8115_v51 = vcombine.high %v513_v44, %v521_v45  ;;  %v8114_v58 = vcombine.low %v513_v44, %v521_v45  ;;  %v8116_v59 = vcombine.low %v514_v46, %v522_v48  ;;  %v633_v40 = vld [vmem:[%s13070_s1 + $0xe40] sm:$0xff] }
  0x46   : > { %3276 = vmatpush1.bf16.msra.mxu0 %v7986_v52  ;;  %3358 = vmatpush1.bf16.msra.mxu1 %v7988_v53  ;;  %v529_v52 = vld [vmem:[%s13070_s1 + $0xb00] sm:$0xff] }
  0x47   : > { %3277 = vmatprep.subr.bf16.mxu0 %v8003_v54  ;;  %3359 = vmatprep.subr.bf16.mxu1 %v8005_v55  ;;  %v537_v53 = vld [vmem:[%s13070_s1 + $0xb40] sm:$0xff]  ;;  %v530_v54 = vld [vmem:[%s13070_s1 + $0xb08] sm:$0xff]  ;;  %v8117_v55 = vcombine.high %v514_v46, %v522_v48 }
  0x48   : > { %v8131_v60 = vcombine.high %v529_v52, %v537_v53  ;;  %v8130_v2 = vcombine.low %v529_v52, %v537_v53  ;;  %v8132_v3 = vcombine.low %v530_v54, %v538_v56  ;;  %v649_v48 = vld [vmem:[%s13070_s1 + $0xec0] sm:$0xff] }
  0x4a   : > { %3278 = vmatpush1.bf16.msra.mxu0 %v8002_v61  ;;  %3360 = vmatpush1.bf16.msra.mxu1 %v8004_v62  ;;  %v545_v61 = vld [vmem:[%s13070_s1 + $0xb80] sm:$0xff] }
  0x4b   : > { %3279 = vmatprep.subr.bf16.mxu0 %v8019_v63  ;;  %3361 = vmatprep.subr.bf16.mxu1 %v8021_v0  ;;  %v553_v62 = vld [vmem:[%s13070_s1 + $0xbc0] sm:$0xff]  ;;  %v546_v63 = vld [vmem:[%s13070_s1 + $0xb88] sm:$0xff]  ;;  %v8133_v0 = vcombine.high %v530_v54, %v538_v56 }
  0x4c   : > { %v8147_v4 = vcombine.high %v545_v61, %v553_v62  ;;  %v8146_v10 = vcombine.low %v545_v61, %v553_v62  ;;  %v8148_v11 = vcombine.low %v546_v63, %v554_v1  ;;  %v665_v56 = vld [vmem:[%s13070_s1 + $0xf40] sm:$0xff] }
  0x4e   : > { %3280 = vmatpush1.bf16.msra.mxu0 %v8018_v5  ;;  %3362 = vmatpush1.bf16.msra.mxu1 %v8020_v7  ;;  %v561_v5 = vld [vmem:[%s13070_s1 + $0xc00] sm:$0xff]  ;;  %v562_v7 = vld [vmem:[%s13070_s1 + $0xc08] sm:$0xff] }
  0x4f   : > { %3290 = vmatprep.subr.bf16.mxu0 %v8035_v8  ;;  %3372 = vmatprep.subr.bf16.mxu1 %v8037_v9  ;;  %v8149_v8 = vcombine.high %v546_v63, %v554_v1  ;;  %v570_v9 = vld [vmem:[%s13070_s1 + $0xc48] sm:$0xff]  ;;  %v8163_v13 = vcombine.high %v561_v5, %v569_v6  ;;  %v8162_v19 = vcombine.low %v561_v5, %v569_v6  ;;  %v681_v1 = vld [vmem:[%s13070_s1 + $0xfc0] sm:$0xff] }
  0x50   : > { %v8164_v20 = vcombine.low %v562_v7, %v570_v9 }
  0x51   : > { %3282 = vmatmul.mubr.bf16.vlgmr.msra.gmra.mrb[0].mxu0 %v10070_v12  ;;  %3364 = vmatmul.mubr.bf16.vlgmr.msra.gmra.mrb[0].mxu1 %v10070_v12 }
  0x52   : > { %3291 = vmatpush1.bf16.msra.mxu0 %v8034_v16  ;;  %3373 = vmatpush1.bf16.msra.mxu1 %v8036_v17  ;;  %v578_v16 = vld [vmem:[%s13070_s1 + $0xc88] sm:$0xff]  ;;  %v8165_v17 = vcombine.high %v562_v7, %v570_v9  ;;  %v187_v9 = vld [vmem:[%s13070_s1 + $0x50] sm:$0xff] }
  0x53   : > { %3292 = vmatprep.subr.bf16.mxu0 %v8051_v18  ;;  %3374 = vmatprep.subr.bf16.mxu1 %v8053_v21  ;;  %v586_v18 = vld [vmem:[%s13070_s1 + $0xcc8] sm:$0xff]  ;;  %v8179_v21 = vcombine.high %v577_v14, %v585_v15  ;;  %v188_v14 = vld [vmem:[%s13070_s1 + $0x58] sm:$0xff] }
  0x54   : > { %3322 = vmatprep.mubr.bf16.mxu0 %v10091_v24  ;;  %3404 = vmatprep.mubr.bf16.mxu1 %v10091_v24  ;;  %v8180_v29 = vcombine.low %v578_v16, %v586_v18 }
  0x56   : > { %3293 = vmatpush1.bf16.msra.mxu0 %v8050_v25  ;;  %3375 = vmatpush1.bf16.msra.mxu1 %v8052_v26  ;;  %v594_v25 = vld [vmem:[%s13070_s1 + $0xd08] sm:$0xff]  ;;  %v8181_v26 = vcombine.high %v578_v16, %v586_v18  ;;  %v195_v18 = vld [vmem:[%s13070_s1 + $0x90] sm:$0xff] }
  0x57   : > { %3294 = vmatprep.subr.bf16.mxu0 %v8067_v27  ;;  %3376 = vmatprep.subr.bf16.mxu1 %v8069_v31  ;;  %v602_v27 = vld [vmem:[%s13070_s1 + $0xd48] sm:$0xff]  ;;  %v609_v31 = vld [vmem:[%s13070_s1 + $0xd80] sm:$0xff] }
  0x58   : > { %v8196_v37 = vcombine.low %v594_v25, %v602_v27  ;;  %v8211_v38 = vcombine.high %v609_v31, %v617_v32  ;;  %v8210_v44 = vcombine.low %v609_v31, %v617_v32  ;;  %v220_v32 = vld [vmem:[%s13070_s1 + $0x158] sm:$0xff] }
  0x5a   : > { %3295 = vmatpush1.bf16.msra.mxu0 %v8066_v33  ;;  %3377 = vmatpush1.bf16.msra.mxu1 %v8068_v34  ;;  %v610_v33 = vld [vmem:[%s13070_s1 + $0xd88] sm:$0xff]  ;;  %v8197_v34 = vcombine.high %v594_v25, %v602_v27 }
  0x5b   : > { %3296 = vmatprep.subr.bf16.mxu0 %v8083_v35  ;;  %3378 = vmatprep.subr.bf16.mxu1 %v8085_v39  ;;  %v618_v35 = vld [vmem:[%s13070_s1 + $0xdc8] sm:$0xff]  ;;  %v625_v39 = vld [vmem:[%s13070_s1 + $0xe00] sm:$0xff] }
  0x5c   : > { %v8212_v45 = vcombine.low %v610_v33, %v618_v35  ;;  %v8227_v46 = vcombine.high %v625_v39, %v633_v40  ;;  %v8226_v52 = vcombine.low %v625_v39, %v633_v40  ;;  %v236_v40 = vld [vmem:[%s13070_s1 + $0x1d8] sm:$0xff] }
  0x5e   : > { %3297 = vmatpush1.bf16.msra.mxu0 %v8082_v41  ;;  %3379 = vmatpush1.bf16.msra.mxu1 %v8084_v42  ;;  %v626_v41 = vld [vmem:[%s13070_s1 + $0xe08] sm:$0xff]  ;;  %v8213_v42 = vcombine.high %v610_v33, %v618_v35 }
  0x5f   : > { %3298 = vmatprep.subr.bf16.mxu0 %v8099_v43  ;;  %3380 = vmatprep.subr.bf16.mxu1 %v8101_v47  ;;  %v634_v43 = vld [vmem:[%s13070_s1 + $0xe48] sm:$0xff]  ;;  %v641_v47 = vld [vmem:[%s13070_s1 + $0xe80] sm:$0xff] }
  0x60   : > { %v8228_v53 = vcombine.low %v626_v41, %v634_v43  ;;  %v8243_v54 = vcombine.high %v641_v47, %v649_v48  ;;  %v8242_v61 = vcombine.low %v641_v47, %v649_v48  ;;  %v252_v48 = vld [vmem:[%s13070_s1 + $0x258] sm:$0xff] }
  0x62   : > { %3299 = vmatpush1.bf16.msra.mxu0 %v8098_v49  ;;  %3381 = vmatpush1.bf16.msra.mxu1 %v8100_v50  ;;  %v642_v49 = vld [vmem:[%s13070_s1 + $0xe88] sm:$0xff]  ;;  %v8229_v50 = vcombine.high %v626_v41, %v634_v43 }
  0x63   : > { %3300 = vmatprep.subr.bf16.mxu0 %v8115_v51  ;;  %3382 = vmatprep.subr.bf16.mxu1 %v8117_v55  ;;  %v650_v51 = vld [vmem:[%s13070_s1 + $0xec8] sm:$0xff]  ;;  %v657_v55 = vld [vmem:[%s13070_s1 + $0xf00] sm:$0xff] }
  0x64   : > { %v8244_v62 = vcombine.low %v642_v49, %v650_v51  ;;  %v8259_v63 = vcombine.high %v657_v55, %v665_v56  ;;  %v8258_v5 = vcombine.low %v657_v55, %v665_v56  ;;  %v268_v56 = vld [vmem:[%s13070_s1 + $0x2d8] sm:$0xff] }
  0x66   : > { %3301 = vmatpush1.bf16.msra.mxu0 %v8114_v58  ;;  %3383 = vmatpush1.bf16.msra.mxu1 %v8116_v59  ;;  %v658_v58 = vld [vmem:[%s13070_s1 + $0xf08] sm:$0xff]  ;;  %v8245_v59 = vcombine.high %v642_v49, %v650_v51 }
  0x67   : > { %3302 = vmatprep.subr.bf16.mxu0 %v8131_v60  ;;  %3384 = vmatprep.subr.bf16.mxu1 %v8133_v0  ;;  %v666_v60 = vld [vmem:[%s13070_s1 + $0xf48] sm:$0xff]  ;;  %v673_v0 = vld [vmem:[%s13070_s1 + $0xf80] sm:$0xff] }
  0x68   : > { %v8260_v6 = vcombine.low %v658_v58, %v666_v60  ;;  %v8275_v7 = vcombine.high %v673_v0, %v681_v1  ;;  %v8274_v15 = vcombine.low %v673_v0, %v681_v1  ;;  %v284_v1 = vld [vmem:[%s13070_s1 + $0x358] sm:$0xff] }
  0x6a   : > { %3303 = vmatpush1.bf16.msra.mxu0 %v8130_v2  ;;  %3385 = vmatpush1.bf16.msra.mxu1 %v8132_v3  ;;  %v674_v2 = vld [vmem:[%s13070_s1 + $0xf88] sm:$0xff]  ;;  %v8261_v3 = vcombine.high %v658_v58, %v666_v60 }
  0x6b   : > { %3304 = vmatprep.subr.bf16.mxu0 %v8147_v4  ;;  %3386 = vmatprep.subr.bf16.mxu1 %v8149_v8  ;;  %v682_v4 = vld [vmem:[%s13070_s1 + $0xfc8] sm:$0xff]  ;;  %v179_v8 = vld [vmem:[%s13070_s1 + $0x10] sm:$0xff] }
  0x6c   : > { %v8276_v16 = vcombine.low %v674_v2, %v682_v4  ;;  %v7782_v25 = vcombine.low %v179_v8, %v187_v9 }
  0x6e   : > { %3305 = vmatpush1.bf16.msra.mxu0 %v8146_v10  ;;  %3387 = vmatpush1.bf16.msra.mxu1 %v8148_v11  ;;  %v180_v10 = vld [vmem:[%s13070_s1 + $0x18] sm:$0xff]  ;;  %v8277_v11 = vcombine.high %v674_v2, %v682_v4 }
  0x6f   : > { %3306 = vmatprep.subr.bf16.mxu0 %v8163_v13  ;;  %3388 = vmatprep.subr.bf16.mxu1 %v8165_v17  ;;  %v171_v13 = vld [vmem:[%s9930_s26 + $0x10] sm:$0xff]  ;;  %v7783_v17 = vcombine.high %v179_v8, %v187_v9  ;;  %v300_v9 = vld [vmem:[%s13070_s1 + $0x3d8] sm:$0xff] }
  0x70   : > { %v10278_v23 = vpack.c.bf16 %v171_v13, %v171_v13 }
  0x72   : > { %3307 = vmatpush1.bf16.msra.mxu0 %v8162_v19  ;;  %3389 = vmatpush1.bf16.msra.mxu1 %v8164_v20  ;;  %v203_v19 = vld [vmem:[%s13070_s1 + $0xd0] sm:$0xff]  ;;  %v196_v20 = vld [vmem:[%s13070_s1 + $0x98] sm:$0xff] }
  0x73   : > { %3308 = vmatprep.subr.bf16.mxu0 %v8179_v21  ;;  %3390 = vmatprep.subr.bf16.mxu1 %v8181_v26  ;;  %v7785_v21 = vcombine.high %v180_v10, %v188_v14  ;;  %v7784_v26 = vcombine.low %v180_v10, %v188_v14  ;;  %v7799_v27 = vcombine.high %v195_v18, %v203_v19  ;;  %v307_v14 = vld [vmem:[%s13070_s1 + $0x410] sm:$0xff] }
  0x74   : > { %v7801_v31 = vcombine.high %v196_v20, %v204_v22  ;;  %v7798_v33 = vcombine.low %v195_v18, %v203_v19  ;;  %v316_v18 = vld [vmem:[%s13070_s1 + $0x458] sm:$0xff] }
  0x76   : > { %3309 = vmatpush1.bf16.msra.mxu0 %v8178_v28  ;;  %3391 = vmatpush1.bf16.msra.mxu1 %v8180_v29  ;;  %v211_v28 = vld [vmem:[%s13070_s1 + $0x110] sm:$0xff] }
  0x77   : > { %3310 = vmatprep.subr.bf16.mxu0 %v8195_v30  ;;  %3392 = vmatprep.subr.bf16.mxu1 %v8197_v34  ;;  %v219_v29 = vld [vmem:[%s13070_s1 + $0x150] sm:$0xff]  ;;  %v212_v30 = vld [vmem:[%s13070_s1 + $0x118] sm:$0xff]  ;;  %v7800_v34 = vcombine.low %v196_v20, %v204_v22 }
  0x78   : > { %v7815_v35 = vcombine.high %v211_v28, %v219_v29  ;;  %v7817_v39 = vcombine.high %v212_v30, %v220_v32  ;;  %v7814_v41 = vcombine.low %v211_v28, %v219_v29  ;;  %v323_v22 = vld [vmem:[%s13070_s1 + $0x490] sm:$0xff]  ;;  %v332_v28 = vld [vmem:[%s13070_s1 + $0x4d8] sm:$0xff] }
  0x7a   : > { %3311 = vmatpush1.bf16.msra.mxu0 %v8194_v36  ;;  %3393 = vmatpush1.bf16.msra.mxu1 %v8196_v37  ;;  %v227_v36 = vld [vmem:[%s13070_s1 + $0x190] sm:$0xff] }
  0x7b   : > { %3312 = vmatprep.subr.bf16.mxu0 %v8211_v38  ;;  %3394 = vmatprep.subr.bf16.mxu1 %v8213_v42  ;;  %v235_v37 = vld [vmem:[%s13070_s1 + $0x1d0] sm:$0xff]  ;;  %v228_v38 = vld [vmem:[%s13070_s1 + $0x198] sm:$0xff]  ;;  %v7816_v42 = vcombine.low %v212_v30, %v220_v32 }
  0x7c   : > { %v7831_v43 = vcombine.high %v227_v36, %v235_v37  ;;  %v7833_v47 = vcombine.high %v228_v38, %v236_v40  ;;  %v7830_v49 = vcombine.low %v227_v36, %v235_v37  ;;  %v339_v32 = vld [vmem:[%s13070_s1 + $0x510] sm:$0xff]  ;;  %v348_v36 = vld [vmem:[%s13070_s1 + $0x558] sm:$0xff] }
  0x7e   : > { %3313 = vmatpush1.bf16.msra.mxu0 %v8210_v44  ;;  %3395 = vmatpush1.bf16.msra.mxu1 %v8212_v45  ;;  %v243_v44 = vld [vmem:[%s13070_s1 + $0x210] sm:$0xff] }
  0x7f   : > { %3314 = vmatprep.subr.bf16.mxu0 %v8227_v46  ;;  %3396 = vmatprep.subr.bf16.mxu1 %v8229_v50  ;;  %v251_v45 = vld [vmem:[%s13070_s1 + $0x250] sm:$0xff]  ;;  %v244_v46 = vld [vmem:[%s13070_s1 + $0x218] sm:$0xff]  ;;  %v7832_v50 = vcombine.low %v228_v38, %v236_v40 }
  0x80   : > { %v7847_v51 = vcombine.high %v243_v44, %v251_v45  ;;  %v7849_v55 = vcombine.high %v244_v46, %v252_v48  ;;  %v7846_v58 = vcombine.low %v243_v44, %v251_v45  ;;  %v355_v40 = vld [vmem:[%s13070_s1 + $0x590] sm:$0xff]  ;;  %v364_v44 = vld [vmem:[%s13070_s1 + $0x5d8] sm:$0xff] }
  0x82   : > { %3315 = vmatpush1.bf16.msra.mxu0 %v8226_v52  ;;  %3397 = vmatpush1.bf16.msra.mxu1 %v8228_v53  ;;  %v259_v52 = vld [vmem:[%s13070_s1 + $0x290] sm:$0xff] }
  0x83   : > { %3316 = vmatprep.subr.bf16.mxu0 %v8243_v54  ;;  %3398 = vmatprep.subr.bf16.mxu1 %v8245_v59  ;;  %v267_v53 = vld [vmem:[%s13070_s1 + $0x2d0] sm:$0xff]  ;;  %v260_v54 = vld [vmem:[%s13070_s1 + $0x298] sm:$0xff]  ;;  %v7848_v59 = vcombine.low %v244_v46, %v252_v48 }
  0x84   : > { %v7863_v60 = vcombine.high %v259_v52, %v267_v53  ;;  %v7865_v0 = vcombine.high %v260_v54, %v268_v56  ;;  %v7862_v2 = vcombine.low %v259_v52, %v267_v53  ;;  %v371_v48 = vld [vmem:[%s13070_s1 + $0x610] sm:$0xff]  ;;  %v380_v52 = vld [vmem:[%s13070_s1 + $0x658] sm:$0xff] }
  0x86   : > { %3317 = vmatpush1.bf16.msra.mxu0 %v8242_v61  ;;  %3399 = vmatpush1.bf16.msra.mxu1 %v8244_v62  ;;  %v275_v61 = vld [vmem:[%s13070_s1 + $0x310] sm:$0xff] }
  0x87   : > { %3318 = vmatprep.subr.bf16.mxu0 %v8259_v63  ;;  %3400 = vmatprep.subr.bf16.mxu1 %v8261_v3  ;;  %v283_v62 = vld [vmem:[%s13070_s1 + $0x350] sm:$0xff]  ;;  %v276_v63 = vld [vmem:[%s13070_s1 + $0x318] sm:$0xff]  ;;  %v7864_v3 = vcombine.low %v260_v54, %v268_v56 }
  0x88   : > { %v7879_v4 = vcombine.high %v275_v61, %v283_v62  ;;  %v7881_v8 = vcombine.high %v276_v63, %v284_v1  ;;  %v7878_v10 = vcombine.low %v275_v61, %v283_v62  ;;  %v387_v56 = vld [vmem:[%s13070_s1 + $0x690] sm:$0xff]  ;;  %v396_v61 = vld [vmem:[%s13070_s1 + $0x6d8] sm:$0xff] }
  0x8a   : > { %3319 = vmatpush1.bf16.msra.mxu0 %v8258_v5  ;;  %3401 = vmatpush1.bf16.msra.mxu1 %v8260_v6  ;;  %v291_v5 = vld [vmem:[%s13070_s1 + $0x390] sm:$0xff] }
  0x8b   : > { %3320 = vmatprep.subr.bf16.mxu0 %v8275_v7  ;;  %3402 = vmatprep.subr.bf16.mxu1 %v8277_v11  ;;  %v299_v6 = vld [vmem:[%s13070_s1 + $0x3d0] sm:$0xff]  ;;  %v292_v7 = vld [vmem:[%s13070_s1 + $0x398] sm:$0xff]  ;;  %v7880_v11 = vcombine.low %v276_v63, %v284_v1 }
  0x8c   : > { %v7895_v13 = vcombine.high %v291_v5, %v299_v6  ;;  %v7894_v19 = vcombine.low %v291_v5, %v299_v6  ;;  %v7896_v20 = vcombine.low %v292_v7, %v300_v9  ;;  %v403_v1 = vld [vmem:[%s13070_s1 + $0x710] sm:$0xff]  ;;  %v412_v5 = vld [vmem:[%s13070_s1 + $0x758] sm:$0xff] }
  0x8e   : > { %3321 = vmatpush1.bf16.msra.mxu0 %v8274_v15  ;;  %3403 = vmatpush1.bf16.msra.mxu1 %v8276_v16  ;;  %v315_v15 = vld [vmem:[%s13070_s1 + $0x450] sm:$0xff]  ;;  %v308_v16 = vld [vmem:[%s13070_s1 + $0x418] sm:$0xff] }
  0x8f   : > { %3413 = vmatprep.subr.bf16.mxu0 %v7783_v17  ;;  %3495 = vmatprep.subr.bf16.mxu1 %v7785_v21  ;;  %v7897_v17 = vcombine.high %v292_v7, %v300_v9  ;;  %v7911_v21 = vcombine.high %v307_v14, %v315_v15  ;;  %v7910_v29 = vcombine.low %v307_v14, %v315_v15  ;;  %v419_v9 = vld [vmem:[%s13070_s1 + $0x790] sm:$0xff]  ;;  %v428_v14 = vld [vmem:[%s13070_s1 + $0x7d8] sm:$0xff] }
  0x90   : > { %v7912_v30 = vcombine.low %v308_v16, %v316_v18 }
  0x91   : > { %3323 = vmatmul.mubr.bf16.vlgmr.msra.gmra.mrb[0].mxu0 %v10278_v23  ;;  %3405 = vmatmul.mubr.bf16.vlgmr.msra.gmra.mrb[0].mxu1 %v10278_v23 }
  0x92   : > { %3414 = vmatpush1.bf16.msra.mxu0 %v7782_v25  ;;  %3496 = vmatpush1.bf16.msra.mxu1 %v7784_v26  ;;  %v331_v25 = vld [vmem:[%s13070_s1 + $0x4d0] sm:$0xff]  ;;  %v324_v26 = vld [vmem:[%s13070_s1 + $0x498] sm:$0xff] }
  0x93   : > { %3415 = vmatprep.subr.bf16.mxu0 %v7799_v27  ;;  %3497 = vmatprep.subr.bf16.mxu1 %v7801_v31  ;;  %v7913_v27 = vcombine.high %v308_v16, %v316_v18  ;;  %v7927_v31 = vcombine.high %v323_v22, %v331_v25  ;;  %v7926_v37 = vcombine.low %v323_v22, %v331_v25  ;;  %v435_v18 = vld [vmem:[%s13070_s1 + $0x810] sm:$0xff]  ;;  %v444_v22 = vld [vmem:[%s13070_s1 + $0x858] sm:$0xff] }
  0x94   : > { %3445 = vmatprep.mubr.bf16.mxu0 %v9945_v57  ;;  %3527 = vmatprep.mubr.bf16.mxu1 %v9945_v57  ;;  %v7928_v38 = vcombine.low %v324_v26, %v332_v28 }
  0x96   : > { %3416 = vmatpush1.bf16.msra.mxu0 %v7798_v33  ;;  %3498 = vmatpush1.bf16.msra.mxu1 %v7800_v34  ;;  %v347_v33 = vld [vmem:[%s13070_s1 + $0x550] sm:$0xff]  ;;  %v340_v34 = vld [vmem:[%s13070_s1 + $0x518] sm:$0xff] }
  0x97   : > { %3417 = vmatprep.subr.bf16.mxu0 %v7815_v35  ;;  %3499 = vmatprep.subr.bf16.mxu1 %v7817_v39  ;;  %v7929_v35 = vcombine.high %v324_v26, %v332_v28  ;;  %v7943_v39 = vcombine.high %v339_v32, %v347_v33  ;;  %v7942_v45 = vcombine.low %v339_v32, %v347_v33  ;;  %v451_v28 = vld [vmem:[%s13070_s1 + $0x890] sm:$0xff]  ;;  %v460_v32 = vld [vmem:[%s13070_s1 + $0x8d8] sm:$0xff] }
  0x98   : > { %v7944_v46 = vcombine.low %v340_v34, %v348_v36 }
  0x9a   : > { %3418 = vmatpush1.bf16.msra.mxu0 %v7814_v41  ;;  %3500 = vmatpush1.bf16.msra.mxu1 %v7816_v42  ;;  %v363_v41 = vld [vmem:[%s13070_s1 + $0x5d0] sm:$0xff]  ;;  %v356_v42 = vld [vmem:[%s13070_s1 + $0x598] sm:$0xff] }
  0x9b   : > { %3419 = vmatprep.subr.bf16.mxu0 %v7831_v43  ;;  %3501 = vmatprep.subr.bf16.mxu1 %v7833_v47  ;;  %v7945_v43 = vcombine.high %v340_v34, %v348_v36  ;;  %v7959_v47 = vcombine.high %v355_v40, %v363_v41  ;;  %v7958_v53 = vcombine.low %v355_v40, %v363_v41  ;;  %v467_v36 = vld [vmem:[%s13070_s1 + $0x910] sm:$0xff]  ;;  %v476_v40 = vld [vmem:[%s13070_s1 + $0x958] sm:$0xff] }
  0x9c   : > { %v7960_v54 = vcombine.low %v356_v42, %v364_v44 }
  0x9e   : > { %3420 = vmatpush1.bf16.msra.mxu0 %v7830_v49  ;;  %3502 = vmatpush1.bf16.msra.mxu1 %v7832_v50  ;;  %v379_v49 = vld [vmem:[%s13070_s1 + $0x650] sm:$0xff]  ;;  %v372_v50 = vld [vmem:[%s13070_s1 + $0x618] sm:$0xff] }
  0x9f   : > { %3421 = vmatprep.subr.bf16.mxu0 %v7847_v51  ;;  %3503 = vmatprep.subr.bf16.mxu1 %v7849_v55  ;;  %v7961_v51 = vcombine.high %v356_v42, %v364_v44  ;;  %v7975_v55 = vcombine.high %v371_v48, %v379_v49  ;;  %v7974_v62 = vcombine.low %v371_v48, %v379_v49  ;;  %v483_v44 = vld [vmem:[%s13070_s1 + $0x990] sm:$0xff]  ;;  %v492_v48 = vld [vmem:[%s13070_s1 + $0x9d8] sm:$0xff] }
  0xa0   : > { %v7976_v63 = vcombine.low %v372_v50, %v380_v52 }
  0xa2   : > { %3422 = vmatpush1.bf16.msra.mxu0 %v7846_v58  ;;  %3504 = vmatpush1.bf16.msra.mxu1 %v7848_v59  ;;  %v395_v58 = vld [vmem:[%s13070_s1 + $0x6d0] sm:$0xff]  ;;  %v388_v59 = vld [vmem:[%s13070_s1 + $0x698] sm:$0xff] }
  0xa3   : > { %3423 = vmatprep.subr.bf16.mxu0 %v7863_v60  ;;  %3505 = vmatprep.subr.bf16.mxu1 %v7865_v0  ;;  %v7977_v60 = vcombine.high %v372_v50, %v380_v52  ;;  %v7991_v0 = vcombine.high %v387_v56, %v395_v58  ;;  %v7990_v6 = vcombine.low %v387_v56, %v395_v58  ;;  %v499_v52 = vld [vmem:[%s13070_s1 + $0xa10] sm:$0xff]  ;;  %v508_v56 = vld [vmem:[%s13070_s1 + $0xa58] sm:$0xff] }
  0xa4   : > { %v7992_v7 = vcombine.low %v388_v59, %v396_v61 }
  0xa6   : > { %3424 = vmatpush1.bf16.msra.mxu0 %v7862_v2  ;;  %3506 = vmatpush1.bf16.msra.mxu1 %v7864_v3  ;;  %v411_v2 = vld [vmem:[%s13070_s1 + $0x750] sm:$0xff]  ;;  %v404_v3 = vld [vmem:[%s13070_s1 + $0x718] sm:$0xff] }
  0xa7   : > { %3425 = vmatprep.subr.bf16.mxu0 %v7879_v4  ;;  %3507 = vmatprep.subr.bf16.mxu1 %v7881_v8  ;;  %v7993_v4 = vcombine.high %v388_v59, %v396_v61  ;;  %v8007_v8 = vcombine.high %v403_v1, %v411_v2  ;;  %v8006_v15 = vcombine.low %v403_v1, %v411_v2  ;;  %v515_v61 = vld [vmem:[%s13070_s1 + $0xa90] sm:$0xff]  ;;  %v524_v1 = vld [vmem:[%s13070_s1 + $0xad8] sm:$0xff] }
  0xa8   : > { %v8008_v16 = vcombine.low %v404_v3, %v412_v5 }
  0xaa   : > { %3426 = vmatpush1.bf16.msra.mxu0 %v7878_v10  ;;  %3508 = vmatpush1.bf16.msra.mxu1 %v7880_v11  ;;  %v427_v10 = vld [vmem:[%s13070_s1 + $0x7d0] sm:$0xff]  ;;  %v420_v11 = vld [vmem:[%s13070_s1 + $0x798] sm:$0xff] }
  0xab   : > { %3427 = vmatprep.subr.bf16.mxu0 %v7895_v13  ;;  %3509 = vmatprep.subr.bf16.mxu1 %v7897_v17  ;;  %v8009_v13 = vcombine.high %v404_v3, %v412_v5  ;;  %v8023_v17 = vcombine.high %v419_v9, %v427_v10  ;;  %v8022_v25 = vcombine.low %v419_v9, %v427_v10  ;;  %v531_v5 = vld [vmem:[%s13070_s1 + $0xb10] sm:$0xff]  ;;  %v540_v9 = vld [vmem:[%s13070_s1 + $0xb58] sm:$0xff] }
  0xac   : > { %v8024_v26 = vcombine.low %v420_v11, %v428_v14 }
  0xae   : > { %3428 = vmatpush1.bf16.msra.mxu0 %v7894_v19  ;;  %3510 = vmatpush1.bf16.msra.mxu1 %v7896_v20  ;;  %v443_v19 = vld [vmem:[%s13070_s1 + $0x850] sm:$0xff]  ;;  %v436_v20 = vld [vmem:[%s13070_s1 + $0x818] sm:$0xff] }
  0xaf   : > { %3429 = vmatprep.subr.bf16.mxu0 %v7911_v21  ;;  %3511 = vmatprep.subr.bf16.mxu1 %v7913_v27  ;;  %v8025_v21 = vcombine.high %v420_v11, %v428_v14  ;;  %v8039_v27 = vcombine.high %v435_v18, %v443_v19  ;;  %v8038_v33 = vcombine.low %v435_v18, %v443_v19  ;;  %v547_v14 = vld [vmem:[%s13070_s1 + $0xb90] sm:$0xff]  ;;  %v556_v18 = vld [vmem:[%s13070_s1 + $0xbd8] sm:$0xff] }
  0xb0   : > { %v8040_v34 = vcombine.low %v436_v20, %v444_v22 }
  0xb2   : > { %3430 = vmatpush1.bf16.msra.mxu0 %v7910_v29  ;;  %3512 = vmatpush1.bf16.msra.mxu1 %v7912_v30  ;;  %v459_v29 = vld [vmem:[%s13070_s1 + $0x8d0] sm:$0xff]  ;;  %v452_v30 = vld [vmem:[%s13070_s1 + $0x898] sm:$0xff] }
  0xb3   : > { %3431 = vmatprep.subr.bf16.mxu0 %v7927_v31  ;;  %3513 = vmatprep.subr.bf16.mxu1 %v7929_v35  ;;  %v8041_v31 = vcombine.high %v436_v20, %v444_v22  ;;  %v8055_v35 = vcombine.high %v451_v28, %v459_v29  ;;  %v8054_v41 = vcombine.low %v451_v28, %v459_v29  ;;  %v563_v22 = vld [vmem:[%s13070_s1 + $0xc10] sm:$0xff]  ;;  %v572_v28 = vld [vmem:[%s13070_s1 + $0xc58] sm:$0xff] }
  0xb4   : > { %v8056_v42 = vcombine.low %v452_v30, %v460_v32 }
  0xb6   : > { %3432 = vmatpush1.bf16.msra.mxu0 %v7926_v37  ;;  %3514 = vmatpush1.bf16.msra.mxu1 %v7928_v38  ;;  %v475_v37 = vld [vmem:[%s13070_s1 + $0x950] sm:$0xff]  ;;  %v468_v38 = vld [vmem:[%s13070_s1 + $0x918] sm:$0xff] }
  0xb7   : > { %3433 = vmatprep.subr.bf16.mxu0 %v7943_v39  ;;  %3515 = vmatprep.subr.bf16.mxu1 %v7945_v43  ;;  %v8057_v39 = vcombine.high %v452_v30, %v460_v32  ;;  %v8071_v43 = vcombine.high %v467_v36, %v475_v37  ;;  %v8070_v49 = vcombine.low %v467_v36, %v475_v37  ;;  %v579_v32 = vld [vmem:[%s13070_s1 + $0xc90] sm:$0xff]  ;;  %v588_v36 = vld [vmem:[%s13070_s1 + $0xcd8] sm:$0xff] }
  0xb8   : > { %v8072_v50 = vcombine.low %v468_v38, %v476_v40 }
  0xba   : > { %3434 = vmatpush1.bf16.msra.mxu0 %v7942_v45  ;;  %3516 = vmatpush1.bf16.msra.mxu1 %v7944_v46  ;;  %v491_v45 = vld [vmem:[%s13070_s1 + $0x9d0] sm:$0xff]  ;;  %v484_v46 = vld [vmem:[%s13070_s1 + $0x998] sm:$0xff] }
  0xbb   : > { %3435 = vmatprep.subr.bf16.mxu0 %v7959_v47  ;;  %3517 = vmatprep.subr.bf16.mxu1 %v7961_v51  ;;  %v8073_v47 = vcombine.high %v468_v38, %v476_v40  ;;  %v8087_v51 = vcombine.high %v483_v44, %v491_v45  ;;  %v8086_v58 = vcombine.low %v483_v44, %v491_v45  ;;  %v595_v40 = vld [vmem:[%s13070_s1 + $0xd10] sm:$0xff]  ;;  %v604_v44 = vld [vmem:[%s13070_s1 + $0xd58] sm:$0xff] }
  0xbc   : > { %v8088_v59 = vcombine.low %v484_v46, %v492_v48 }
  0xbe   : > { %3436 = vmatpush1.bf16.msra.mxu0 %v7958_v53  ;;  %3518 = vmatpush1.bf16.msra.mxu1 %v7960_v54  ;;  %v507_v53 = vld [vmem:[%s13070_s1 + $0xa50] sm:$0xff]  ;;  %v500_v54 = vld [vmem:[%s13070_s1 + $0xa18] sm:$0xff] }
  0xbf   : > { %3437 = vmatprep.subr.bf16.mxu0 %v7975_v55  ;;  %3519 = vmatprep.subr.bf16.mxu1 %v7977_v60  ;;  %v8089_v55 = vcombine.high %v484_v46, %v492_v48  ;;  %v8103_v60 = vcombine.high %v499_v52, %v507_v53  ;;  %v8102_v2 = vcombine.low %v499_v52, %v507_v53  ;;  %v611_v48 = vld [vmem:[%s13070_s1 + $0xd90] sm:$0xff]  ;;  %v620_v52 = vld [vmem:[%s13070_s1 + $0xdd8] sm:$0xff] }
  0xc0   : > { %v8104_v3 = vcombine.low %v500_v54, %v508_v56 }
  0xc2   : > { %3438 = vmatpush1.bf16.msra.mxu0 %v7974_v62  ;;  %3520 = vmatpush1.bf16.msra.mxu1 %v7976_v63  ;;  %v523_v62 = vld [vmem:[%s13070_s1 + $0xad0] sm:$0xff]  ;;  %v516_v63 = vld [vmem:[%s13070_s1 + $0xa98] sm:$0xff] }
  0xc3   : > { %3439 = vmatprep.subr.bf16.mxu0 %v7991_v0  ;;  %3521 = vmatprep.subr.bf16.mxu1 %v7993_v4  ;;  %v8105_v0 = vcombine.high %v500_v54, %v508_v56  ;;  %v8119_v4 = vcombine.high %v515_v61, %v523_v62  ;;  %v8118_v10 = vcombine.low %v515_v61, %v523_v62  ;;  %v627_v56 = vld [vmem:[%s13070_s1 + $0xe10] sm:$0xff]  ;;  %v636_v61 = vld [vmem:[%s13070_s1 + $0xe58] sm:$0xff] }
  0xc4   : > { %v8120_v11 = vcombine.low %v516_v63, %v524_v1 }
  0xc6   : > { %3440 = vmatpush1.bf16.msra.mxu0 %v7990_v6  ;;  %3522 = vmatpush1.bf16.msra.mxu1 %v7992_v7  ;;  %v539_v6 = vld [vmem:[%s13070_s1 + $0xb50] sm:$0xff]  ;;  %v532_v7 = vld [vmem:[%s13070_s1 + $0xb18] sm:$0xff] }
  0xc7   : > { %3441 = vmatprep.subr.bf16.mxu0 %v8007_v8  ;;  %3523 = vmatprep.subr.bf16.mxu1 %v8009_v13  ;;  %v8121_v8 = vcombine.high %v516_v63, %v524_v1  ;;  %v8135_v13 = vcombine.high %v531_v5, %v539_v6  ;;  %v8134_v19 = vcombine.low %v531_v5, %v539_v6  ;;  %v643_v1 = vld [vmem:[%s13070_s1 + $0xe90] sm:$0xff]  ;;  %v652_v5 = vld [vmem:[%s13070_s1 + $0xed8] sm:$0xff] }
  0xc8   : > { %v8136_v20 = vcombine.low %v532_v7, %v540_v9 }
  0xca   : > { %3442 = vmatpush1.bf16.msra.mxu0 %v8006_v15  ;;  %3524 = vmatpush1.bf16.msra.mxu1 %v8008_v16  ;;  %v555_v15 = vld [vmem:[%s13070_s1 + $0xbd0] sm:$0xff]  ;;  %v548_v16 = vld [vmem:[%s13070_s1 + $0xb98] sm:$0xff] }
  0xcb   : > { %3443 = vmatprep.subr.bf16.mxu0 %v8023_v17  ;;  %3525 = vmatprep.subr.bf16.mxu1 %v8025_v21  ;;  %v8137_v17 = vcombine.high %v532_v7, %v540_v9  ;;  %v8151_v21 = vcombine.high %v547_v14, %v555_v15  ;;  %v8150_v29 = vcombine.low %v547_v14, %v555_v15  ;;  %v659_v9 = vld [vmem:[%s13070_s1 + $0xf10] sm:$0xff]  ;;  %v668_v14 = vld [vmem:[%s13070_s1 + $0xf58] sm:$0xff] }
  0xcc   : > { %v8152_v30 = vcombine.low %v548_v16, %v556_v18 }
  0xce   : > { %3444 = vmatpush1.bf16.msra.mxu0 %v8022_v25  ;;  %3526 = vmatpush1.bf16.msra.mxu1 %v8024_v26  ;;  %v571_v25 = vld [vmem:[%s13070_s1 + $0xc50] sm:$0xff]  ;;  %v564_v26 = vld [vmem:[%s13070_s1 + $0xc18] sm:$0xff] }
  0xcf   : > { %3454 = vmatprep.subr.bf16.mxu0 %v8039_v27  ;;  %3536 = vmatprep.subr.bf16.mxu1 %v8041_v31  ;;  %v8153_v27 = vcombine.high %v548_v16, %v556_v18  ;;  %v8167_v31 = vcombine.high %v563_v22, %v571_v25  ;;  %v8166_v37 = vcombine.low %v563_v22, %v571_v25  ;;  %v675_v18 = vld [vmem:[%s13070_s1 + $0xf90] sm:$0xff]  ;;  %v684_v22 = vld [vmem:[%s13070_s1 + $0xfd8] sm:$0xff] }
  0xd0   : > { %v8168_v38 = vcombine.low %v564_v26, %v572_v28 }
  0xd1   : > { %3446 = vmatmul.mubr.bf16.vlgmr.msra.gmra.mrb[4].mxu0 %v10070_v12  ;;  %3528 = vmatmul.mubr.bf16.vlgmr.msra.gmra.mrb[4].mxu1 %v10070_v12 }
  0xd2   : > { %3455 = vmatpush1.bf16.msra.mxu0 %v8038_v33  ;;  %3537 = vmatpush1.bf16.msra.mxu1 %v8040_v34  ;;  %v587_v33 = vld [vmem:[%s13070_s1 + $0xcd0] sm:$0xff]  ;;  %v580_v34 = vld [vmem:[%s13070_s1 + $0xc98] sm:$0xff] }
  0xd3   : > { %3456 = vmatprep.subr.bf16.mxu0 %v8055_v35  ;;  %3538 = vmatprep.subr.bf16.mxu1 %v8057_v39  ;;  %v8169_v35 = vcombine.high %v564_v26, %v572_v28  ;;  %v8183_v39 = vcombine.high %v579_v32, %v587_v33  ;;  %v8182_v45 = vcombine.low %v579_v32, %v587_v33  ;;  %v181_v28 = vld [vmem:[%s13070_s1 + $0x20] sm:$0xff]  ;;  %v190_v32 = vld [vmem:[%s13070_s1 + $0x68] sm:$0xff] }
  0xd4   : > { %3486 = vmatprep.mubr.bf16.mxu0 %v10091_v24  ;;  %3568 = vmatprep.mubr.bf16.mxu1 %v10091_v24  ;;  %v8184_v46 = vcombine.low %v580_v34, %v588_v36 }
  0xd6   : > { %3457 = vmatpush1.bf16.msra.mxu0 %v8054_v41  ;;  %3539 = vmatpush1.bf16.msra.mxu1 %v8056_v42  ;;  %v603_v41 = vld [vmem:[%s13070_s1 + $0xd50] sm:$0xff]  ;;  %v596_v42 = vld [vmem:[%s13070_s1 + $0xd18] sm:$0xff] }
  0xd7   : > { %3458 = vmatprep.subr.bf16.mxu0 %v8071_v43  ;;  %3540 = vmatprep.subr.bf16.mxu1 %v8073_v47  ;;  %v8185_v43 = vcombine.high %v580_v34, %v588_v36  ;;  %v8199_v47 = vcombine.high %v595_v40, %v603_v41  ;;  %v8198_v53 = vcombine.low %v595_v40, %v603_v41  ;;  %v197_v36 = vld [vmem:[%s13070_s1 + $0xa0] sm:$0xff]  ;;  %v206_v40 = vld [vmem:[%s13070_s1 + $0xe8] sm:$0xff] }
  0xd8   : > { %v8200_v54 = vcombine.low %v596_v42, %v604_v44 }
  0xda   : > { %3459 = vmatpush1.bf16.msra.mxu0 %v8070_v49  ;;  %3541 = vmatpush1.bf16.msra.mxu1 %v8072_v50  ;;  %v619_v49 = vld [vmem:[%s13070_s1 + $0xdd0] sm:$0xff]  ;;  %v612_v50 = vld [vmem:[%s13070_s1 + $0xd98] sm:$0xff] }
  0xdb   : > { %3460 = vmatprep.subr.bf16.mxu0 %v8087_v51  ;;  %3542 = vmatprep.subr.bf16.mxu1 %v8089_v55  ;;  %v8201_v51 = vcombine.high %v596_v42, %v604_v44  ;;  %v8215_v55 = vcombine.high %v611_v48, %v619_v49  ;;  %v8214_v62 = vcombine.low %v611_v48, %v619_v49  ;;  %v213_v44 = vld [vmem:[%s13070_s1 + $0x120] sm:$0xff]  ;;  %v222_v48 = vld [vmem:[%s13070_s1 + $0x168] sm:$0xff] }
  0xdc   : > { %v8216_v63 = vcombine.low %v612_v50, %v620_v52 }
  0xde   : > { %3461 = vmatpush1.bf16.msra.mxu0 %v8086_v58  ;;  %3543 = vmatpush1.bf16.msra.mxu1 %v8088_v59  ;;  %v635_v58 = vld [vmem:[%s13070_s1 + $0xe50] sm:$0xff]  ;;  %v628_v59 = vld [vmem:[%s13070_s1 + $0xe18] sm:$0xff] }
  0xdf   : > { %3462 = vmatprep.subr.bf16.mxu0 %v8103_v60  ;;  %3544 = vmatprep.subr.bf16.mxu1 %v8105_v0  ;;  %v8217_v60 = vcombine.high %v612_v50, %v620_v52  ;;  %v8231_v0 = vcombine.high %v627_v56, %v635_v58  ;;  %v8230_v6 = vcombine.low %v627_v56, %v635_v58  ;;  %v229_v52 = vld [vmem:[%s13070_s1 + $0x1a0] sm:$0xff]  ;;  %v238_v56 = vld [vmem:[%s13070_s1 + $0x1e8] sm:$0xff] }
  0xe0   : > { %v8232_v7 = vcombine.low %v628_v59, %v636_v61 }
  0xe2   : > { %3463 = vmatpush1.bf16.msra.mxu0 %v8102_v2  ;;  %3545 = vmatpush1.bf16.msra.mxu1 %v8104_v3  ;;  %v651_v2 = vld [vmem:[%s13070_s1 + $0xed0] sm:$0xff]  ;;  %v644_v3 = vld [vmem:[%s13070_s1 + $0xe98] sm:$0xff] }
  0xe3   : > { %3464 = vmatprep.subr.bf16.mxu0 %v8119_v4  ;;  %3546 = vmatprep.subr.bf16.mxu1 %v8121_v8  ;;  %v8233_v4 = vcombine.high %v628_v59, %v636_v61  ;;  %v8247_v8 = vcombine.high %v643_v1, %v651_v2  ;;  %v8246_v15 = vcombine.low %v643_v1, %v651_v2  ;;  %v245_v61 = vld [vmem:[%s13070_s1 + $0x220] sm:$0xff]  ;;  %v254_v1 = vld [vmem:[%s13070_s1 + $0x268] sm:$0xff] }
  0xe4   : > { %v8248_v16 = vcombine.low %v644_v3, %v652_v5 }
  0xe6   : > { %3465 = vmatpush1.bf16.msra.mxu0 %v8118_v10  ;;  %3547 = vmatpush1.bf16.msra.mxu1 %v8120_v11  ;;  %v667_v10 = vld [vmem:[%s13070_s1 + $0xf50] sm:$0xff]  ;;  %v660_v11 = vld [vmem:[%s13070_s1 + $0xf18] sm:$0xff] }
  0xe7   : > { %3466 = vmatprep.subr.bf16.mxu0 %v8135_v13  ;;  %3548 = vmatprep.subr.bf16.mxu1 %v8137_v17  ;;  %v8249_v13 = vcombine.high %v644_v3, %v652_v5  ;;  %v8263_v17 = vcombine.high %v659_v9, %v667_v10  ;;  %v8262_v25 = vcombine.low %v659_v9, %v667_v10  ;;  %v261_v5 = vld [vmem:[%s13070_s1 + $0x2a0] sm:$0xff]  ;;  %v270_v9 = vld [vmem:[%s13070_s1 + $0x2e8] sm:$0xff] }
  0xe8   : > { %v8264_v26 = vcombine.low %v660_v11, %v668_v14 }
  0xea   : > { %3467 = vmatpush1.bf16.msra.mxu0 %v8134_v19  ;;  %3549 = vmatpush1.bf16.msra.mxu1 %v8136_v20  ;;  %v683_v19 = vld [vmem:[%s13070_s1 + $0xfd0] sm:$0xff]  ;;  %v676_v20 = vld [vmem:[%s13070_s1 + $0xf98] sm:$0xff] }
  0xeb   : > { %3468 = vmatprep.subr.bf16.mxu0 %v8151_v21  ;;  %3550 = vmatprep.subr.bf16.mxu1 %v8153_v27  ;;  %v8265_v21 = vcombine.high %v660_v11, %v668_v14  ;;  %v8279_v27 = vcombine.high %v675_v18, %v683_v19  ;;  %v8278_v33 = vcombine.low %v675_v18, %v683_v19  ;;  %v277_v14 = vld [vmem:[%s13070_s1 + $0x320] sm:$0xff]  ;;  %v286_v18 = vld [vmem:[%s13070_s1 + $0x368] sm:$0xff] }
  0xec   : > { %v8280_v34 = vcombine.low %v676_v20, %v684_v22 }
  0xee   : > { %3469 = vmatpush1.bf16.msra.mxu0 %v8150_v29  ;;  %3551 = vmatpush1.bf16.msra.mxu1 %v8152_v30  ;;  %v189_v29 = vld [vmem:[%s13070_s1 + $0x60] sm:$0xff]  ;;  %v182_v30 = vld [vmem:[%s13070_s1 + $0x28] sm:$0xff] }
  0xef   : > { %3470 = vmatprep.subr.bf16.mxu0 %v8167_v31  ;;  %3552 = vmatprep.subr.bf16.mxu1 %v8169_v35  ;;  %v8281_v31 = vcombine.high %v676_v20, %v684_v22  ;;  %v7787_v35 = vcombine.high %v181_v28, %v189_v29  ;;  %v7786_v41 = vcombine.low %v181_v28, %v189_v29  ;;  %v293_v22 = vld [vmem:[%s13070_s1 + $0x3a0] sm:$0xff]  ;;  %v302_v28 = vld [vmem:[%s13070_s1 + $0x3e8] sm:$0xff] }
  0xf0   : > { %v7788_v42 = vcombine.low %v182_v30, %v190_v32 }
  0xf2   : > { %3471 = vmatpush1.bf16.msra.mxu0 %v8166_v37  ;;  %3553 = vmatpush1.bf16.msra.mxu1 %v8168_v38  ;;  %v205_v37 = vld [vmem:[%s13070_s1 + $0xe0] sm:$0xff]  ;;  %v198_v38 = vld [vmem:[%s13070_s1 + $0xa8] sm:$0xff] }
  0xf3   : > { %3472 = vmatprep.subr.bf16.mxu0 %v8183_v39  ;;  %3554 = vmatprep.subr.bf16.mxu1 %v8185_v43  ;;  %v7789_v39 = vcombine.high %v182_v30, %v190_v32  ;;  %v7803_v43 = vcombine.high %v197_v36, %v205_v37  ;;  %v7802_v49 = vcombine.low %v197_v36, %v205_v37  ;;  %v309_v32 = vld [vmem:[%s13070_s1 + $0x420] sm:$0xff]  ;;  %v318_v36 = vld [vmem:[%s13070_s1 + $0x468] sm:$0xff] }
  0xf4   : > { %v7804_v50 = vcombine.low %v198_v38, %v206_v40 }
  0xf6   : > { %3473 = vmatpush1.bf16.msra.mxu0 %v8182_v45  ;;  %3555 = vmatpush1.bf16.msra.mxu1 %v8184_v46  ;;  %v221_v45 = vld [vmem:[%s13070_s1 + $0x160] sm:$0xff]  ;;  %v214_v46 = vld [vmem:[%s13070_s1 + $0x128] sm:$0xff] }
  0xf7   : > { %3474 = vmatprep.subr.bf16.mxu0 %v8199_v47  ;;  %3556 = vmatprep.subr.bf16.mxu1 %v8201_v51  ;;  %v7805_v47 = vcombine.high %v198_v38, %v206_v40  ;;  %v7819_v51 = vcombine.high %v213_v44, %v221_v45  ;;  %v7818_v58 = vcombine.low %v213_v44, %v221_v45  ;;  %v325_v40 = vld [vmem:[%s13070_s1 + $0x4a0] sm:$0xff]  ;;  %v334_v44 = vld [vmem:[%s13070_s1 + $0x4e8] sm:$0xff] }
  0xf8   : > { %v7820_v59 = vcombine.low %v214_v46, %v222_v48 }
  0xfa   : > { %3475 = vmatpush1.bf16.msra.mxu0 %v8198_v53  ;;  %3557 = vmatpush1.bf16.msra.mxu1 %v8200_v54  ;;  %v237_v53 = vld [vmem:[%s13070_s1 + $0x1e0] sm:$0xff]  ;;  %v230_v54 = vld [vmem:[%s13070_s1 + $0x1a8] sm:$0xff] }
  0xfb   : > { %3476 = vmatprep.subr.bf16.mxu0 %v8215_v55  ;;  %3558 = vmatprep.subr.bf16.mxu1 %v8217_v60  ;;  %v7821_v55 = vcombine.high %v214_v46, %v222_v48  ;;  %v7835_v60 = vcombine.high %v229_v52, %v237_v53  ;;  %v7834_v2 = vcombine.low %v229_v52, %v237_v53  ;;  %v341_v48 = vld [vmem:[%s13070_s1 + $0x520] sm:$0xff]  ;;  %v350_v52 = vld [vmem:[%s13070_s1 + $0x568] sm:$0xff] }
  0xfc   : > { %v7836_v3 = vcombine.low %v230_v54, %v238_v56 }
  0xfe   : > { %3477 = vmatpush1.bf16.msra.mxu0 %v8214_v62  ;;  %3559 = vmatpush1.bf16.msra.mxu1 %v8216_v63  ;;  %v253_v62 = vld [vmem:[%s13070_s1 + $0x260] sm:$0xff]  ;;  %v246_v63 = vld [vmem:[%s13070_s1 + $0x228] sm:$0xff] }
  0xff   : > { %3478 = vmatprep.subr.bf16.mxu0 %v8231_v0  ;;  %3560 = vmatprep.subr.bf16.mxu1 %v8233_v4  ;;  %v7837_v0 = vcombine.high %v230_v54, %v238_v56  ;;  %v7851_v4 = vcombine.high %v245_v61, %v253_v62  ;;  %v7850_v10 = vcombine.low %v245_v61, %v253_v62  ;;  %v357_v56 = vld [vmem:[%s13070_s1 + $0x5a0] sm:$0xff]  ;;  %v366_v61 = vld [vmem:[%s13070_s1 + $0x5e8] sm:$0xff] }
 0x100   : > { %v7852_v11 = vcombine.low %v246_v63, %v254_v1 }
 0x102   : > { %3479 = vmatpush1.bf16.msra.mxu0 %v8230_v6  ;;  %3561 = vmatpush1.bf16.msra.mxu1 %v8232_v7  ;;  %v269_v6 = vld [vmem:[%s13070_s1 + $0x2e0] sm:$0xff]  ;;  %v262_v7 = vld [vmem:[%s13070_s1 + $0x2a8] sm:$0xff] }
 0x103   : > { %3480 = vmatprep.subr.bf16.mxu0 %v8247_v8  ;;  %3562 = vmatprep.subr.bf16.mxu1 %v8249_v13  ;;  %v7853_v8 = vcombine.high %v246_v63, %v254_v1  ;;  %v7867_v13 = vcombine.high %v261_v5, %v269_v6  ;;  %v7866_v19 = vcombine.low %v261_v5, %v269_v6  ;;  %v373_v1 = vld [vmem:[%s13070_s1 + $0x620] sm:$0xff]  ;;  %v382_v5 = vld [vmem:[%s13070_s1 + $0x668] sm:$0xff] }
 0x104   : > { %v7868_v20 = vcombine.low %v262_v7, %v270_v9 }
 0x106   : > { %3481 = vmatpush1.bf16.msra.mxu0 %v8246_v15  ;;  %3563 = vmatpush1.bf16.msra.mxu1 %v8248_v16  ;;  %v285_v15 = vld [vmem:[%s13070_s1 + $0x360] sm:$0xff]  ;;  %v278_v16 = vld [vmem:[%s13070_s1 + $0x328] sm:$0xff] }
 0x107   : > { %3482 = vmatprep.subr.bf16.mxu0 %v8263_v17  ;;  %3564 = vmatprep.subr.bf16.mxu1 %v8265_v21  ;;  %v7869_v17 = vcombine.high %v262_v7, %v270_v9  ;;  %v7883_v21 = vcombine.high %v277_v14, %v285_v15  ;;  %v7882_v29 = vcombine.low %v277_v14, %v285_v15  ;;  %v389_v9 = vld [vmem:[%s13070_s1 + $0x6a0] sm:$0xff]  ;;  %v398_v14 = vld [vmem:[%s13070_s1 + $0x6e8] sm:$0xff] }
 0x108   : > { %v7884_v30 = vcombine.low %v278_v16, %v286_v18 }
 0x10a   : > { %3483 = vmatpush1.bf16.msra.mxu0 %v8262_v25  ;;  %3565 = vmatpush1.bf16.msra.mxu1 %v8264_v26  ;;  %v301_v25 = vld [vmem:[%s13070_s1 + $0x3e0] sm:$0xff]  ;;  %v294_v26 = vld [vmem:[%s13070_s1 + $0x3a8] sm:$0xff] }
 0x10b   : > { %3484 = vmatprep.subr.bf16.mxu0 %v8279_v27  ;;  %3566 = vmatprep.subr.bf16.mxu1 %v8281_v31  ;;  %v7885_v27 = vcombine.high %v278_v16, %v286_v18  ;;  %v7899_v31 = vcombine.high %v293_v22, %v301_v25  ;;  %v7898_v37 = vcombine.low %v293_v22, %v301_v25  ;;  %v405_v18 = vld [vmem:[%s13070_s1 + $0x720] sm:$0xff]  ;;  %v414_v22 = vld [vmem:[%s13070_s1 + $0x768] sm:$0xff] }
 0x10c   : > { %v7900_v38 = vcombine.low %v294_v26, %v302_v28 }
 0x10e   : > { %3485 = vmatpush1.bf16.msra.mxu0 %v8278_v33  ;;  %3567 = vmatpush1.bf16.msra.mxu1 %v8280_v34  ;;  %v317_v33 = vld [vmem:[%s13070_s1 + $0x460] sm:$0xff]  ;;  %v310_v34 = vld [vmem:[%s13070_s1 + $0x428] sm:$0xff] }
 0x10f   : > { %3577 = vmatprep.subr.bf16.mxu0 %v7787_v35  ;;  %3659 = vmatprep.subr.bf16.mxu1 %v7789_v39  ;;  %v7901_v35 = vcombine.high %v294_v26, %v302_v28  ;;  %v7915_v39 = vcombine.high %v309_v32, %v317_v33  ;;  %v7914_v45 = vcombine.low %v309_v32, %v317_v33  ;;  %v421_v28 = vld [vmem:[%s13070_s1 + $0x7a0] sm:$0xff]  ;;  %v430_v32 = vld [vmem:[%s13070_s1 + $0x7e8] sm:$0xff] }
 0x110   : > { %v7916_v46 = vcombine.low %v310_v34, %v318_v36 }
 0x111   : > { %3487 = vmatmul.mubr.bf16.vlgmr.msra.gmra.mrb[4].mxu0 %v10278_v23  ;;  %3569 = vmatmul.mubr.bf16.vlgmr.msra.gmra.mrb[4].mxu1 %v10278_v23 }
 0x112   : > { %3578 = vmatpush1.bf16.msra.mxu0 %v7786_v41  ;;  %3660 = vmatpush1.bf16.msra.mxu1 %v7788_v42  ;;  %v333_v41 = vld [vmem:[%s13070_s1 + $0x4e0] sm:$0xff]  ;;  %v326_v42 = vld [vmem:[%s13070_s1 + $0x4a8] sm:$0xff] }
 0x113   : > { %3579 = vmatprep.subr.bf16.mxu0 %v7803_v43  ;;  %3661 = vmatprep.subr.bf16.mxu1 %v7805_v47  ;;  %v7917_v43 = vcombine.high %v310_v34, %v318_v36  ;;  %v7931_v47 = vcombine.high %v325_v40, %v333_v41  ;;  %v7930_v53 = vcombine.low %v325_v40, %v333_v41  ;;  %v437_v36 = vld [vmem:[%s13070_s1 + $0x820] sm:$0xff]  ;;  %v446_v40 = vld [vmem:[%s13070_s1 + $0x868] sm:$0xff] }
 0x114   : > { %3609 = vmatprep.mubr.bf16.mxu0 %v9945_v57  ;;  %3691 = vmatprep.mubr.bf16.mxu1 %v9945_v57  ;;  %v7932_v54 = vcombine.low %v326_v42, %v334_v44 }
 0x116   : > { %3580 = vmatpush1.bf16.msra.mxu0 %v7802_v49  ;;  %3662 = vmatpush1.bf16.msra.mxu1 %v7804_v50  ;;  %v349_v49 = vld [vmem:[%s13070_s1 + $0x560] sm:$0xff]  ;;  %v342_v50 = vld [vmem:[%s13070_s1 + $0x528] sm:$0xff] }
 0x117   : > { %3581 = vmatprep.subr.bf16.mxu0 %v7819_v51  ;;  %3663 = vmatprep.subr.bf16.mxu1 %v7821_v55  ;;  %v7933_v51 = vcombine.high %v326_v42, %v334_v44  ;;  %v7947_v55 = vcombine.high %v341_v48, %v349_v49  ;;  %v7946_v62 = vcombine.low %v341_v48, %v349_v49  ;;  %v453_v44 = vld [vmem:[%s13070_s1 + $0x8a0] sm:$0xff]  ;;  %v462_v48 = vld [vmem:[%s13070_s1 + $0x8e8] sm:$0xff] }
 0x118   : > { %v7948_v63 = vcombine.low %v342_v50, %v350_v52 }
 0x11a   : > { %3582 = vmatpush1.bf16.msra.mxu0 %v7818_v58  ;;  %3664 = vmatpush1.bf16.msra.mxu1 %v7820_v59  ;;  %v365_v58 = vld [vmem:[%s13070_s1 + $0x5e0] sm:$0xff]  ;;  %v358_v59 = vld [vmem:[%s13070_s1 + $0x5a8] sm:$0xff] }
 0x11b   : > { %3583 = vmatprep.subr.bf16.mxu0 %v7835_v60  ;;  %3665 = vmatprep.subr.bf16.mxu1 %v7837_v0  ;;  %v7949_v60 = vcombine.high %v342_v50, %v350_v52  ;;  %v7963_v0 = vcombine.high %v357_v56, %v365_v58  ;;  %v7962_v6 = vcombine.low %v357_v56, %v365_v58  ;;  %v478_v56 = vld [vmem:[%s13070_s1 + $0x968] sm:$0xff] }
 0x11c   : > { %v7964_v7 = vcombine.low %v358_v59, %v366_v61 }
 0x11e   : > { %3584 = vmatpush1.bf16.msra.mxu0 %v7834_v2  ;;  %3666 = vmatpush1.bf16.msra.mxu1 %v7836_v3  ;;  %v381_v2 = vld [vmem:[%s13070_s1 + $0x660] sm:$0xff]  ;;  %v374_v3 = vld [vmem:[%s13070_s1 + $0x628] sm:$0xff] }
 0x11f   : > { %3585 = vmatprep.subr.bf16.mxu0 %v7851_v4  ;;  %3667 = vmatprep.subr.bf16.mxu1 %v7853_v8  ;;  %v7965_v4 = vcombine.high %v358_v59, %v366_v61  ;;  %v7979_v8 = vcombine.high %v373_v1, %v381_v2  ;;  %v7978_v15 = vcombine.low %v373_v1, %v381_v2  ;;  %v494_v1 = vld [vmem:[%s13070_s1 + $0x9e8] sm:$0xff] }
 0x120   : > { %v7980_v16 = vcombine.low %v374_v3, %v382_v5 }
 0x122   : > { %3586 = vmatpush1.bf16.msra.mxu0 %v7850_v10  ;;  %3668 = vmatpush1.bf16.msra.mxu1 %v7852_v11  ;;  %v397_v10 = vld [vmem:[%s13070_s1 + $0x6e0] sm:$0xff]  ;;  %v390_v11 = vld [vmem:[%s13070_s1 + $0x6a8] sm:$0xff] }
 0x123   : > { %3587 = vmatprep.subr.bf16.mxu0 %v7867_v13  ;;  %3669 = vmatprep.subr.bf16.mxu1 %v7869_v17  ;;  %v7981_v13 = vcombine.high %v374_v3, %v382_v5  ;;  %v7995_v17 = vcombine.high %v389_v9, %v397_v10  ;;  %v7994_v25 = vcombine.low %v389_v9, %v397_v10  ;;  %v510_v9 = vld [vmem:[%s13070_s1 + $0xa68] sm:$0xff] }
 0x124   : > { %v7996_v26 = vcombine.low %v390_v11, %v398_v14 }
 0x126   : > { %3588 = vmatpush1.bf16.msra.mxu0 %v7866_v19  ;;  %3670 = vmatpush1.bf16.msra.mxu1 %v7868_v20  ;;  %v413_v19 = vld [vmem:[%s13070_s1 + $0x760] sm:$0xff]  ;;  %v406_v20 = vld [vmem:[%s13070_s1 + $0x728] sm:$0xff] }
 0x127   : > { %3589 = vmatprep.subr.bf16.mxu0 %v7883_v21  ;;  %3671 = vmatprep.subr.bf16.mxu1 %v7885_v27  ;;  %v7997_v21 = vcombine.high %v390_v11, %v398_v14  ;;  %v8011_v27 = vcombine.high %v405_v18, %v413_v19  ;;  %v8010_v33 = vcombine.low %v405_v18, %v413_v19  ;;  %v526_v18 = vld [vmem:[%s13070_s1 + $0xae8] sm:$0xff] }
 0x128   : > { %v8012_v34 = vcombine.low %v406_v20, %v414_v22 }
 0x12a   : > { %3590 = vmatpush1.bf16.msra.mxu0 %v7882_v29  ;;  %3672 = vmatpush1.bf16.msra.mxu1 %v7884_v30  ;;  %v429_v29 = vld [vmem:[%s13070_s1 + $0x7e0] sm:$0xff]  ;;  %v422_v30 = vld [vmem:[%s13070_s1 + $0x7a8] sm:$0xff] }
 0x12b   : > { %3591 = vmatprep.subr.bf16.mxu0 %v7899_v31  ;;  %3673 = vmatprep.subr.bf16.mxu1 %v7901_v35  ;;  %v8013_v31 = vcombine.high %v406_v20, %v414_v22  ;;  %v8027_v35 = vcombine.high %v421_v28, %v429_v29  ;;  %v8026_v41 = vcombine.low %v421_v28, %v429_v29  ;;  %v542_v28 = vld [vmem:[%s13070_s1 + $0xb68] sm:$0xff] }
 0x12c   : > { %v8028_v42 = vcombine.low %v422_v30, %v430_v32 }
 0x12e   : > { %3592 = vmatpush1.bf16.msra.mxu0 %v7898_v37  ;;  %3674 = vmatpush1.bf16.msra.mxu1 %v7900_v38  ;;  %v445_v37 = vld [vmem:[%s13070_s1 + $0x860] sm:$0xff]  ;;  %v438_v38 = vld [vmem:[%s13070_s1 + $0x828] sm:$0xff] }
 0x12f   : > { %3593 = vmatprep.subr.bf16.mxu0 %v7915_v39  ;;  %3675 = vmatprep.subr.bf16.mxu1 %v7917_v43  ;;  %v8029_v39 = vcombine.high %v422_v30, %v430_v32  ;;  %v8043_v43 = vcombine.high %v437_v36, %v445_v37  ;;  %v8042_v49 = vcombine.low %v437_v36, %v445_v37 }
 0x130   : > { %v8044_v50 = vcombine.low %v438_v38, %v446_v40 }
 0x132   : > { %3594 = vmatpush1.bf16.msra.mxu0 %v7914_v45  ;;  %3676 = vmatpush1.bf16.msra.mxu1 %v7916_v46  ;;  %v461_v45 = vld [vmem:[%s13070_s1 + $0x8e0] sm:$0xff]  ;;  %v454_v46 = vld [vmem:[%s13070_s1 + $0x8a8] sm:$0xff] }
 0x133   : > { %3595 = vmatprep.subr.bf16.mxu0 %v7931_v47  ;;  %3677 = vmatprep.subr.bf16.mxu1 %v7933_v51  ;;  %v8045_v47 = vcombine.high %v438_v38, %v446_v40  ;;  %v8059_v51 = vcombine.high %v453_v44, %v461_v45  ;;  %v8061_v52 = vcombine.high %v454_v46, %v462_v48  ;;  %v550_v38 = vld [vmem:[%s13070_s1 + $0xba8] sm:$0xff] }
 0x134   : > { %v8058_v58 = vcombine.low %v453_v44, %v461_v45  ;;  %v8060_v59 = vcombine.low %v454_v46, %v462_v48 }
 0x136   : > { %3596 = vmatpush1.bf16.msra.mxu0 %v7930_v53  ;;  %3678 = vmatpush1.bf16.msra.mxu1 %v7932_v54  ;;  %v469_v53 = vld [vmem:[%s13070_s1 + $0x920] sm:$0xff] }
 0x137   : > { %3597 = vmatprep.subr.bf16.mxu0 %v7947_v55  ;;  %3679 = vmatprep.subr.bf16.mxu1 %v7949_v60  ;;  %v477_v54 = vld [vmem:[%s13070_s1 + $0x960] sm:$0xff]  ;;  %v470_v55 = vld [vmem:[%s13070_s1 + $0x928] sm:$0xff] }
 0x138   : > { %v8075_v60 = vcombine.high %v469_v53, %v477_v54  ;;  %v8077_v61 = vcombine.high %v470_v55, %v478_v56  ;;  %v8074_v2 = vcombine.low %v469_v53, %v477_v54  ;;  %v8076_v3 = vcombine.low %v470_v55, %v478_v56 }
 0x13a   : > { %3598 = vmatpush1.bf16.msra.mxu0 %v7946_v62  ;;  %3680 = vmatpush1.bf16.msra.mxu1 %v7948_v63  ;;  %v485_v62 = vld [vmem:[%s13070_s1 + $0x9a0] sm:$0xff] }
 0x13b   : > { %3599 = vmatprep.subr.bf16.mxu0 %v7963_v0  ;;  %3681 = vmatprep.subr.bf16.mxu1 %v7965_v4  ;;  %v493_v63 = vld [vmem:[%s13070_s1 + $0x9e0] sm:$0xff]  ;;  %v486_v0 = vld [vmem:[%s13070_s1 + $0x9a8] sm:$0xff] }
 0x13c   : > { %v8091_v4 = vcombine.high %v485_v62, %v493_v63  ;;  %v8093_v5 = vcombine.high %v486_v0, %v494_v1  ;;  %v8090_v10 = vcombine.low %v485_v62, %v493_v63  ;;  %v8092_v11 = vcombine.low %v486_v0, %v494_v1 }
 0x13e   : > { %3600 = vmatpush1.bf16.msra.mxu0 %v7962_v6  ;;  %3682 = vmatpush1.bf16.msra.mxu1 %v7964_v7  ;;  %v501_v6 = vld [vmem:[%s13070_s1 + $0xa20] sm:$0xff] }
 0x13f   : > { %3601 = vmatprep.subr.bf16.mxu0 %v7979_v8  ;;  %3683 = vmatprep.subr.bf16.mxu1 %v7981_v13  ;;  %v509_v7 = vld [vmem:[%s13070_s1 + $0xa60] sm:$0xff]  ;;  %v502_v8 = vld [vmem:[%s13070_s1 + $0xa28] sm:$0xff] }
 0x140   : > { %v8107_v13 = vcombine.high %v501_v6, %v509_v7  ;;  %v8109_v14 = vcombine.high %v502_v8, %v510_v9  ;;  %v8106_v19 = vcombine.low %v501_v6, %v509_v7  ;;  %v8108_v20 = vcombine.low %v502_v8, %v510_v9 }
 0x142   : > { %3602 = vmatpush1.bf16.msra.mxu0 %v7978_v15  ;;  %3684 = vmatpush1.bf16.msra.mxu1 %v7980_v16  ;;  %v517_v15 = vld [vmem:[%s13070_s1 + $0xaa0] sm:$0xff] }
 0x143   : > { %3603 = vmatprep.subr.bf16.mxu0 %v7995_v17  ;;  %3685 = vmatprep.subr.bf16.mxu1 %v7997_v21  ;;  %v525_v16 = vld [vmem:[%s13070_s1 + $0xae0] sm:$0xff]  ;;  %v518_v17 = vld [vmem:[%s13070_s1 + $0xaa8] sm:$0xff] }
 0x144   : > { %v8123_v21 = vcombine.high %v517_v15, %v525_v16  ;;  %v8125_v22 = vcombine.high %v518_v17, %v526_v18  ;;  %v8122_v29 = vcombine.low %v517_v15, %v525_v16  ;;  %v8124_v30 = vcombine.low %v518_v17, %v526_v18 }
 0x146   : > { %3604 = vmatpush1.bf16.msra.mxu0 %v7994_v25  ;;  %3686 = vmatpush1.bf16.msra.mxu1 %v7996_v26  ;;  %v533_v25 = vld [vmem:[%s13070_s1 + $0xb20] sm:$0xff] }
 0x147   : > { %3605 = vmatprep.subr.bf16.mxu0 %v8011_v27  ;;  %3687 = vmatprep.subr.bf16.mxu1 %v8013_v31  ;;  %v541_v26 = vld [vmem:[%s13070_s1 + $0xb60] sm:$0xff]  ;;  %v534_v27 = vld [vmem:[%s13070_s1 + $0xb28] sm:$0xff] }
 0x148   : > { %v8139_v31 = vcombine.high %v533_v25, %v541_v26  ;;  %v8140_v45 = vcombine.low %v534_v27, %v542_v28 }
 0x14a   : > { %3606 = vmatpush1.bf16.msra.mxu0 %v8010_v33  ;;  %3688 = vmatpush1.bf16.msra.mxu1 %v8012_v34  ;;  %v8141_v33 = vcombine.high %v534_v27, %v542_v28  ;;  %v549_v34 = vld [vmem:[%s13070_s1 + $0xba0] sm:$0xff] }
 0x14b   : > { %3607 = vmatprep.subr.bf16.mxu0 %v8027_v35  ;;  %3689 = vmatprep.subr.bf16.mxu1 %v8029_v39  ;;  %v557_v35 = vld [vmem:[%s13070_s1 + $0xbe0] sm:$0xff]  ;;  %v558_v39 = vld [vmem:[%s13070_s1 + $0xbe8] sm:$0xff] }
 0x14c   : > { %v8155_v46 = vcombine.high %v549_v34, %v557_v35  ;;  %v8157_v48 = vcombine.high %v550_v38, %v558_v39  ;;  %v8154_v53 = vcombine.low %v549_v34, %v557_v35  ;;  %v8156_v54 = vcombine.low %v550_v38, %v558_v39 }
 0x14e   : > { %3608 = vmatpush1.bf16.msra.mxu0 %v8026_v41  ;;  %3690 = vmatpush1.bf16.msra.mxu1 %v8028_v42  ;;  %v8138_v42 = vcombine.low %v533_v25, %v541_v26 }
 0x14f   : > { %3618 = vmatprep.subr.bf16.mxu0 %v8043_v43  ;;  %3700 = vmatprep.subr.bf16.mxu1 %v8045_v47 }
 0x151   : > { %3610 = vmatmul.mubr.bf16.vlgmr.msra.gmra.mrb[8].mxu0 %v10070_v12  ;;  %3692 = vmatmul.mubr.bf16.vlgmr.msra.gmra.mrb[8].mxu1 %v10070_v12 }
 0x152   : > { %3619 = vmatpush1.bf16.msra.mxu0 %v8042_v49  ;;  %3701 = vmatpush1.bf16.msra.mxu1 %v8044_v50  ;;  %v565_v49 = vld [vmem:[%s13070_s1 + $0xc20] sm:$0xff] }
 0x153   : > { %3620 = vmatprep.subr.bf16.mxu0 %v8059_v51  ;;  %3702 = vmatprep.subr.bf16.mxu1 %v8061_v52  ;;  %v573_v50 = vld [vmem:[%s13070_s1 + $0xc60] sm:$0xff]  ;;  %v566_v51 = vld [vmem:[%s13070_s1 + $0xc28] sm:$0xff] }
 0x154   : > { %3650 = vmatprep.mubr.bf16.mxu0 %v10091_v24  ;;  %3732 = vmatprep.mubr.bf16.mxu1 %v10091_v24  ;;  %v574_v52 = vld [vmem:[%s13070_s1 + $0xc68] sm:$0xff]  ;;  %v8171_v55 = vcombine.high %v565_v49, %v573_v50  ;;  %v8170_v62 = vcombine.low %v565_v49, %v573_v50  ;;  %v677_v49 = vld [vmem:[%s13070_s1 + $0xfa0] sm:$0xff] }
 0x155   : > { %v8173_v56 = vcombine.high %v566_v51, %v574_v52  ;;  %v8172_v63 = vcombine.low %v566_v51, %v574_v52  ;;  %v685_v50 = vld [vmem:[%s13070_s1 + $0xfe0] sm:$0xff]  ;;  %v678_v51 = vld [vmem:[%s13070_s1 + $0xfa8] sm:$0xff] }
 0x156   : > { %3621 = vmatpush1.bf16.msra.mxu0 %v8058_v58  ;;  %3703 = vmatpush1.bf16.msra.mxu1 %v8060_v59  ;;  %v581_v58 = vld [vmem:[%s13070_s1 + $0xca0] sm:$0xff]  ;;  %v686_v52 = vld [vmem:[%s13070_s1 + $0xfe8] sm:$0xff] }
 0x157   : > { %3622 = vmatprep.subr.bf16.mxu0 %v8075_v60  ;;  %3704 = vmatprep.subr.bf16.mxu1 %v8077_v61  ;;  %v589_v59 = vld [vmem:[%s13070_s1 + $0xce0] sm:$0xff]  ;;  %v582_v60 = vld [vmem:[%s13070_s1 + $0xca8] sm:$0xff] }
 0x158   : > { %v590_v61 = vld [vmem:[%s13070_s1 + $0xce8] sm:$0xff]  ;;  %v8187_v0 = vcombine.high %v581_v58, %v589_v59  ;;  %v8186_v6 = vcombine.low %v581_v58, %v589_v59  ;;  %v183_v58 = vld [vmem:[%s13070_s1 + $0x30] sm:$0xff] }
 0x159   : > { %v8189_v1 = vcombine.high %v582_v60, %v590_v61  ;;  %v8188_v7 = vcombine.low %v582_v60, %v590_v61  ;;  %v191_v59 = vld [vmem:[%s13070_s1 + $0x70] sm:$0xff]  ;;  %v184_v60 = vld [vmem:[%s13070_s1 + $0x38] sm:$0xff] }
 0x15a   : > { %3623 = vmatpush1.bf16.msra.mxu0 %v8074_v2  ;;  %3705 = vmatpush1.bf16.msra.mxu1 %v8076_v3  ;;  %v597_v2 = vld [vmem:[%s13070_s1 + $0xd20] sm:$0xff]  ;;  %v192_v61 = vld [vmem:[%s13070_s1 + $0x78] sm:$0xff] }
 0x15b   : > { %3624 = vmatprep.subr.bf16.mxu0 %v8091_v4  ;;  %3706 = vmatprep.subr.bf16.mxu1 %v8093_v5  ;;  %v605_v3 = vld [vmem:[%s13070_s1 + $0xd60] sm:$0xff]  ;;  %v598_v4 = vld [vmem:[%s13070_s1 + $0xd28] sm:$0xff] }
 0x15c   : > { %v606_v5 = vld [vmem:[%s13070_s1 + $0xd68] sm:$0xff]  ;;  %v8203_v8 = vcombine.high %v597_v2, %v605_v3  ;;  %v8202_v15 = vcombine.low %v597_v2, %v605_v3  ;;  %v199_v2 = vld [vmem:[%s13070_s1 + $0xb0] sm:$0xff] }
 0x15d   : > { %v8205_v9 = vcombine.high %v598_v4, %v606_v5  ;;  %v8204_v16 = vcombine.low %v598_v4, %v606_v5  ;;  %v207_v3 = vld [vmem:[%s13070_s1 + $0xf0] sm:$0xff]  ;;  %v200_v4 = vld [vmem:[%s13070_s1 + $0xb8] sm:$0xff] }
 0x15e   : > { %3625 = vmatpush1.bf16.msra.mxu0 %v8090_v10  ;;  %3707 = vmatpush1.bf16.msra.mxu1 %v8092_v11  ;;  %v613_v10 = vld [vmem:[%s13070_s1 + $0xda0] sm:$0xff]  ;;  %v208_v5 = vld [vmem:[%s13070_s1 + $0xf8] sm:$0xff] }
 0x15f   : > { %3626 = vmatprep.subr.bf16.mxu0 %v8107_v13  ;;  %3708 = vmatprep.subr.bf16.mxu1 %v8109_v14  ;;  %v621_v11 = vld [vmem:[%s13070_s1 + $0xde0] sm:$0xff]  ;;  %v614_v13 = vld [vmem:[%s13070_s1 + $0xda8] sm:$0xff] }
 0x160   : > { %v622_v14 = vld [vmem:[%s13070_s1 + $0xde8] sm:$0xff]  ;;  %v8219_v17 = vcombine.high %v613_v10, %v621_v11  ;;  %v8218_v25 = vcombine.low %v613_v10, %v621_v11  ;;  %v215_v10 = vld [vmem:[%s13070_s1 + $0x130] sm:$0xff] }
 0x161   : > { %v8221_v18 = vcombine.high %v614_v13, %v622_v14  ;;  %v8220_v26 = vcombine.low %v614_v13, %v622_v14  ;;  %v223_v11 = vld [vmem:[%s13070_s1 + $0x170] sm:$0xff]  ;;  %v216_v13 = vld [vmem:[%s13070_s1 + $0x138] sm:$0xff] }
 0x162   : > { %3627 = vmatpush1.bf16.msra.mxu0 %v8106_v19  ;;  %3709 = vmatpush1.bf16.msra.mxu1 %v8108_v20  ;;  %v629_v19 = vld [vmem:[%s13070_s1 + $0xe20] sm:$0xff]  ;;  %v224_v14 = vld [vmem:[%s13070_s1 + $0x178] sm:$0xff] }
 0x163   : > { %3628 = vmatprep.subr.bf16.mxu0 %v8123_v21  ;;  %3710 = vmatprep.subr.bf16.mxu1 %v8125_v22  ;;  %v637_v20 = vld [vmem:[%s13070_s1 + $0xe60] sm:$0xff]  ;;  %v630_v21 = vld [vmem:[%s13070_s1 + $0xe28] sm:$0xff] }
 0x164   : > { %v10932_v32 = vpop.f32.mrb[0].mxu0  ;;  %v10940_v36 = vpop.f32.mrb[0].mxu1  ;;  %v638_v22 = vld [vmem:[%s13070_s1 + $0xe68] sm:$0xff]  ;;  %v8235_v27 = vcombine.high %v629_v19, %v637_v20  ;;  %v8234_v34 = vcombine.low %v629_v19, %v637_v20  ;;  %v231_v19 = vld [vmem:[%s13070_s1 + $0x1b0] sm:$0xff] }
 0x165   : > { %v10942_v37 = vpop.f32.mrb[1].mxu0  ;;  %v10950_v40 = vpop.f32.mrb[1].mxu1  ;;  %v8237_v28 = vcombine.high %v630_v21, %v638_v22  ;;  %v8236_v35 = vcombine.low %v630_v21, %v638_v22  ;;  %v239_v20 = vld [vmem:[%s13070_s1 + $0x1f0] sm:$0xff]  ;;  %v232_v21 = vld [vmem:[%s13070_s1 + $0x1b8] sm:$0xff] }
 0x166   : > { %v3328_v41 = vpop.f32.mrb[2].mxu0  ;;  %3629 = vmatpush1.bf16.msra.mxu0 %v8122_v29  ;;  %v3410_v43 = vpop.f32.mrb[2].mxu1  ;;  %3711 = vmatpush1.bf16.msra.mxu1 %v8124_v30  ;;  %v645_v29 = vld [vmem:[%s13070_s1 + $0xea0] sm:$0xff]  ;;  %v240_v22 = vld [vmem:[%s13070_s1 + $0x1f8] sm:$0xff] }
 0x167   : > { %v3329_v44 = vpop.f32.mrb[3].mxu0  ;;  %3630 = vmatprep.subr.bf16.mxu0 %v8139_v31  ;;  %v3411_v47 = vpop.f32.mrb[3].mxu1  ;;  %3712 = vmatprep.subr.bf16.mxu1 %v8141_v33  ;;  %v653_v30 = vld [vmem:[%s13070_s1 + $0xee0] sm:$0xff]  ;;  %v646_v31 = vld [vmem:[%s13070_s1 + $0xea8] sm:$0xff] }
 0x168   : > { %v654_v33 = vld [vmem:[%s13070_s1 + $0xee8] sm:$0xff]  ;;  %v8251_v38 = vcombine.high %v645_v29, %v653_v30  ;;  %v661_v41 = vld [vmem:[%s13070_s1 + $0xf20] sm:$0xff] }
 0x169   : > { %v8253_v39 = vcombine.high %v646_v31, %v654_v33  ;;  %v662_v43 = vld [vmem:[%s13070_s1 + $0xf28] sm:$0xff] }
 0x16a   : > { %3631 = vmatpush1.bf16.msra.mxu0 %v8138_v42  ;;  %3713 = vmatpush1.bf16.msra.mxu1 %v8140_v45  ;;  %v669_v42 = vld [vmem:[%s13070_s1 + $0xf60] sm:$0xff]  ;;  %v670_v44 = vld [vmem:[%s13070_s1 + $0xf68] sm:$0xff]  ;;  %v8250_v45 = vcombine.low %v645_v29, %v653_v30  ;;  %v247_v29 = vld [vmem:[%s13070_s1 + $0x230] sm:$0xff] }
 0x16b   : > { %3632 = vmatprep.subr.bf16.mxu0 %v8155_v46  ;;  %3714 = vmatprep.subr.bf16.mxu1 %v8157_v48  ;;  %v8252_v46 = vcombine.low %v646_v31, %v654_v33  ;;  %v8267_v47 = vcombine.high %v661_v41, %v669_v42  ;;  %v8269_v48 = vcombine.high %v662_v43, %v670_v44  ;;  %v255_v30 = vld [vmem:[%s13070_s1 + $0x270] sm:$0xff]  ;;  %v256_v31 = vld [vmem:[%s13070_s1 + $0x278] sm:$0xff] }
 0x16c   : > { %v7838_v33 = vcombine.low %v231_v19, %v239_v20 }
 0x16e   : > { %3633 = vmatpush1.bf16.msra.mxu0 %v8154_v53  ;;  %3715 = vmatpush1.bf16.msra.mxu1 %v8156_v54  ;;  %v8266_v53 = vcombine.low %v661_v41, %v669_v42  ;;  %v8268_v54 = vcombine.low %v662_v43, %v670_v44  ;;  %v271_v41 = vld [vmem:[%s13070_s1 + $0x2f0] sm:$0xff]  ;;  %v264_v42 = vld [vmem:[%s13070_s1 + $0x2b8] sm:$0xff]  ;;  %v7854_v44 = vcombine.low %v247_v29, %v255_v30 }
 0x16f   : > { %3634 = vmatprep.subr.bf16.mxu0 %v8171_v55  ;;  %3716 = vmatprep.subr.bf16.mxu1 %v8173_v56  ;;  %v8283_v55 = vcombine.high %v677_v49, %v685_v50  ;;  %v8285_v56 = vcombine.high %v678_v51, %v686_v52  ;;  %v272_v43 = vld [vmem:[%s13070_s1 + $0x2f8] sm:$0xff] }
 0x172   : > { %3635 = vmatpush1.bf16.msra.mxu0 %v8170_v62  ;;  %3717 = vmatpush1.bf16.msra.mxu1 %v8172_v63  ;;  %v8282_v62 = vcombine.low %v677_v49, %v685_v50  ;;  %v8284_v63 = vcombine.low %v678_v51, %v686_v52  ;;  %v287_v49 = vld [vmem:[%s13070_s1 + $0x370] sm:$0xff]  ;;  %v280_v50 = vld [vmem:[%s13070_s1 + $0x338] sm:$0xff] }
 0x173   : > { %3636 = vmatprep.subr.bf16.mxu0 %v8187_v0  ;;  %3718 = vmatprep.subr.bf16.mxu1 %v8189_v1  ;;  %v7791_v0 = vcombine.high %v183_v58, %v191_v59  ;;  %v7793_v1 = vcombine.high %v184_v60, %v192_v61  ;;  %v288_v51 = vld [vmem:[%s13070_s1 + $0x378] sm:$0xff] }
 0x176   : > { %3637 = vmatpush1.bf16.msra.mxu0 %v8186_v6  ;;  %3719 = vmatpush1.bf16.msra.mxu1 %v8188_v7  ;;  %v7790_v6 = vcombine.low %v183_v58, %v191_v59  ;;  %v7792_v7 = vcombine.low %v184_v60, %v192_v61  ;;  %v303_v58 = vld [vmem:[%s13070_s1 + $0x3f0] sm:$0xff]  ;;  %v296_v59 = vld [vmem:[%s13070_s1 + $0x3b8] sm:$0xff] }
 0x177   : > { %3638 = vmatprep.subr.bf16.mxu0 %v8203_v8  ;;  %3720 = vmatprep.subr.bf16.mxu1 %v8205_v9  ;;  %v7807_v8 = vcombine.high %v199_v2, %v207_v3  ;;  %v7809_v9 = vcombine.high %v200_v4, %v208_v5  ;;  %v304_v60 = vld [vmem:[%s13070_s1 + $0x3f8] sm:$0xff] }
 0x17a   : > { %3639 = vmatpush1.bf16.msra.mxu0 %v8202_v15  ;;  %3721 = vmatpush1.bf16.msra.mxu1 %v8204_v16  ;;  %v7806_v15 = vcombine.low %v199_v2, %v207_v3  ;;  %v7808_v16 = vcombine.low %v200_v4, %v208_v5  ;;  %v319_v2 = vld [vmem:[%s13070_s1 + $0x470] sm:$0xff]  ;;  %v312_v3 = vld [vmem:[%s13070_s1 + $0x438] sm:$0xff] }
 0x17b   : > { %3640 = vmatprep.subr.bf16.mxu0 %v8219_v17  ;;  %3722 = vmatprep.subr.bf16.mxu1 %v8221_v18  ;;  %v7823_v17 = vcombine.high %v215_v10, %v223_v11  ;;  %v7825_v18 = vcombine.high %v216_v13, %v224_v14  ;;  %v320_v4 = vld [vmem:[%s13070_s1 + $0x478] sm:$0xff] }
 0x17e   : > { %3641 = vmatpush1.bf16.msra.mxu0 %v8218_v25  ;;  %3723 = vmatpush1.bf16.msra.mxu1 %v8220_v26  ;;  %v7822_v25 = vcombine.low %v215_v10, %v223_v11  ;;  %v7824_v26 = vcombine.low %v216_v13, %v224_v14  ;;  %v335_v10 = vld [vmem:[%s13070_s1 + $0x4f0] sm:$0xff]  ;;  %v328_v11 = vld [vmem:[%s13070_s1 + $0x4b8] sm:$0xff] }
 0x17f   : > { %3642 = vmatprep.subr.bf16.mxu0 %v8235_v27  ;;  %3724 = vmatprep.subr.bf16.mxu1 %v8237_v28  ;;  %v7839_v27 = vcombine.high %v231_v19, %v239_v20  ;;  %v7841_v28 = vcombine.high %v232_v21, %v240_v22  ;;  %v336_v13 = vld [vmem:[%s13070_s1 + $0x4f8] sm:$0xff]  ;;  %v351_v19 = vld [vmem:[%s13070_s1 + $0x570] sm:$0xff] }
 0x180   : > { %v344_v20 = vld [vmem:[%s13070_s1 + $0x538] sm:$0xff] }
 0x182   : > { %3643 = vmatpush1.bf16.msra.mxu0 %v8234_v34  ;;  %3725 = vmatpush1.bf16.msra.mxu1 %v8236_v35  ;;  %v7840_v34 = vcombine.low %v232_v21, %v240_v22  ;;  %v7855_v35 = vcombine.high %v247_v29, %v255_v30  ;;  %v352_v21 = vld [vmem:[%s13070_s1 + $0x578] sm:$0xff]  ;;  %v367_v29 = vld [vmem:[%s13070_s1 + $0x5f0] sm:$0xff] }
 0x183   : > { %3644 = vmatprep.subr.bf16.mxu0 %v8251_v38  ;;  %3726 = vmatprep.subr.bf16.mxu1 %v8253_v39  ;;  %v263_v39 = vld [vmem:[%s13070_s1 + $0x2b0] sm:$0xff]  ;;  %v360_v30 = vld [vmem:[%s13070_s1 + $0x5b8] sm:$0xff] }
 0x184   : > { %v7870_v52 = vcombine.low %v263_v39, %v271_v41 }
 0x186   : > { %3645 = vmatpush1.bf16.msra.mxu0 %v8250_v45  ;;  %3727 = vmatpush1.bf16.msra.mxu1 %v8252_v46  ;;  %v7871_v46 = vcombine.high %v263_v39, %v271_v41  ;;  %v383_v39 = vld [vmem:[%s13070_s1 + $0x670] sm:$0xff]  ;;  %v376_v41 = vld [vmem:[%s13070_s1 + $0x638] sm:$0xff] }
 0x187   : > { %3646 = vmatprep.subr.bf16.mxu0 %v8267_v47  ;;  %3728 = vmatprep.subr.bf16.mxu1 %v8269_v48  ;;  %v7873_v47 = vcombine.high %v264_v42, %v272_v43  ;;  %v279_v48 = vld [vmem:[%s13070_s1 + $0x330] sm:$0xff] }
 0x188   : > { %v7886_v61 = vcombine.low %v279_v48, %v287_v49 }
 0x18a   : > { %3647 = vmatpush1.bf16.msra.mxu0 %v8266_v53  ;;  %3729 = vmatpush1.bf16.msra.mxu1 %v8268_v54  ;;  %v7872_v53 = vcombine.low %v264_v42, %v272_v43  ;;  %v7887_v54 = vcombine.high %v279_v48, %v287_v49  ;;  %v384_v42 = vld [vmem:[%s13070_s1 + $0x678] sm:$0xff]  ;;  %v399_v48 = vld [vmem:[%s13070_s1 + $0x6f0] sm:$0xff] }
 0x18b   : > { %3648 = vmatprep.subr.bf16.mxu0 %v8283_v55  ;;  %3730 = vmatprep.subr.bf16.mxu1 %v8285_v56  ;;  %v7889_v55 = vcombine.high %v280_v50, %v288_v51  ;;  %v295_v56 = vld [vmem:[%s13070_s1 + $0x3b0] sm:$0xff]  ;;  %v392_v49 = vld [vmem:[%s13070_s1 + $0x6b8] sm:$0xff] }
 0x18c   : > { %v7902_v5 = vcombine.low %v295_v56, %v303_v58 }
 0x18e   : > { %3649 = vmatpush1.bf16.msra.mxu0 %v8282_v62  ;;  %3731 = vmatpush1.bf16.msra.mxu1 %v8284_v63  ;;  %v7888_v62 = vcombine.low %v280_v50, %v288_v51  ;;  %v7903_v63 = vcombine.high %v295_v56, %v303_v58  ;;  %v400_v50 = vld [vmem:[%s13070_s1 + $0x6f8] sm:$0xff]  ;;  %v415_v56 = vld [vmem:[%s13070_s1 + $0x770] sm:$0xff] }
 0x18f   : > { %3741 = vmatprep.subr.bf16.mxu0 %v7791_v0  ;;  %3823 = vmatprep.subr.bf16.mxu1 %v7793_v1  ;;  %v7905_v0 = vcombine.high %v296_v59, %v304_v60  ;;  %v311_v1 = vld [vmem:[%s13070_s1 + $0x430] sm:$0xff]  ;;  %v408_v58 = vld [vmem:[%s13070_s1 + $0x738] sm:$0xff] }
 0x190   : > { %v7918_v14 = vcombine.low %v311_v1, %v319_v2 }
 0x191   : > { %3651 = vmatmul.mubr.bf16.vlgmr.msra.gmra.mrb[8].mxu0 %v10278_v23  ;;  %3733 = vmatmul.mubr.bf16.vlgmr.msra.gmra.mrb[8].mxu1 %v10278_v23 }
 0x192   : > { %3742 = vmatpush1.bf16.msra.mxu0 %v7790_v6  ;;  %3824 = vmatpush1.bf16.msra.mxu1 %v7792_v7  ;;  %v7904_v6 = vcombine.low %v296_v59, %v304_v60  ;;  %v7919_v7 = vcombine.high %v311_v1, %v319_v2  ;;  %v416_v59 = vld [vmem:[%s13070_s1 + $0x778] sm:$0xff]  ;;  %v431_v1 = vld [vmem:[%s13070_s1 + $0x7f0] sm:$0xff] }
 0x193   : > { %3743 = vmatprep.subr.bf16.mxu0 %v7807_v8  ;;  %3825 = vmatprep.subr.bf16.mxu1 %v7809_v9  ;;  %v7921_v8 = vcombine.high %v312_v3, %v320_v4  ;;  %v327_v9 = vld [vmem:[%s13070_s1 + $0x4b0] sm:$0xff]  ;;  %v424_v2 = vld [vmem:[%s13070_s1 + $0x7b8] sm:$0xff] }
 0x194   : > { %3773 = vmatprep.mubr.bf16.mxu0 %v9945_v57  ;;  %3855 = vmatprep.mubr.bf16.mxu1 %v9945_v57  ;;  %v248_v57 = vld [vmem:[%s13070_s1 + $0x238] sm:$0xff]  ;;  %v7934_v22 = vcombine.low %v327_v9, %v335_v10 }
 0x195   : > { %v7857_v38 = vcombine.high %v248_v57, %v256_v31  ;;  %v7856_v45 = vcombine.low %v248_v57, %v256_v31  ;;  %v368_v57 = vld [vmem:[%s13070_s1 + $0x5f8] sm:$0xff] }
 0x196   : > { %3744 = vmatpush1.bf16.msra.mxu0 %v7806_v15  ;;  %3826 = vmatpush1.bf16.msra.mxu1 %v7808_v16  ;;  %v7920_v15 = vcombine.low %v312_v3, %v320_v4  ;;  %v7935_v16 = vcombine.high %v327_v9, %v335_v10  ;;  %v432_v3 = vld [vmem:[%s13070_s1 + $0x7f8] sm:$0xff]  ;;  %v447_v9 = vld [vmem:[%s13070_s1 + $0x870] sm:$0xff] }
 0x197   : > { %3745 = vmatprep.subr.bf16.mxu0 %v7823_v17  ;;  %3827 = vmatprep.subr.bf16.mxu1 %v7825_v18  ;;  %v7937_v17 = vcombine.high %v328_v11, %v336_v13  ;;  %v343_v18 = vld [vmem:[%s13070_s1 + $0x530] sm:$0xff]  ;;  %v440_v10 = vld [vmem:[%s13070_s1 + $0x838] sm:$0xff] }
 0x198   : > { %v7950_v31 = vcombine.low %v343_v18, %v351_v19 }
 0x19a   : > { %3746 = vmatpush1.bf16.msra.mxu0 %v7822_v25  ;;  %3828 = vmatpush1.bf16.msra.mxu1 %v7824_v26  ;;  %v7936_v25 = vcombine.low %v328_v11, %v336_v13  ;;  %v7951_v26 = vcombine.high %v343_v18, %v351_v19  ;;  %v448_v11 = vld [vmem:[%s13070_s1 + $0x878] sm:$0xff]  ;;  %v463_v18 = vld [vmem:[%s13070_s1 + $0x8f0] sm:$0xff] }
 0x19b   : > { %3747 = vmatprep.subr.bf16.mxu0 %v7839_v27  ;;  %3829 = vmatprep.subr.bf16.mxu1 %v7841_v28  ;;  %v7953_v27 = vcombine.high %v344_v20, %v352_v21  ;;  %v359_v28 = vld [vmem:[%s13070_s1 + $0x5b0] sm:$0xff]  ;;  %v456_v19 = vld [vmem:[%s13070_s1 + $0x8b8] sm:$0xff] }
 0x19c   : > { %v7966_v43 = vcombine.low %v359_v28, %v367_v29 }
 0x19e   : > { %3748 = vmatpush1.bf16.msra.mxu0 %v7838_v33  ;;  %3830 = vmatpush1.bf16.msra.mxu1 %v7840_v34  ;;  %v7952_v33 = vcombine.low %v344_v20, %v352_v21  ;;  %v7967_v34 = vcombine.high %v359_v28, %v367_v29  ;;  %v464_v20 = vld [vmem:[%s13070_s1 + $0x8f8] sm:$0xff]  ;;  %v479_v28 = vld [vmem:[%s13070_s1 + $0x970] sm:$0xff] }
 0x19f   : > { %3749 = vmatprep.subr.bf16.mxu0 %v7855_v35  ;;  %3831 = vmatprep.subr.bf16.mxu1 %v7857_v38  ;;  %v7969_v35 = vcombine.high %v360_v30, %v368_v57  ;;  %v375_v38 = vld [vmem:[%s13070_s1 + $0x630] sm:$0xff]  ;;  %v472_v29 = vld [vmem:[%s13070_s1 + $0x938] sm:$0xff] }
 0x1a0   : > { %v7982_v51 = vcombine.low %v375_v38, %v383_v39 }
 0x1a2   : > { %3750 = vmatpush1.bf16.msra.mxu0 %v7854_v44  ;;  %3832 = vmatpush1.bf16.msra.mxu1 %v7856_v45  ;;  %v7968_v44 = vcombine.low %v360_v30, %v368_v57  ;;  %v7983_v45 = vcombine.high %v375_v38, %v383_v39  ;;  %v480_v30 = vld [vmem:[%s13070_s1 + $0x978] sm:$0xff]  ;;  %v495_v38 = vld [vmem:[%s13070_s1 + $0x9f0] sm:$0xff] }
 0x1a3   : > { %3751 = vmatprep.subr.bf16.mxu0 %v7871_v46  ;;  %3833 = vmatprep.subr.bf16.mxu1 %v7873_v47  ;;  %v7985_v46 = vcombine.high %v376_v41, %v384_v42  ;;  %v391_v47 = vld [vmem:[%s13070_s1 + $0x6b0] sm:$0xff]  ;;  %v496_v39 = vld [vmem:[%s13070_s1 + $0x9f8] sm:$0xff] }
 0x1a4   : > { %v7998_v60 = vcombine.low %v391_v47, %v399_v48 }
 0x1a6   : > { %3752 = vmatpush1.bf16.msra.mxu0 %v7870_v52  ;;  %3834 = vmatpush1.bf16.msra.mxu1 %v7872_v53  ;;  %v7984_v52 = vcombine.low %v376_v41, %v384_v42  ;;  %v7999_v53 = vcombine.high %v391_v47, %v399_v48  ;;  %v8080_v42 = vcombine.low %v472_v29, %v480_v30  ;;  %v512_v47 = vld [vmem:[%s13070_s1 + $0xa78] sm:$0xff] }
 0x1a7   : > { %3753 = vmatprep.subr.bf16.mxu0 %v7887_v54  ;;  %3835 = vmatprep.subr.bf16.mxu1 %v7889_v55  ;;  %v8001_v54 = vcombine.high %v392_v49, %v400_v50  ;;  %v407_v55 = vld [vmem:[%s13070_s1 + $0x730] sm:$0xff] }
 0x1a8   : > { %v8014_v4 = vcombine.low %v407_v55, %v415_v56 }
 0x1aa   : > { %3754 = vmatpush1.bf16.msra.mxu0 %v7886_v61  ;;  %3836 = vmatpush1.bf16.msra.mxu1 %v7888_v62  ;;  %v8000_v61 = vcombine.low %v392_v49, %v400_v50  ;;  %v8015_v62 = vcombine.high %v407_v55, %v415_v56  ;;  %v528_v55 = vld [vmem:[%s13070_s1 + $0xaf8] sm:$0xff] }
 0x1ab   : > { %3755 = vmatprep.subr.bf16.mxu0 %v7903_v63  ;;  %3837 = vmatprep.subr.bf16.mxu1 %v7905_v0  ;;  %v8017_v63 = vcombine.high %v408_v58, %v416_v59  ;;  %v423_v0 = vld [vmem:[%s13070_s1 + $0x7b0] sm:$0xff] }
 0x1ac   : > { %v8030_v13 = vcombine.low %v423_v0, %v431_v1 }
 0x1ae   : > { %3756 = vmatpush1.bf16.msra.mxu0 %v7902_v5  ;;  %3838 = vmatpush1.bf16.msra.mxu1 %v7904_v6  ;;  %v8016_v5 = vcombine.low %v408_v58, %v416_v59  ;;  %v8031_v6 = vcombine.high %v423_v0, %v431_v1  ;;  %v544_v0 = vld [vmem:[%s13070_s1 + $0xb78] sm:$0xff] }
 0x1af   : > { %3757 = vmatprep.subr.bf16.mxu0 %v7919_v7  ;;  %3839 = vmatprep.subr.bf16.mxu1 %v7921_v8  ;;  %v8033_v7 = vcombine.high %v424_v2, %v432_v3  ;;  %v439_v8 = vld [vmem:[%s13070_s1 + $0x830] sm:$0xff] }
 0x1b0   : > { %v8046_v21 = vcombine.low %v439_v8, %v447_v9 }
 0x1b2   : > { %3758 = vmatpush1.bf16.msra.mxu0 %v7918_v14  ;;  %3840 = vmatpush1.bf16.msra.mxu1 %v7920_v15  ;;  %v8032_v14 = vcombine.low %v424_v2, %v432_v3  ;;  %v8047_v15 = vcombine.high %v439_v8, %v447_v9 }
 0x1b3   : > { %3759 = vmatprep.subr.bf16.mxu0 %v7935_v16  ;;  %3841 = vmatprep.subr.bf16.mxu1 %v7937_v17  ;;  %v8049_v16 = vcombine.high %v440_v10, %v448_v11  ;;  %v455_v17 = vld [vmem:[%s13070_s1 + $0x8b0] sm:$0xff] }
 0x1b4   : > { %v8062_v57 = vcombine.low %v455_v17, %v463_v18 }
 0x1b6   : > { %3760 = vmatpush1.bf16.msra.mxu0 %v7934_v22  ;;  %3842 = vmatpush1.bf16.msra.mxu1 %v7936_v25  ;;  %v8048_v22 = vcombine.low %v440_v10, %v448_v11  ;;  %v8063_v25 = vcombine.high %v455_v17, %v463_v18  ;;  %v552_v10 = vld [vmem:[%s13070_s1 + $0xbb8] sm:$0xff] }
 0x1b7   : > { %3761 = vmatprep.subr.bf16.mxu0 %v7951_v26  ;;  %3843 = vmatprep.subr.bf16.mxu1 %v7953_v27  ;;  %v8065_v26 = vcombine.high %v456_v19, %v464_v20  ;;  %v471_v27 = vld [vmem:[%s13070_s1 + $0x930] sm:$0xff]  ;;  %v560_v11 = vld [vmem:[%s13070_s1 + $0xbf8] sm:$0xff] }
 0x1b8   : > { %v8078_v41 = vcombine.low %v471_v27, %v479_v28 }
 0x1ba   : > { %3762 = vmatpush1.bf16.msra.mxu0 %v7950_v31  ;;  %3844 = vmatpush1.bf16.msra.mxu1 %v7952_v33  ;;  %v8064_v31 = vcombine.low %v456_v19, %v464_v20  ;;  %v8079_v33 = vcombine.high %v471_v27, %v479_v28  ;;  %v576_v27 = vld [vmem:[%s13070_s1 + $0xc78] sm:$0xff] }
 0x1bb   : > { %3763 = vmatprep.subr.bf16.mxu0 %v7967_v34  ;;  %3845 = vmatprep.subr.bf16.mxu1 %v7969_v35  ;;  %v8081_v34 = vcombine.high %v472_v29, %v480_v30  ;;  %v487_v35 = vld [vmem:[%s13070_s1 + $0x9b0] sm:$0xff]  ;;  %v8160_v29 = vcombine.low %v552_v10, %v560_v11 }
 0x1bc   : > { %v8094_v48 = vcombine.low %v487_v35, %v495_v38 }
 0x1be   : > { %3764 = vmatpush1.bf16.msra.mxu0 %v7966_v43  ;;  %3846 = vmatpush1.bf16.msra.mxu1 %v7968_v44  ;;  %v8095_v43 = vcombine.high %v487_v35, %v495_v38  ;;  %v592_v35 = vld [vmem:[%s13070_s1 + $0xcf8] sm:$0xff] }
 0x1bf   : > { %3765 = vmatprep.subr.bf16.mxu0 %v7983_v45  ;;  %3847 = vmatprep.subr.bf16.mxu1 %v7985_v46  ;;  %v503_v45 = vld [vmem:[%s13070_s1 + $0xa30] sm:$0xff] }
 0x1c0   : > { %v511_v46 = vld [vmem:[%s13070_s1 + $0xa70] sm:$0xff] }
 0x1c1   : > { %v8111_v50 = vcombine.high %v503_v45, %v511_v46  ;;  %v8110_v56 = vcombine.low %v503_v45, %v511_v46  ;;  %v608_v45 = vld [vmem:[%s13070_s1 + $0xd78] sm:$0xff] }
 0x1c2   : > { %3766 = vmatpush1.bf16.msra.mxu0 %v7982_v51  ;;  %3848 = vmatpush1.bf16.msra.mxu1 %v7984_v52  ;;  %v519_v52 = vld [vmem:[%s13070_s1 + $0xab0] sm:$0xff] }
 0x1c3   : > { %3767 = vmatprep.subr.bf16.mxu0 %v7999_v53  ;;  %3849 = vmatprep.subr.bf16.mxu1 %v8001_v54  ;;  %v527_v53 = vld [vmem:[%s13070_s1 + $0xaf0] sm:$0xff]  ;;  %v520_v54 = vld [vmem:[%s13070_s1 + $0xab8] sm:$0xff] }
 0x1c4   : > { %v8127_v59 = vcombine.high %v519_v52, %v527_v53  ;;  %v8126_v1 = vcombine.low %v519_v52, %v527_v53  ;;  %v8128_v2 = vcombine.low %v520_v54, %v528_v55  ;;  %v624_v52 = vld [vmem:[%s13070_s1 + $0xdf8] sm:$0xff] }
 0x1c6   : > { %3768 = vmatpush1.bf16.msra.mxu0 %v7998_v60  ;;  %3850 = vmatpush1.bf16.msra.mxu1 %v8000_v61  ;;  %v8129_v60 = vcombine.high %v520_v54, %v528_v55  ;;  %v535_v61 = vld [vmem:[%s13070_s1 + $0xb30] sm:$0xff] }
 0x1c7   : > { %3769 = vmatprep.subr.bf16.mxu0 %v8015_v62  ;;  %3851 = vmatprep.subr.bf16.mxu1 %v8017_v63  ;;  %v543_v62 = vld [vmem:[%s13070_s1 + $0xb70] sm:$0xff]  ;;  %v536_v63 = vld [vmem:[%s13070_s1 + $0xb38] sm:$0xff] }
 0x1c8   : > { %v8143_v3 = vcombine.high %v535_v61, %v543_v62  ;;  %v8144_v18 = vcombine.low %v536_v63, %v544_v0 }
 0x1ca   : > { %3770 = vmatpush1.bf16.msra.mxu0 %v8014_v4  ;;  %3852 = vmatpush1.bf16.msra.mxu1 %v8016_v5  ;;  %v8145_v5 = vcombine.high %v536_v63, %v544_v0 }
 0x1cb   : > { %3771 = vmatprep.subr.bf16.mxu0 %v8031_v6  ;;  %3853 = vmatprep.subr.bf16.mxu1 %v8033_v7  ;;  %v551_v6 = vld [vmem:[%s13070_s1 + $0xbb0] sm:$0xff] }
 0x1cc   : > { %v559_v7 = vld [vmem:[%s13070_s1 + $0xbf0] sm:$0xff] }
 0x1cd   : > { %v8159_v19 = vcombine.high %v551_v6, %v559_v7  ;;  %v8158_v28 = vcombine.low %v551_v6, %v559_v7  ;;  %v656_v6 = vld [vmem:[%s13070_s1 + $0xef8] sm:$0xff] }
 0x1ce   : > { %3772 = vmatpush1.bf16.msra.mxu0 %v8030_v13  ;;  %3854 = vmatpush1.bf16.msra.mxu1 %v8032_v14 }
 0x1cf   : > { %3782 = vmatprep.subr.bf16.mxu0 %v8047_v15  ;;  %3864 = vmatprep.subr.bf16.mxu1 %v8049_v16  ;;  %v8142_v15 = vcombine.low %v535_v61, %v543_v62  ;;  %v640_v61 = vld [vmem:[%s13070_s1 + $0xe78] sm:$0xff] }
 0x1d1   : > { %3774 = vmatmul.mubr.bf16.vlgmr.msra.gmra.mrb[12].mxu0 %v10070_v12  ;;  %3856 = vmatmul.mubr.bf16.vlgmr.msra.gmra.mrb[12].mxu1 %v10070_v12  ;;  %v488_v12 = vld [vmem:[%s13070_s1 + $0x9b8] sm:$0xff] }
 0x1d2   : > { %3783 = vmatpush1.bf16.msra.mxu0 %v8046_v21  ;;  %3865 = vmatpush1.bf16.msra.mxu1 %v8048_v22  ;;  %v8097_v44 = vcombine.high %v488_v12, %v496_v39  ;;  %v8096_v49 = vcombine.low %v488_v12, %v496_v39  ;;  %v8161_v21 = vcombine.high %v552_v10, %v560_v11  ;;  %v567_v22 = vld [vmem:[%s13070_s1 + $0xc30] sm:$0xff] }
 0x1d3   : > { %3784 = vmatprep.subr.bf16.mxu0 %v8063_v25  ;;  %3866 = vmatprep.subr.bf16.mxu1 %v8065_v26  ;;  %v575_v25 = vld [vmem:[%s13070_s1 + $0xc70] sm:$0xff]  ;;  %v568_v26 = vld [vmem:[%s13070_s1 + $0xc38] sm:$0xff] }
 0x1d4   : > { %3814 = vmatprep.mubr.bf16.mxu0 %v10091_v24  ;;  %3896 = vmatprep.mubr.bf16.mxu1 %v10091_v24  ;;  %v504_v24 = vld [vmem:[%s13070_s1 + $0xa38] sm:$0xff]  ;;  %v8175_v30 = vcombine.high %v567_v22, %v575_v25  ;;  %v8174_v38 = vcombine.low %v567_v22, %v575_v25  ;;  %v8176_v12 = vcombine.low %v568_v26, %v576_v27  ;;  %v679_v25 = vld [vmem:[%s13070_s1 + $0xfb0] sm:$0xff] }
 0x1d5   : > { %v8113_v51 = vcombine.high %v504_v24, %v512_v47  ;;  %v8112_v58 = vcombine.low %v504_v24, %v512_v47 }
 0x1d6   : > { %3785 = vmatpush1.bf16.msra.mxu0 %v8062_v57  ;;  %3867 = vmatpush1.bf16.msra.mxu1 %v8064_v31  ;;  %v8177_v57 = vcombine.high %v568_v26, %v576_v27  ;;  %v583_v31 = vld [vmem:[%s13070_s1 + $0xcb0] sm:$0xff]  ;;  %v680_v27 = vld [vmem:[%s13070_s1 + $0xfb8] sm:$0xff] }
 0x1d7   : > { %3786 = vmatprep.subr.bf16.mxu0 %v8079_v33  ;;  %3868 = vmatprep.subr.bf16.mxu1 %v8081_v34  ;;  %v591_v33 = vld [vmem:[%s13070_s1 + $0xcf0] sm:$0xff]  ;;  %v584_v34 = vld [vmem:[%s13070_s1 + $0xcb8] sm:$0xff] }
 0x1d8   : > { %v8191_v39 = vcombine.high %v583_v31, %v591_v33  ;;  %v8190_v46 = vcombine.low %v583_v31, %v591_v33  ;;  %v8192_v24 = vcombine.low %v584_v34, %v592_v35  ;;  %v687_v26 = vld [vmem:[%s13070_s1 + $0xff0] sm:$0xff] }
 0x1d9   : > { %v8286_v33 = vcombine.low %v679_v25, %v687_v26 }
 0x1da   : > { %3787 = vmatpush1.bf16.msra.mxu0 %v8078_v41  ;;  %3869 = vmatpush1.bf16.msra.mxu1 %v8080_v42  ;;  %v8193_v41 = vcombine.high %v584_v34, %v592_v35  ;;  %v599_v42 = vld [vmem:[%s13070_s1 + $0xd30] sm:$0xff] }
 0x1db   : > { %3788 = vmatprep.subr.bf16.mxu0 %v8095_v43  ;;  %3870 = vmatprep.subr.bf16.mxu1 %v8097_v44  ;;  %v607_v43 = vld [vmem:[%s13070_s1 + $0xd70] sm:$0xff]  ;;  %v600_v44 = vld [vmem:[%s13070_s1 + $0xd38] sm:$0xff] }
 0x1dc   : > { %v8207_v47 = vcombine.high %v599_v42, %v607_v43  ;;  %v8206_v53 = vcombine.low %v599_v42, %v607_v43  ;;  %v8208_v54 = vcombine.low %v600_v44, %v608_v45  ;;  %v8942_v35 = vld [vmem:[%s13071_s2 + $0x4] ss:$16 sps:$4 sm:$0xff]  }
 0x1dd   : > { %v8948_v42 = vld [vmem:[%s13071_s2 + $0x24] ss:$16 sps:$4 sm:$0xff]  }
 0x1de   : > { %3789 = vmatpush1.bf16.msra.mxu0 %v8094_v48  ;;  %3871 = vmatpush1.bf16.msra.mxu1 %v8096_v49  ;;  %v8209_v48 = vcombine.high %v600_v44, %v608_v45  ;;  %v615_v49 = vld [vmem:[%s13070_s1 + $0xdb0] sm:$0xff]  ;;  %v8949_v45 = vld [vmem:[%s13071_s2 + $0x28] ss:$16 sps:$4 sm:$0xff]  }
 0x1df   : > { %3790 = vmatprep.subr.bf16.mxu0 %v8111_v50  ;;  %3872 = vmatprep.subr.bf16.mxu1 %v8113_v51  ;;  %v623_v50 = vld [vmem:[%s13070_s1 + $0xdf0] sm:$0xff]  ;;  %v616_v51 = vld [vmem:[%s13070_s1 + $0xdb8] sm:$0xff] }
 0x1e0   : > { %v8223_v55 = vcombine.high %v615_v49, %v623_v50  ;;  %v8222_v62 = vcombine.low %v615_v49, %v623_v50  ;;  %v8224_v63 = vcombine.low %v616_v51, %v624_v52  ;;  %v8946_v44 = vld [vmem:[%s13071_s2 + $0x20] ss:$16 sps:$4 sm:$0xff]   ;;  %v8963_v49 = vld [vmem:[%s13071_s2 + $0x6c] ss:$16 sps:$4 sm:$0xff]  }
 0x1e1   : > { %v8958_v50 = vld [vmem:[%s13071_s2 + $0x60] ss:$16 sps:$4 sm:$0xff]  }
 0x1e2   : > { %3791 = vmatpush1.bf16.msra.mxu0 %v8110_v56  ;;  %3873 = vmatpush1.bf16.msra.mxu1 %v8112_v58  ;;  %v8225_v56 = vcombine.high %v616_v51, %v624_v52  ;;  %v631_v58 = vld [vmem:[%s13070_s1 + $0xe30] sm:$0xff]  ;;  %v8961_v51 = vld [vmem:[%s13071_s2 + $0x68] ss:$16 sps:$4 sm:$0xff]  }
 0x1e3   : > { %3792 = vmatprep.subr.bf16.mxu0 %v8127_v59  ;;  %3874 = vmatprep.subr.bf16.mxu1 %v8129_v60  ;;  %v639_v59 = vld [vmem:[%s13070_s1 + $0xe70] sm:$0xff]  ;;  %v632_v60 = vld [vmem:[%s13070_s1 + $0xe38] sm:$0xff] }
 0x1e4   : > { %v11332_v4 = vpop.f32.mrb[4].mxu0  ;;  %v11340_v8 = vpop.f32.mrb[4].mxu1  ;;  %v8239_v0 = vcombine.high %v631_v58, %v639_v59  ;;  %v8238_v7 = vcombine.low %v631_v58, %v639_v59  ;;  %v8240_v10 = vcombine.low %v632_v60, %v640_v61  ;;  %v8966_v52 = vld [vmem:[%s13071_s2 + $0x84] ss:$16 sps:$4 sm:$0xff]   ;;  %v8975_v58 = vld [vmem:[%s13071_s2 + $0xac] ss:$16 sps:$4 sm:$0xff]  }
 0x1e5   : > { %v11342_v9 = vpop.f32.mrb[5].mxu0  ;;  %v11350_v13 = vpop.f32.mrb[5].mxu1  ;;  %v8970_v59 = vld [vmem:[%s13071_s2 + $0xa0] ss:$16 sps:$4 sm:$0xff]  }
 0x1e6   : > { %v3492_v14 = vpop.f32.mrb[6].mxu0  ;;  %3793 = vmatpush1.bf16.msra.mxu0 %v8126_v1  ;;  %v3574_v16 = vpop.f32.mrb[6].mxu1  ;;  %3875 = vmatpush1.bf16.msra.mxu1 %v8128_v2  ;;  %v8241_v1 = vcombine.high %v632_v60, %v640_v61  ;;  %v647_v2 = vld [vmem:[%s13070_s1 + $0xeb0] sm:$0xff]  ;;  %v8973_v60 = vld [vmem:[%s13071_s2 + $0xa8] ss:$16 sps:$4 sm:$0xff]  }
 0x1e7   : > { %v3493_v17 = vpop.f32.mrb[7].mxu0  ;;  %3794 = vmatprep.subr.bf16.mxu0 %v8143_v3  ;;  %v3575_v20 = vpop.f32.mrb[7].mxu1  ;;  %3876 = vmatprep.subr.bf16.mxu1 %v8145_v5  ;;  %v655_v3 = vld [vmem:[%s13070_s1 + $0xef0] sm:$0xff]  ;;  %v648_v5 = vld [vmem:[%s13070_s1 + $0xeb8] sm:$0xff] }
 0x1e8   : > { %v8255_v11 = vcombine.high %v647_v2, %v655_v3  ;;  %v8257_v14 = vcombine.high %v648_v5, %v656_v6  ;;  %v671_v16 = vld [vmem:[%s13070_s1 + $0xf70] sm:$0xff]  ;;  %v664_v17 = vld [vmem:[%s13070_s1 + $0xf38] sm:$0xff]  ;;  %v8256_v20 = vcombine.low %v648_v5, %v656_v6 }
 0x1e9   : > { %v8978_v61 = vld [vmem:[%s13071_s2 + $0xc4] ss:$16 sps:$4 sm:$0xff]   ;;  %v8985_v5 = vld [vmem:[%s13071_s2 + $0xe8] ss:$16 sps:$4 sm:$0xff]  }
 0x1ea   : > { %3795 = vmatpush1.bf16.msra.mxu0 %v8142_v15  ;;  %3877 = vmatpush1.bf16.msra.mxu1 %v8144_v18  ;;  %v663_v15 = vld [vmem:[%s13070_s1 + $0xf30] sm:$0xff]  ;;  %v672_v18 = vld [vmem:[%s13070_s1 + $0xf78] sm:$0xff] }
 0x1eb   : > { %3796 = vmatprep.subr.bf16.mxu0 %v8159_v19  ;;  %3878 = vmatprep.subr.bf16.mxu1 %v8161_v21  ;;  %v8254_v19 = vcombine.low %v647_v2, %v655_v3  ;;  %v8271_v21 = vcombine.high %v663_v15, %v671_v16  ;;  %v8273_v22 = vcombine.high %v664_v17, %v672_v18  ;;  %v8987_v2 = vld [vmem:[%s13071_s2 + $0xec] ss:$16 sps:$4 sm:$0xff]   ;;  %v8982_v3 = vld [vmem:[%s13071_s2 + $0xe0] ss:$16 sps:$4 sm:$0xff]   ;;  %v8990_v6 = vld [vmem:[%s13071_s2 + $0x104] ss:$16 sps:$4 sm:$0xff]  }
 0x1ee   : > { %3797 = vmatpush1.bf16.msra.mxu0 %v8158_v28  ;;  %3879 = vmatpush1.bf16.msra.mxu1 %v8160_v29  ;;  %v688_v28 = vld [vmem:[%s13070_s1 + $0xff8] sm:$0xff]  ;;  %v8270_v29 = vcombine.low %v663_v15, %v671_v16  ;;  %v8994_v16 = vld [vmem:[%s13071_s2 + $0x120] ss:$16 sps:$4 sm:$0xff]  }
 0x1ef   : > { %3798 = vmatprep.subr.bf16.mxu0 %v8175_v30  ;;  %3880 = vmatprep.subr.bf16.mxu1 %v8177_v57  ;;  %v8272_v30 = vcombine.low %v664_v17, %v672_v18  ;;  %v8287_v57 = vcombine.high %v679_v25, %v687_v26  ;;  %v8289_v31 = vcombine.high %v680_v27, %v688_v28  ;;  %v8999_v15 = vld [vmem:[%s13071_s2 + $0x12c] ss:$16 sps:$4 sm:$0xff]   ;;  %v8997_v17 = vld [vmem:[%s13071_s2 + $0x128] ss:$16 sps:$4 sm:$0xff]   ;;  %v9002_v18 = vld [vmem:[%s13071_s2 + $0x144] ss:$16 sps:$4 sm:$0xff]  }
 0x1f0   : > { %v8288_v34 = vcombine.low %v680_v27, %v688_v28  ;;  %v9011_v25 = vld [vmem:[%s13071_s2 + $0x16c] ss:$16 sps:$4 sm:$0xff]   ;;  %v9006_v26 = vld [vmem:[%s13071_s2 + $0x160] ss:$16 sps:$4 sm:$0xff]   ;;  %v9009_v27 = vld [vmem:[%s13071_s2 + $0x168] ss:$16 sps:$4 sm:$0xff]  }
 0x1f1   : > { %v9014_v28 = vld [vmem:[%s13071_s2 + $0x184] ss:$16 sps:$4 sm:$0xff]  }
 0x1f2   : > { %3799 = vmatpush1.bf16.msra.mxu0 %v8174_v38  ;;  %3881 = vmatpush1.bf16.msra.mxu1 %v8176_v12  ;;  %v8945_v38 = vld [vmem:[%s13071_s2 + $0xc] ss:$16 sps:$4 sm:$0xff]   ;;  %v3906_v12 = vmax.f32 %v10942_v37, 0.0 }
 0x1f3   : > { %3800 = vmatprep.subr.bf16.mxu0 %v8191_v39  ;;  %3882 = vmatprep.subr.bf16.mxu1 %v8193_v41  ;;  %v8940_v39 = vld [vmem:[%s13071_s2] ss:$16 sps:$4 sm:$0xff]   ;;  %v8943_v41 = vld [vmem:[%s13071_s2 + $0x8] ss:$16 sps:$4 sm:$0xff]   ;;  %v8951_v37 = vld [vmem:[%s13071_s2 + $0x2c] ss:$16 sps:$4 sm:$0xff]  }
 0x1f4   : > { %v3922_v43 = vpack.c.bf16 %v3906_v12, %v3906_v12  ;;  %v9029_v12 = vld [vmem:[%s13071_s2 + $0x1cc] ss:$16 sps:$4 sm:$0xff]  }
 0x1f6   : > { %3801 = vmatpush1.bf16.msra.mxu0 %v8190_v46  ;;  %3883 = vmatpush1.bf16.msra.mxu1 %v8192_v24  ;;  %v8954_v46 = vld [vmem:[%s13071_s2 + $0x44] ss:$16 sps:$4 sm:$0xff]   ;;  %v8952_v24 = vld [vmem:[%s13071_s2 + $0x40] ss:$16 sps:$4 sm:$0xff]  }
 0x1f7   : > { %3802 = vmatprep.subr.bf16.mxu0 %v8207_v47  ;;  %3884 = vmatprep.subr.bf16.mxu1 %v8209_v48  ;;  %v8955_v47 = vld [vmem:[%s13071_s2 + $0x48] ss:$16 sps:$4 sm:$0xff]   ;;  %v8960_v48 = vld [vmem:[%s13071_s2 + $0x64] ss:$16 sps:$4 sm:$0xff]  }
 0x1fa   : > { %3803 = vmatpush1.bf16.msra.mxu0 %v8206_v53  ;;  %3885 = vmatpush1.bf16.msra.mxu1 %v8208_v54  ;;  %v8969_v53 = vld [vmem:[%s13071_s2 + $0x8c] ss:$16 sps:$4 sm:$0xff]   ;;  %v8964_v54 = vld [vmem:[%s13071_s2 + $0x80] ss:$16 sps:$4 sm:$0xff]  }
 0x1fb   : > { %3804 = vmatprep.subr.bf16.mxu0 %v8223_v55  ;;  %3886 = vmatprep.subr.bf16.mxu1 %v8225_v56  ;;  %v8967_v55 = vld [vmem:[%s13071_s2 + $0x88] ss:$16 sps:$4 sm:$0xff]   ;;  %v8972_v56 = vld [vmem:[%s13071_s2 + $0xa4] ss:$16 sps:$4 sm:$0xff]  }
 0x1fe   : > { %3805 = vmatpush1.bf16.msra.mxu0 %v8222_v62  ;;  %3887 = vmatpush1.bf16.msra.mxu1 %v8224_v63  ;;  %v8981_v62 = vld [vmem:[%s13071_s2 + $0xcc] ss:$16 sps:$4 sm:$0xff]   ;;  %v8976_v63 = vld [vmem:[%s13071_s2 + $0xc0] ss:$16 sps:$4 sm:$0xff]  }
 0x1ff   : > { %3806 = vmatprep.subr.bf16.mxu0 %v8239_v0  ;;  %3888 = vmatprep.subr.bf16.mxu1 %v8241_v1  ;;  %v8979_v0 = vld [vmem:[%s13071_s2 + $0xc8] ss:$16 sps:$4 sm:$0xff]   ;;  %v8984_v1 = vld [vmem:[%s13071_s2 + $0xe4] ss:$16 sps:$4 sm:$0xff]  }
 0x202   : > { %3807 = vmatpush1.bf16.msra.mxu0 %v8238_v7  ;;  %3889 = vmatpush1.bf16.msra.mxu1 %v8240_v10  ;;  %v8993_v7 = vld [vmem:[%s13071_s2 + $0x10c] ss:$16 sps:$4 sm:$0xff]   ;;  %v8988_v10 = vld [vmem:[%s13071_s2 + $0x100] ss:$16 sps:$4 sm:$0xff]  }
 0x203   : > { %3808 = vmatprep.subr.bf16.mxu0 %v8255_v11  ;;  %3890 = vmatprep.subr.bf16.mxu1 %v8257_v14  ;;  %v8991_v11 = vld [vmem:[%s13071_s2 + $0x108] ss:$16 sps:$4 sm:$0xff]   ;;  %v8996_v14 = vld [vmem:[%s13071_s2 + $0x124] ss:$16 sps:$4 sm:$0xff]  }
 0x206   : > { %3809 = vmatpush1.bf16.msra.mxu0 %v8254_v19  ;;  %3891 = vmatpush1.bf16.msra.mxu1 %v8256_v20  ;;  %v9005_v19 = vld [vmem:[%s13071_s2 + $0x14c] ss:$16 sps:$4 sm:$0xff]   ;;  %v9000_v20 = vld [vmem:[%s13071_s2 + $0x140] ss:$16 sps:$4 sm:$0xff]  }
 0x207   : > { %3810 = vmatprep.subr.bf16.mxu0 %v8271_v21  ;;  %3892 = vmatprep.subr.bf16.mxu1 %v8273_v22  ;;  %v9003_v21 = vld [vmem:[%s13071_s2 + $0x148] ss:$16 sps:$4 sm:$0xff]   ;;  %v9008_v22 = vld [vmem:[%s13071_s2 + $0x164] ss:$16 sps:$4 sm:$0xff]  }
 0x20a   : > { %3811 = vmatpush1.bf16.msra.mxu0 %v8270_v29  ;;  %3893 = vmatpush1.bf16.msra.mxu1 %v8272_v30  ;;  %v9017_v29 = vld [vmem:[%s13071_s2 + $0x18c] ss:$16 sps:$4 sm:$0xff]   ;;  %v9012_v30 = vld [vmem:[%s13071_s2 + $0x180] ss:$16 sps:$4 sm:$0xff]  }
 0x20b   : > { %3812 = vmatprep.subr.bf16.mxu0 %v8287_v57  ;;  %3894 = vmatprep.subr.bf16.mxu1 %v8289_v31  ;;  %v9015_v57 = vld [vmem:[%s13071_s2 + $0x188] ss:$16 sps:$4 sm:$0xff]   ;;  %v9020_v31 = vld [vmem:[%s13071_s2 + $0x1a4] ss:$16 sps:$4 sm:$0xff]  }
 0x20e   : > { %3813 = vmatpush1.bf16.msra.mxu0 %v8286_v33  ;;  %3895 = vmatpush1.bf16.msra.mxu1 %v8288_v34  ;;  %v9023_v33 = vld [vmem:[%s13071_s2 + $0x1ac] ss:$16 sps:$4 sm:$0xff]   ;;  %v9018_v34 = vld [vmem:[%s13071_s2 + $0x1a0] ss:$16 sps:$4 sm:$0xff]  }
 0x20f   : > { %7009 = vmatprep.subr.bf16.mxu0 %v8942_v35  ;;  %7337 = vmatprep.subr.bf16.mxu1 %v8945_v38  ;;  %v9021_v35 = vld [vmem:[%s13071_s2 + $0x1a8] ss:$16 sps:$4 sm:$0xff]   ;;  %v9026_v38 = vld [vmem:[%s13071_s2 + $0x1c4] ss:$16 sps:$4 sm:$0xff]  }
 0x211   : > { %3815 = vmatmul.mubr.bf16.vlgmr.msra.gmra.mrb[12].mxu0 %v10278_v23  ;;  %3897 = vmatmul.mubr.bf16.vlgmr.msra.gmra.mrb[12].mxu1 %v10278_v23  ;;  %v8957_v23 = vld [vmem:[%s13071_s2 + $0x4c] ss:$16 sps:$4 sm:$0xff]  }
 0x212   : > { %7010 = vmatpush1.bf16.msra.mxu0 %v8940_v39  ;;  %7041 = vmatprep.mubr.bf16.mxu0 %v3922_v43  ;;  %v9024_v39 = vld [vmem:[%s13071_s2 + $0x1c0] ss:$16 sps:$4 sm:$0xff]  }
 0x213   : > { %7338 = vmatpush1.bf16.msra.mxu1 %v8943_v41  ;;  %7369 = vmatprep.mubr.bf16.mxu1 %v3922_v43  ;;  %v9027_v41 = vld [vmem:[%s13071_s2 + $0x1c8] ss:$16 sps:$4 sm:$0xff]   ;;  %v9035_v43 = vld [vmem:[%s13071_s2 + $0x1ec] ss:$16 sps:$4 sm:$0xff]  }
 0x214   : > { %7011 = vmatprep.subr.bf16.mxu0 %v8948_v42  ;;  %7339 = vmatprep.subr.bf16.mxu1 %v8951_v37  ;;  %v9032_v42 = vld [vmem:[%s13071_s2 + $0x1e4] ss:$16 sps:$4 sm:$0xff]   ;;  %v9030_v37 = vld [vmem:[%s13071_s2 + $0x1e0] ss:$16 sps:$4 sm:$0xff]  }
 0x216   : > { %7012 = vmatpush1.bf16.msra.mxu0 %v8946_v44  ;;  %v3905_v44 = vmax.f32 %v10932_v32, 0.0  ;;  %v9036_v32 = vld [vmem:[%s13071_s2 + $0x200] ss:$16 sps:$4 sm:$0xff]  }
 0x217   : > { %7340 = vmatpush1.bf16.msra.mxu1 %v8949_v45  ;;  %7013 = vmatprep.subr.bf16.mxu0 %v8954_v46  ;;  %v9033_v45 = vld [vmem:[%s13071_s2 + $0x1e8] ss:$16 sps:$4 sm:$0xff]   ;;  %v9038_v46 = vld [vmem:[%s13071_s2 + $0x204] ss:$16 sps:$4 sm:$0xff]  }
 0x218   : > { %7341 = vmatprep.subr.bf16.mxu1 %v8957_v23  ;;  %v9041_v23 = vld [vmem:[%s13071_s2 + $0x20c] ss:$16 sps:$4 sm:$0xff]  }
 0x21a   : > { %7014 = vmatpush1.bf16.msra.mxu0 %v8952_v24  ;;  %v3908_v24 = vmax.f32 %v10950_v40, 0.0  ;;  %v9047_v40 = vld [vmem:[%s13071_s2 + $0x22c] ss:$16 sps:$4 sm:$0xff]  }
 0x21b   : > { %7342 = vmatpush1.bf16.msra.mxu1 %v8955_v47  ;;  %7015 = vmatprep.subr.bf16.mxu0 %v8960_v48  ;;  %v3921_v47 = vpack.c.bf16 %v3905_v44, %v3905_v44  ;;  %v9039_v48 = vld [vmem:[%s13071_s2 + $0x208] ss:$16 sps:$4 sm:$0xff]   ;;  %v9102_v44 = vld [vmem:[%s13071_s2 + $0x360] ss:$16 sps:$4 sm:$0xff]  }
 0x21c   : > { %7343 = vmatprep.subr.bf16.mxu1 %v8963_v49  ;;  %v9044_v49 = vld [vmem:[%s13071_s2 + $0x224] ss:$16 sps:$4 sm:$0xff]  }
 0x21e   : > { %7016 = vmatpush1.bf16.msra.mxu0 %v8958_v50  ;;  %v3924_v50 = vpack.c.bf16 %v3908_v24, %v3908_v24  ;;  %v9108_v24 = vld [vmem:[%s13071_s2 + $0x380] ss:$16 sps:$4 sm:$0xff]  }
 0x21f   : > { %7344 = vmatpush1.bf16.msra.mxu1 %v8961_v51  ;;  %7017 = vmatprep.subr.bf16.mxu0 %v8966_v52  ;;  %v9042_v51 = vld [vmem:[%s13071_s2 + $0x220] ss:$16 sps:$4 sm:$0xff]   ;;  %v9045_v52 = vld [vmem:[%s13071_s2 + $0x228] ss:$16 sps:$4 sm:$0xff]  }
 0x220   : > { %7345 = vmatprep.subr.bf16.mxu1 %v8969_v53  ;;  %v9050_v53 = vld [vmem:[%s13071_s2 + $0x244] ss:$16 sps:$4 sm:$0xff]  }
 0x222   : > { %7018 = vmatpush1.bf16.msra.mxu0 %v8964_v54  ;;  %v9053_v54 = vld [vmem:[%s13071_s2 + $0x24c] ss:$16 sps:$4 sm:$0xff]  }
 0x223   : > { %7346 = vmatpush1.bf16.msra.mxu1 %v8967_v55  ;;  %7019 = vmatprep.subr.bf16.mxu0 %v8972_v56  ;;  %v9048_v55 = vld [vmem:[%s13071_s2 + $0x240] ss:$16 sps:$4 sm:$0xff]   ;;  %v9051_v56 = vld [vmem:[%s13071_s2 + $0x248] ss:$16 sps:$4 sm:$0xff]  }
 0x224   : > { %7347 = vmatprep.subr.bf16.mxu1 %v8975_v58  ;;  %v9056_v58 = vld [vmem:[%s13071_s2 + $0x264] ss:$16 sps:$4 sm:$0xff]  }
 0x226   : > { %7020 = vmatpush1.bf16.msra.mxu0 %v8970_v59  ;;  %v9059_v59 = vld [vmem:[%s13071_s2 + $0x26c] ss:$16 sps:$4 sm:$0xff]  }
 0x227   : > { %7348 = vmatpush1.bf16.msra.mxu1 %v8973_v60  ;;  %7021 = vmatprep.subr.bf16.mxu0 %v8978_v61  ;;  %v9054_v60 = vld [vmem:[%s13071_s2 + $0x260] ss:$16 sps:$4 sm:$0xff]   ;;  %v9057_v61 = vld [vmem:[%s13071_s2 + $0x268] ss:$16 sps:$4 sm:$0xff]  }
 0x228   : > { %7349 = vmatprep.subr.bf16.mxu1 %v8981_v62  ;;  %v9062_v62 = vld [vmem:[%s13071_s2 + $0x284] ss:$16 sps:$4 sm:$0xff]  }
 0x22a   : > { %7022 = vmatpush1.bf16.msra.mxu0 %v8976_v63  ;;  %v9065_v63 = vld [vmem:[%s13071_s2 + $0x28c] ss:$16 sps:$4 sm:$0xff]  }
 0x22b   : > { %7350 = vmatpush1.bf16.msra.mxu1 %v8979_v0  ;;  %7023 = vmatprep.subr.bf16.mxu0 %v8984_v1  ;;  %v9060_v0 = vld [vmem:[%s13071_s2 + $0x280] ss:$16 sps:$4 sm:$0xff]   ;;  %v9063_v1 = vld [vmem:[%s13071_s2 + $0x288] ss:$16 sps:$4 sm:$0xff]  }
 0x22c   : > { %7351 = vmatprep.subr.bf16.mxu1 %v8987_v2  ;;  %v9068_v2 = vld [vmem:[%s13071_s2 + $0x2a4] ss:$16 sps:$4 sm:$0xff]  }
 0x22e   : > { %7024 = vmatpush1.bf16.msra.mxu0 %v8982_v3  ;;  %v9071_v3 = vld [vmem:[%s13071_s2 + $0x2ac] ss:$16 sps:$4 sm:$0xff]  }
 0x22f   : > { %7352 = vmatpush1.bf16.msra.mxu1 %v8985_v5  ;;  %7025 = vmatprep.subr.bf16.mxu0 %v8990_v6  ;;  %v9066_v5 = vld [vmem:[%s13071_s2 + $0x2a0] ss:$16 sps:$4 sm:$0xff]   ;;  %v9069_v6 = vld [vmem:[%s13071_s2 + $0x2a8] ss:$16 sps:$4 sm:$0xff]  }
 0x230   : > { %7353 = vmatprep.subr.bf16.mxu1 %v8993_v7  ;;  %v9074_v7 = vld [vmem:[%s13071_s2 + $0x2c4] ss:$16 sps:$4 sm:$0xff]  }
 0x232   : > { %7026 = vmatpush1.bf16.msra.mxu0 %v8988_v10 }
 0x233   : > { %7354 = vmatpush1.bf16.msra.mxu1 %v8991_v11  ;;  %7027 = vmatprep.subr.bf16.mxu0 %v8996_v14  ;;  %v9077_v11 = vld [vmem:[%s13071_s2 + $0x2cc] ss:$16 sps:$4 sm:$0xff]  }
 0x234   : > { %7355 = vmatprep.subr.bf16.mxu1 %v8999_v15 }
 0x236   : > { %7028 = vmatpush1.bf16.msra.mxu0 %v8994_v16 }
 0x237   : > { %7356 = vmatpush1.bf16.msra.mxu1 %v8997_v17  ;;  %7029 = vmatprep.subr.bf16.mxu0 %v9002_v18  ;;  %v9072_v18 = vld [vmem:[%s13071_s2 + $0x2c0] ss:$16 sps:$4 sm:$0xff]  }
 0x238   : > { %7357 = vmatprep.subr.bf16.mxu1 %v9005_v19 }
 0x23a   : > { %7030 = vmatpush1.bf16.msra.mxu0 %v9000_v20 }
 0x23b   : > { %7358 = vmatpush1.bf16.msra.mxu1 %v9003_v21  ;;  %7031 = vmatprep.subr.bf16.mxu0 %v9008_v22  ;;  %v9075_v21 = vld [vmem:[%s13071_s2 + $0x2c8] ss:$16 sps:$4 sm:$0xff]   ;;  %v9080_v22 = vld [vmem:[%s13071_s2 + $0x2e4] ss:$16 sps:$4 sm:$0xff]  }
 0x23c   : > { %7359 = vmatprep.subr.bf16.mxu1 %v9011_v25 }
 0x23e   : > { %7032 = vmatpush1.bf16.msra.mxu0 %v9006_v26  ;;  %v9083_v26 = vld [vmem:[%s13071_s2 + $0x2ec] ss:$16 sps:$4 sm:$0xff]  }
 0x23f   : > { %7360 = vmatpush1.bf16.msra.mxu1 %v9009_v27  ;;  %7033 = vmatprep.subr.bf16.mxu0 %v9014_v28  ;;  %v9078_v27 = vld [vmem:[%s13071_s2 + $0x2e0] ss:$16 sps:$4 sm:$0xff]   ;;  %v9081_v28 = vld [vmem:[%s13071_s2 + $0x2e8] ss:$16 sps:$4 sm:$0xff]  }
 0x240   : > { %7361 = vmatprep.subr.bf16.mxu1 %v9017_v29  ;;  %v9086_v29 = vld [vmem:[%s13071_s2 + $0x304] ss:$16 sps:$4 sm:$0xff]  }
 0x242   : > { %7034 = vmatpush1.bf16.msra.mxu0 %v9012_v30  ;;  %v9089_v30 = vld [vmem:[%s13071_s2 + $0x30c] ss:$16 sps:$4 sm:$0xff]  }
 0x243   : > { %7362 = vmatpush1.bf16.msra.mxu1 %v9015_v57  ;;  %7035 = vmatprep.subr.bf16.mxu0 %v9020_v31  ;;  %v9084_v57 = vld [vmem:[%s13071_s2 + $0x300] ss:$16 sps:$4 sm:$0xff]   ;;  %v9087_v31 = vld [vmem:[%s13071_s2 + $0x308] ss:$16 sps:$4 sm:$0xff]  }
 0x244   : > { %7363 = vmatprep.subr.bf16.mxu1 %v9023_v33  ;;  %v9092_v33 = vld [vmem:[%s13071_s2 + $0x324] ss:$16 sps:$4 sm:$0xff]  }
 0x246   : > { %7036 = vmatpush1.bf16.msra.mxu0 %v9018_v34  ;;  %v9095_v34 = vld [vmem:[%s13071_s2 + $0x32c] ss:$16 sps:$4 sm:$0xff]  }
 0x247   : > { %7364 = vmatpush1.bf16.msra.mxu1 %v9021_v35  ;;  %7037 = vmatprep.subr.bf16.mxu0 %v9026_v38  ;;  %v9090_v35 = vld [vmem:[%s13071_s2 + $0x320] ss:$16 sps:$4 sm:$0xff]   ;;  %v9093_v38 = vld [vmem:[%s13071_s2 + $0x328] ss:$16 sps:$4 sm:$0xff]  }
 0x248   : > { %7365 = vmatprep.subr.bf16.mxu1 %v9029_v12  ;;  %v9098_v12 = vld [vmem:[%s13071_s2 + $0x344] ss:$16 sps:$4 sm:$0xff]  }
 0x24a   : > { %7038 = vmatpush1.bf16.msra.mxu0 %v9024_v39  ;;  %v9101_v39 = vld [vmem:[%s13071_s2 + $0x34c] ss:$16 sps:$4 sm:$0xff]  }
 0x24b   : > { %7366 = vmatpush1.bf16.msra.mxu1 %v9027_v41  ;;  %7039 = vmatprep.subr.bf16.mxu0 %v9032_v42  ;;  %v9096_v41 = vld [vmem:[%s13071_s2 + $0x340] ss:$16 sps:$4 sm:$0xff]   ;;  %v9099_v42 = vld [vmem:[%s13071_s2 + $0x348] ss:$16 sps:$4 sm:$0xff]  }
 0x24c   : > { %7367 = vmatprep.subr.bf16.mxu1 %v9035_v43  ;;  %v9104_v43 = vld [vmem:[%s13071_s2 + $0x364] ss:$16 sps:$4 sm:$0xff]  }
 0x24e   : > { %7040 = vmatpush1.bf16.msra.mxu0 %v9030_v37  ;;  %v9107_v37 = vld [vmem:[%s13071_s2 + $0x36c] ss:$16 sps:$4 sm:$0xff]  }
 0x24f   : > { %7368 = vmatpush1.bf16.msra.mxu1 %v9033_v45  ;;  %7050 = vmatprep.subr.bf16.mxu0 %v9038_v46  ;;  %v9105_v45 = vld [vmem:[%s13071_s2 + $0x368] ss:$16 sps:$4 sm:$0xff]   ;;  %v9110_v46 = vld [vmem:[%s13071_s2 + $0x384] ss:$16 sps:$4 sm:$0xff]  }
 0x250   : > { %7378 = vmatprep.subr.bf16.mxu1 %v9041_v23  ;;  %v9113_v23 = vld [vmem:[%s13071_s2 + $0x38c] ss:$16 sps:$4 sm:$0xff]  }
 0x251   : > { %7042 = vmatmul.mubr.bf16.vlgmr.msra.gmra.mrb[16].mxu0 %v3921_v47 }
 0x252   : > { %7370 = vmatmul.mubr.bf16.vlgmr.msra.gmra.mrb[16].mxu1 %v3921_v47  ;;  %7051 = vmatpush1.bf16.msra.mxu0 %v9036_v32  ;;  %v9111_v32 = vld [vmem:[%s13071_s2 + $0x388] ss:$16 sps:$4 sm:$0xff]   ;;  %v9116_v47 = vld [vmem:[%s13071_s2 + $0x3a4] ss:$16 sps:$4 sm:$0xff]  }
 0x253   : > { %7082 = vmatprep.mubr.bf16.mxu0 %v3924_v50  ;;  %7379 = vmatpush1.bf16.msra.mxu1 %v9039_v48  ;;  %v9119_v48 = vld [vmem:[%s13071_s2 + $0x3ac] ss:$16 sps:$4 sm:$0xff]  }
 0x254   : > { %7410 = vmatprep.mubr.bf16.mxu1 %v3924_v50  ;;  %7052 = vmatprep.subr.bf16.mxu0 %v9044_v49  ;;  %v9114_v49 = vld [vmem:[%s13071_s2 + $0x3a0] ss:$16 sps:$4 sm:$0xff]   ;;  %v9117_v50 = vld [vmem:[%s13071_s2 + $0x3a8] ss:$16 sps:$4 sm:$0xff]  }
 0x255   : > { %7380 = vmatprep.subr.bf16.mxu1 %v9047_v40  ;;  %v9122_v40 = vld [vmem:[%s13071_s2 + $0x3c4] ss:$16 sps:$4 sm:$0xff]  }
 0x256   : > { %7053 = vmatpush1.bf16.msra.mxu0 %v9042_v51  ;;  %v9125_v51 = vld [vmem:[%s13071_s2 + $0x3cc] ss:$16 sps:$4 sm:$0xff]  }
 0x257   : > { %7381 = vmatpush1.bf16.msra.mxu1 %v9045_v52  ;;  %7054 = vmatprep.subr.bf16.mxu0 %v9050_v53  ;;  %v9120_v52 = vld [vmem:[%s13071_s2 + $0x3c0] ss:$16 sps:$4 sm:$0xff]   ;;  %v9123_v53 = vld [vmem:[%s13071_s2 + $0x3c8] ss:$16 sps:$4 sm:$0xff]  }
 0x258   : > { %7382 = vmatprep.subr.bf16.mxu1 %v9053_v54  ;;  %v9128_v54 = vld [vmem:[%s13071_s2 + $0x3e4] ss:$16 sps:$4 sm:$0xff]  }
 0x25a   : > { %7055 = vmatpush1.bf16.msra.mxu0 %v9048_v55  ;;  %v9131_v55 = vld [vmem:[%s13071_s2 + $0x3ec] ss:$16 sps:$4 sm:$0xff]  }
 0x25b   : > { %7383 = vmatpush1.bf16.msra.mxu1 %v9051_v56  ;;  %7056 = vmatprep.subr.bf16.mxu0 %v9056_v58  ;;  %v9126_v56 = vld [vmem:[%s13071_s2 + $0x3e0] ss:$16 sps:$4 sm:$0xff]   ;;  %v3907_v58 = vmax.f32 %v10940_v36, 0.0 }
 0x25c   : > { %7384 = vmatprep.subr.bf16.mxu1 %v9059_v59  ;;  %v9129_v59 = vld [vmem:[%s13071_s2 + $0x3e8] ss:$16 sps:$4 sm:$0xff]   ;;  %v9132_v36 = vld [vmem:[%s13071_s2 + $0x400] ss:$16 sps:$4 sm:$0xff]  }
 0x25e   : > { %7057 = vmatpush1.bf16.msra.mxu0 %v9054_v60  ;;  %v9134_v60 = vld [vmem:[%s13071_s2 + $0x404] ss:$16 sps:$4 sm:$0xff]  }
 0x25f   : > { %7385 = vmatpush1.bf16.msra.mxu1 %v9057_v61  ;;  %7058 = vmatprep.subr.bf16.mxu0 %v9062_v62  ;;  %v9137_v61 = vld [vmem:[%s13071_s2 + $0x40c] ss:$16 sps:$4 sm:$0xff]   ;;  %v3910_v62 = vmax.f32 %v11342_v9, 0.0 }
 0x260   : > { %7386 = vmatprep.subr.bf16.mxu1 %v9065_v63  ;;  %v3923_v63 = vpack.c.bf16 %v3907_v58, %v3907_v58  ;;  %v9143_v9 = vld [vmem:[%s13071_s2 + $0x42c] ss:$16 sps:$4 sm:$0xff]   ;;  %v9212_v58 = vld [vmem:[%s13071_s2 + $0x5a4] ss:$16 sps:$4 sm:$0xff]  }
 0x262   : > { %7059 = vmatpush1.bf16.msra.mxu0 %v9060_v0  ;;  %v9135_v0 = vld [vmem:[%s13071_s2 + $0x408] ss:$16 sps:$4 sm:$0xff]  }
 0x263   : > { %7387 = vmatpush1.bf16.msra.mxu1 %v9063_v1  ;;  %7060 = vmatprep.subr.bf16.mxu0 %v9068_v2  ;;  %v9140_v1 = vld [vmem:[%s13071_s2 + $0x424] ss:$16 sps:$4 sm:$0xff]   ;;  %v3926_v2 = vpack.c.bf16 %v3910_v62, %v3910_v62 }
 0x264   : > { %v11720_v10 = vpop.f32.mrb[8].mxu0  ;;  %7388 = vmatprep.subr.bf16.mxu1 %v9071_v3  ;;  %v11725_v14 = vpop.f32.mrb[8].mxu1  ;;  %v9138_v3 = vld [vmem:[%s13071_s2 + $0x420] ss:$16 sps:$4 sm:$0xff]   ;;  %v9218_v62 = vld [vmem:[%s13071_s2 + $0x5c4] ss:$16 sps:$4 sm:$0xff]  }
 0x265   : > { %v11727_v15 = vpop.f32.mrb[9].mxu0  ;;  %v11729_v16 = vpop.f32.mrb[9].mxu1 }
 0x266   : > { %v3656_v17 = vpop.f32.mrb[10].mxu0  ;;  %7061 = vmatpush1.bf16.msra.mxu0 %v9066_v5  ;;  %v3738_v19 = vpop.f32.mrb[10].mxu1  ;;  %v9141_v5 = vld [vmem:[%s13071_s2 + $0x428] ss:$16 sps:$4 sm:$0xff]  }
 0x267   : > { %7389 = vmatpush1.bf16.msra.mxu1 %v9069_v6  ;;  %v3657_v20 = vpop.f32.mrb[11].mxu0  ;;  %7062 = vmatprep.subr.bf16.mxu0 %v9074_v7  ;;  %v3739_v25 = vpop.f32.mrb[11].mxu1  ;;  %v9146_v6 = vld [vmem:[%s13071_s2 + $0x444] ss:$16 sps:$4 sm:$0xff]   ;;  %v9149_v7 = vld [vmem:[%s13071_s2 + $0x44c] ss:$16 sps:$4 sm:$0xff]  }
 0x268   : > { %7390 = vmatprep.subr.bf16.mxu1 %v9077_v11  ;;  %v9144_v11 = vld [vmem:[%s13071_s2 + $0x440] ss:$16 sps:$4 sm:$0xff]   ;;  %v9147_v17 = vld [vmem:[%s13071_s2 + $0x448] ss:$16 sps:$4 sm:$0xff]   ;;  %v9155_v19 = vld [vmem:[%s13071_s2 + $0x46c] ss:$16 sps:$4 sm:$0xff]  }
 0x269   : > { %v9150_v20 = vld [vmem:[%s13071_s2 + $0x460] ss:$16 sps:$4 sm:$0xff]   ;;  %v9161_v25 = vld [vmem:[%s13071_s2 + $0x48c] ss:$16 sps:$4 sm:$0xff]  }
 0x26a   : > { %7063 = vmatpush1.bf16.msra.mxu0 %v9072_v18  ;;  %v9152_v18 = vld [vmem:[%s13071_s2 + $0x464] ss:$16 sps:$4 sm:$0xff]  }
 0x26b   : > { %7391 = vmatpush1.bf16.msra.mxu1 %v9075_v21  ;;  %7064 = vmatprep.subr.bf16.mxu0 %v9080_v22  ;;  %v9153_v21 = vld [vmem:[%s13071_s2 + $0x468] ss:$16 sps:$4 sm:$0xff]   ;;  %v9158_v22 = vld [vmem:[%s13071_s2 + $0x484] ss:$16 sps:$4 sm:$0xff]  }
 0x26c   : > { %7392 = vmatprep.subr.bf16.mxu1 %v9083_v26  ;;  %v9156_v26 = vld [vmem:[%s13071_s2 + $0x480] ss:$16 sps:$4 sm:$0xff]  }
 0x26e   : > { %7065 = vmatpush1.bf16.msra.mxu0 %v9078_v27  ;;  %v9159_v27 = vld [vmem:[%s13071_s2 + $0x488] ss:$16 sps:$4 sm:$0xff]  }
 0x26f   : > { %7393 = vmatpush1.bf16.msra.mxu1 %v9081_v28  ;;  %7066 = vmatprep.subr.bf16.mxu0 %v9086_v29  ;;  %v9164_v28 = vld [vmem:[%s13071_s2 + $0x4a4] ss:$16 sps:$4 sm:$0xff]   ;;  %v9167_v29 = vld [vmem:[%s13071_s2 + $0x4ac] ss:$16 sps:$4 sm:$0xff]  }
 0x270   : > { %7394 = vmatprep.subr.bf16.mxu1 %v9089_v30  ;;  %v9162_v30 = vld [vmem:[%s13071_s2 + $0x4a0] ss:$16 sps:$4 sm:$0xff]  }
 0x272   : > { %7067 = vmatpush1.bf16.msra.mxu0 %v9084_v57  ;;  %v9165_v57 = vld [vmem:[%s13071_s2 + $0x4a8] ss:$16 sps:$4 sm:$0xff]  }
 0x273   : > { %7395 = vmatpush1.bf16.msra.mxu1 %v9087_v31  ;;  %7068 = vmatprep.subr.bf16.mxu0 %v9092_v33  ;;  %v9170_v31 = vld [vmem:[%s13071_s2 + $0x4c4] ss:$16 sps:$4 sm:$0xff]   ;;  %v9173_v33 = vld [vmem:[%s13071_s2 + $0x4cc] ss:$16 sps:$4 sm:$0xff]  }
 0x274   : > { %7396 = vmatprep.subr.bf16.mxu1 %v9095_v34  ;;  %v9168_v34 = vld [vmem:[%s13071_s2 + $0x4c0] ss:$16 sps:$4 sm:$0xff]  }
 0x276   : > { %7069 = vmatpush1.bf16.msra.mxu0 %v9090_v35  ;;  %v9171_v35 = vld [vmem:[%s13071_s2 + $0x4c8] ss:$16 sps:$4 sm:$0xff]  }
 0x277   : > { %7397 = vmatpush1.bf16.msra.mxu1 %v9093_v38  ;;  %7070 = vmatprep.subr.bf16.mxu0 %v9098_v12  ;;  %v9176_v38 = vld [vmem:[%s13071_s2 + $0x4e4] ss:$16 sps:$4 sm:$0xff]   ;;  %v9179_v12 = vld [vmem:[%s13071_s2 + $0x4ec] ss:$16 sps:$4 sm:$0xff]  }
 0x278   : > { %7398 = vmatprep.subr.bf16.mxu1 %v9101_v39  ;;  %v9174_v39 = vld [vmem:[%s13071_s2 + $0x4e0] ss:$16 sps:$4 sm:$0xff]  }
 0x27a   : > { %7071 = vmatpush1.bf16.msra.mxu0 %v9096_v41  ;;  %v9177_v41 = vld [vmem:[%s13071_s2 + $0x4e8] ss:$16 sps:$4 sm:$0xff]  }
 0x27b   : > { %7399 = vmatpush1.bf16.msra.mxu1 %v9099_v42  ;;  %7072 = vmatprep.subr.bf16.mxu0 %v9104_v43  ;;  %v9182_v42 = vld [vmem:[%s13071_s2 + $0x504] ss:$16 sps:$4 sm:$0xff]   ;;  %v9185_v43 = vld [vmem:[%s13071_s2 + $0x50c] ss:$16 sps:$4 sm:$0xff]  }
 0x27c   : > { %7400 = vmatprep.subr.bf16.mxu1 %v9107_v37  ;;  %v9180_v37 = vld [vmem:[%s13071_s2 + $0x500] ss:$16 sps:$4 sm:$0xff]  }
 0x27e   : > { %7073 = vmatpush1.bf16.msra.mxu0 %v9102_v44  ;;  %v9183_v44 = vld [vmem:[%s13071_s2 + $0x508] ss:$16 sps:$4 sm:$0xff]  }
 0x27f   : > { %7401 = vmatpush1.bf16.msra.mxu1 %v9105_v45  ;;  %7074 = vmatprep.subr.bf16.mxu0 %v9110_v46  ;;  %v9188_v45 = vld [vmem:[%s13071_s2 + $0x524] ss:$16 sps:$4 sm:$0xff]   ;;  %v9191_v46 = vld [vmem:[%s13071_s2 + $0x52c] ss:$16 sps:$4 sm:$0xff]  }
 0x280   : > { %7402 = vmatprep.subr.bf16.mxu1 %v9113_v23  ;;  %v9186_v23 = vld [vmem:[%s13071_s2 + $0x520] ss:$16 sps:$4 sm:$0xff]  }
 0x282   : > { %7075 = vmatpush1.bf16.msra.mxu0 %v9108_v24  ;;  %v9189_v24 = vld [vmem:[%s13071_s2 + $0x528] ss:$16 sps:$4 sm:$0xff]  }
 0x283   : > { %7403 = vmatpush1.bf16.msra.mxu1 %v9111_v32  ;;  %7076 = vmatprep.subr.bf16.mxu0 %v9116_v47  ;;  %v9194_v32 = vld [vmem:[%s13071_s2 + $0x544] ss:$16 sps:$4 sm:$0xff]   ;;  %v9197_v47 = vld [vmem:[%s13071_s2 + $0x54c] ss:$16 sps:$4 sm:$0xff]  }
 0x284   : > { %7404 = vmatprep.subr.bf16.mxu1 %v9119_v48  ;;  %v9192_v48 = vld [vmem:[%s13071_s2 + $0x540] ss:$16 sps:$4 sm:$0xff]  }
 0x286   : > { %7077 = vmatpush1.bf16.msra.mxu0 %v9114_v49  ;;  %v9195_v49 = vld [vmem:[%s13071_s2 + $0x548] ss:$16 sps:$4 sm:$0xff]  }
 0x287   : > { %7405 = vmatpush1.bf16.msra.mxu1 %v9117_v50  ;;  %7078 = vmatprep.subr.bf16.mxu0 %v9122_v40  ;;  %v9200_v50 = vld [vmem:[%s13071_s2 + $0x564] ss:$16 sps:$4 sm:$0xff]   ;;  %v9203_v40 = vld [vmem:[%s13071_s2 + $0x56c] ss:$16 sps:$4 sm:$0xff]  }
 0x288   : > { %7406 = vmatprep.subr.bf16.mxu1 %v9125_v51  ;;  %v9198_v51 = vld [vmem:[%s13071_s2 + $0x560] ss:$16 sps:$4 sm:$0xff]  }
 0x28a   : > { %7079 = vmatpush1.bf16.msra.mxu0 %v9120_v52  ;;  %v9201_v52 = vld [vmem:[%s13071_s2 + $0x568] ss:$16 sps:$4 sm:$0xff]  }
 0x28b   : > { %7407 = vmatpush1.bf16.msra.mxu1 %v9123_v53  ;;  %7080 = vmatprep.subr.bf16.mxu0 %v9128_v54  ;;  %v9206_v53 = vld [vmem:[%s13071_s2 + $0x584] ss:$16 sps:$4 sm:$0xff]   ;;  %v9209_v54 = vld [vmem:[%s13071_s2 + $0x58c] ss:$16 sps:$4 sm:$0xff]  }
 0x28c   : > { %7408 = vmatprep.subr.bf16.mxu1 %v9131_v55  ;;  %v9204_v55 = vld [vmem:[%s13071_s2 + $0x580] ss:$16 sps:$4 sm:$0xff]  }
 0x28e   : > { %7081 = vmatpush1.bf16.msra.mxu0 %v9126_v56  ;;  %v9207_v56 = vld [vmem:[%s13071_s2 + $0x588] ss:$16 sps:$4 sm:$0xff]  }
 0x28f   : > { %7409 = vmatpush1.bf16.msra.mxu1 %v9129_v59  ;;  %7091 = vmatprep.subr.bf16.mxu0 %v9134_v60  ;;  %v9215_v59 = vld [vmem:[%s13071_s2 + $0x5ac] ss:$16 sps:$4 sm:$0xff]   ;;  %v9210_v60 = vld [vmem:[%s13071_s2 + $0x5a0] ss:$16 sps:$4 sm:$0xff]  }
 0x290   : > { %7419 = vmatprep.subr.bf16.mxu1 %v9137_v61  ;;  %v9213_v61 = vld [vmem:[%s13071_s2 + $0x5a8] ss:$16 sps:$4 sm:$0xff]  }
 0x291   : > { %7083 = vmatmul.mubr.bf16.vlgmr.msra.gmra.mrb[16].mxu0 %v3923_v63 }
 0x292   : > { %7411 = vmatmul.mubr.bf16.vlgmr.msra.gmra.mrb[16].mxu1 %v3923_v63  ;;  %7092 = vmatpush1.bf16.msra.mxu0 %v9132_v36  ;;  %v9221_v36 = vld [vmem:[%s13071_s2 + $0x5cc] ss:$16 sps:$4 sm:$0xff]   ;;  %v9216_v63 = vld [vmem:[%s13071_s2 + $0x5c0] ss:$16 sps:$4 sm:$0xff]  }
 0x293   : > { %7123 = vmatprep.mubr.bf16.mxu0 %v3926_v2  ;;  %7420 = vmatpush1.bf16.msra.mxu1 %v9135_v0  ;;  %v9219_v0 = vld [vmem:[%s13071_s2 + $0x5c8] ss:$16 sps:$4 sm:$0xff]  }
 0x294   : > { %7451 = vmatprep.mubr.bf16.mxu1 %v3926_v2  ;;  %7093 = vmatprep.subr.bf16.mxu0 %v9140_v1  ;;  %v9224_v1 = vld [vmem:[%s13071_s2 + $0x5e4] ss:$16 sps:$4 sm:$0xff]   ;;  %v9227_v2 = vld [vmem:[%s13071_s2 + $0x5ec] ss:$16 sps:$4 sm:$0xff]  }
 0x295   : > { %7421 = vmatprep.subr.bf16.mxu1 %v9143_v9  ;;  %v9222_v9 = vld [vmem:[%s13071_s2 + $0x5e0] ss:$16 sps:$4 sm:$0xff]  }
 0x296   : > { %7094 = vmatpush1.bf16.msra.mxu0 %v9138_v3  ;;  %v3909_v3 = vmax.f32 %v11332_v4, 0.0  ;;  %v9228_v4 = vld [vmem:[%s13071_s2 + $0x600] ss:$16 sps:$4 sm:$0xff]  }
 0x297   : > { %7422 = vmatpush1.bf16.msra.mxu1 %v9141_v5  ;;  %7095 = vmatprep.subr.bf16.mxu0 %v9146_v6  ;;  %v9225_v5 = vld [vmem:[%s13071_s2 + $0x5e8] ss:$16 sps:$4 sm:$0xff]   ;;  %v9230_v6 = vld [vmem:[%s13071_s2 + $0x604] ss:$16 sps:$4 sm:$0xff]  }
 0x298   : > { %7423 = vmatprep.subr.bf16.mxu1 %v9149_v7  ;;  %v9233_v7 = vld [vmem:[%s13071_s2 + $0x60c] ss:$16 sps:$4 sm:$0xff]  }
 0x29a   : > { %7096 = vmatpush1.bf16.msra.mxu0 %v9144_v11  ;;  %v3912_v11 = vmax.f32 %v11350_v13, 0.0  ;;  %v9239_v13 = vld [vmem:[%s13071_s2 + $0x62c] ss:$16 sps:$4 sm:$0xff]  }
 0x29b   : > { %7424 = vmatpush1.bf16.msra.mxu1 %v9147_v17  ;;  %7097 = vmatprep.subr.bf16.mxu0 %v9152_v18  ;;  %v3925_v17 = vpack.c.bf16 %v3909_v3, %v3909_v3  ;;  %v9231_v18 = vld [vmem:[%s13071_s2 + $0x608] ss:$16 sps:$4 sm:$0xff]   ;;  %v9294_v3 = vld [vmem:[%s13071_s2 + $0x760] ss:$16 sps:$4 sm:$0xff]  }
 0x29c   : > { %7425 = vmatprep.subr.bf16.mxu1 %v9155_v19  ;;  %v9236_v19 = vld [vmem:[%s13071_s2 + $0x624] ss:$16 sps:$4 sm:$0xff]  }
 0x29e   : > { %7098 = vmatpush1.bf16.msra.mxu0 %v9150_v20  ;;  %v3928_v20 = vpack.c.bf16 %v3912_v11, %v3912_v11  ;;  %v9300_v11 = vld [vmem:[%s13071_s2 + $0x780] ss:$16 sps:$4 sm:$0xff]  }
 0x29f   : > { %7426 = vmatpush1.bf16.msra.mxu1 %v9153_v21  ;;  %7099 = vmatprep.subr.bf16.mxu0 %v9158_v22  ;;  %v9234_v21 = vld [vmem:[%s13071_s2 + $0x620] ss:$16 sps:$4 sm:$0xff]   ;;  %v9237_v22 = vld [vmem:[%s13071_s2 + $0x628] ss:$16 sps:$4 sm:$0xff]  }
 0x2a0   : > { %7427 = vmatprep.subr.bf16.mxu1 %v9161_v25  ;;  %v9242_v25 = vld [vmem:[%s13071_s2 + $0x644] ss:$16 sps:$4 sm:$0xff]  }
 0x2a2   : > { %7100 = vmatpush1.bf16.msra.mxu0 %v9156_v26  ;;  %v9245_v26 = vld [vmem:[%s13071_s2 + $0x64c] ss:$16 sps:$4 sm:$0xff]  }
 0x2a3   : > { %7428 = vmatpush1.bf16.msra.mxu1 %v9159_v27  ;;  %7101 = vmatprep.subr.bf16.mxu0 %v9164_v28  ;;  %v9240_v27 = vld [vmem:[%s13071_s2 + $0x640] ss:$16 sps:$4 sm:$0xff]   ;;  %v9243_v28 = vld [vmem:[%s13071_s2 + $0x648] ss:$16 sps:$4 sm:$0xff]  }
 0x2a4   : > { %7429 = vmatprep.subr.bf16.mxu1 %v9167_v29  ;;  %v9248_v29 = vld [vmem:[%s13071_s2 + $0x664] ss:$16 sps:$4 sm:$0xff]  }
 0x2a6   : > { %7102 = vmatpush1.bf16.msra.mxu0 %v9162_v30  ;;  %v9251_v30 = vld [vmem:[%s13071_s2 + $0x66c] ss:$16 sps:$4 sm:$0xff]  }
 0x2a7   : > { %7430 = vmatpush1.bf16.msra.mxu1 %v9165_v57  ;;  %7103 = vmatprep.subr.bf16.mxu0 %v9170_v31  ;;  %v9246_v57 = vld [vmem:[%s13071_s2 + $0x660] ss:$16 sps:$4 sm:$0xff]   ;;  %v9249_v31 = vld [vmem:[%s13071_s2 + $0x668] ss:$16 sps:$4 sm:$0xff]  }
 0x2a8   : > { %7431 = vmatprep.subr.bf16.mxu1 %v9173_v33  ;;  %v9254_v33 = vld [vmem:[%s13071_s2 + $0x684] ss:$16 sps:$4 sm:$0xff]  }
 0x2aa   : > { %7104 = vmatpush1.bf16.msra.mxu0 %v9168_v34  ;;  %v9257_v34 = vld [vmem:[%s13071_s2 + $0x68c] ss:$16 sps:$4 sm:$0xff]  }
 0x2ab   : > { %7432 = vmatpush1.bf16.msra.mxu1 %v9171_v35  ;;  %7105 = vmatprep.subr.bf16.mxu0 %v9176_v38  ;;  %v9252_v35 = vld [vmem:[%s13071_s2 + $0x680] ss:$16 sps:$4 sm:$0xff]   ;;  %v9255_v38 = vld [vmem:[%s13071_s2 + $0x688] ss:$16 sps:$4 sm:$0xff]  }
 0x2ac   : > { %7433 = vmatprep.subr.bf16.mxu1 %v9179_v12  ;;  %v9260_v12 = vld [vmem:[%s13071_s2 + $0x6a4] ss:$16 sps:$4 sm:$0xff]  }
 0x2ae   : > { %7106 = vmatpush1.bf16.msra.mxu0 %v9174_v39  ;;  %v9263_v39 = vld [vmem:[%s13071_s2 + $0x6ac] ss:$16 sps:$4 sm:$0xff]  }
 0x2af   : > { %7434 = vmatpush1.bf16.msra.mxu1 %v9177_v41  ;;  %7107 = vmatprep.subr.bf16.mxu0 %v9182_v42  ;;  %v9258_v41 = vld [vmem:[%s13071_s2 + $0x6a0] ss:$16 sps:$4 sm:$0xff]   ;;  %v9261_v42 = vld [vmem:[%s13071_s2 + $0x6a8] ss:$16 sps:$4 sm:$0xff]  }
 0x2b0   : > { %7435 = vmatprep.subr.bf16.mxu1 %v9185_v43  ;;  %v9266_v43 = vld [vmem:[%s13071_s2 + $0x6c4] ss:$16 sps:$4 sm:$0xff]  }
 0x2b2   : > { %7108 = vmatpush1.bf16.msra.mxu0 %v9180_v37 }
 0x2b3   : > { %7436 = vmatpush1.bf16.msra.mxu1 %v9183_v44  ;;  %7109 = vmatprep.subr.bf16.mxu0 %v9188_v45  ;;  %v9269_v44 = vld [vmem:[%s13071_s2 + $0x6cc] ss:$16 sps:$4 sm:$0xff]  }
 0x2b4   : > { %7437 = vmatprep.subr.bf16.mxu1 %v9191_v46 }
 0x2b6   : > { %7110 = vmatpush1.bf16.msra.mxu0 %v9186_v23 }
 0x2b7   : > { %7438 = vmatpush1.bf16.msra.mxu1 %v9189_v24  ;;  %7111 = vmatprep.subr.bf16.mxu0 %v9194_v32  ;;  %v9264_v32 = vld [vmem:[%s13071_s2 + $0x6c0] ss:$16 sps:$4 sm:$0xff]  }
 0x2b8   : > { %7439 = vmatprep.subr.bf16.mxu1 %v9197_v47 }
 0x2ba   : > { %7112 = vmatpush1.bf16.msra.mxu0 %v9192_v48 }
 0x2bb   : > { %7440 = vmatpush1.bf16.msra.mxu1 %v9195_v49  ;;  %7113 = vmatprep.subr.bf16.mxu0 %v9200_v50  ;;  %v9267_v49 = vld [vmem:[%s13071_s2 + $0x6c8] ss:$16 sps:$4 sm:$0xff]   ;;  %v9272_v50 = vld [vmem:[%s13071_s2 + $0x6e4] ss:$16 sps:$4 sm:$0xff]  }
 0x2bc   : > { %7441 = vmatprep.subr.bf16.mxu1 %v9203_v40 }
 0x2be   : > { %7114 = vmatpush1.bf16.msra.mxu0 %v9198_v51  ;;  %v9275_v51 = vld [vmem:[%s13071_s2 + $0x6ec] ss:$16 sps:$4 sm:$0xff]  }
 0x2bf   : > { %7442 = vmatpush1.bf16.msra.mxu1 %v9201_v52  ;;  %7115 = vmatprep.subr.bf16.mxu0 %v9206_v53  ;;  %v9270_v52 = vld [vmem:[%s13071_s2 + $0x6e0] ss:$16 sps:$4 sm:$0xff]   ;;  %v9273_v53 = vld [vmem:[%s13071_s2 + $0x6e8] ss:$16 sps:$4 sm:$0xff]  }
 0x2c0   : > { %7443 = vmatprep.subr.bf16.mxu1 %v9209_v54  ;;  %v9278_v54 = vld [vmem:[%s13071_s2 + $0x704] ss:$16 sps:$4 sm:$0xff]  }
 0x2c2   : > { %7116 = vmatpush1.bf16.msra.mxu0 %v9204_v55  ;;  %v9281_v55 = vld [vmem:[%s13071_s2 + $0x70c] ss:$16 sps:$4 sm:$0xff]  }
 0x2c3   : > { %7444 = vmatpush1.bf16.msra.mxu1 %v9207_v56  ;;  %7117 = vmatprep.subr.bf16.mxu0 %v9212_v58  ;;  %v9276_v56 = vld [vmem:[%s13071_s2 + $0x700] ss:$16 sps:$4 sm:$0xff]   ;;  %v9279_v58 = vld [vmem:[%s13071_s2 + $0x708] ss:$16 sps:$4 sm:$0xff]  }
 0x2c4   : > { %7445 = vmatprep.subr.bf16.mxu1 %v9215_v59  ;;  %v9284_v59 = vld [vmem:[%s13071_s2 + $0x724] ss:$16 sps:$4 sm:$0xff]  }
 0x2c6   : > { %7118 = vmatpush1.bf16.msra.mxu0 %v9210_v60  ;;  %v9287_v60 = vld [vmem:[%s13071_s2 + $0x72c] ss:$16 sps:$4 sm:$0xff]  }
 0x2c7   : > { %7446 = vmatpush1.bf16.msra.mxu1 %v9213_v61  ;;  %7119 = vmatprep.subr.bf16.mxu0 %v9218_v62  ;;  %v9282_v61 = vld [vmem:[%s13071_s2 + $0x720] ss:$16 sps:$4 sm:$0xff]   ;;  %v9285_v62 = vld [vmem:[%s13071_s2 + $0x728] ss:$16 sps:$4 sm:$0xff]  }
 0x2c8   : > { %7447 = vmatprep.subr.bf16.mxu1 %v9221_v36  ;;  %v9290_v36 = vld [vmem:[%s13071_s2 + $0x744] ss:$16 sps:$4 sm:$0xff]  }
 0x2ca   : > { %7120 = vmatpush1.bf16.msra.mxu0 %v9216_v63  ;;  %v9293_v63 = vld [vmem:[%s13071_s2 + $0x74c] ss:$16 sps:$4 sm:$0xff]  }
 0x2cb   : > { %7448 = vmatpush1.bf16.msra.mxu1 %v9219_v0  ;;  %7121 = vmatprep.subr.bf16.mxu0 %v9224_v1  ;;  %v9288_v0 = vld [vmem:[%s13071_s2 + $0x740] ss:$16 sps:$4 sm:$0xff]   ;;  %v9291_v1 = vld [vmem:[%s13071_s2 + $0x748] ss:$16 sps:$4 sm:$0xff]  }
 0x2cc   : > { %7449 = vmatprep.subr.bf16.mxu1 %v9227_v2  ;;  %v9296_v2 = vld [vmem:[%s13071_s2 + $0x764] ss:$16 sps:$4 sm:$0xff]  }
 0x2ce   : > { %7122 = vmatpush1.bf16.msra.mxu0 %v9222_v9  ;;  %v9299_v9 = vld [vmem:[%s13071_s2 + $0x76c] ss:$16 sps:$4 sm:$0xff]  }
 0x2cf   : > { %7450 = vmatpush1.bf16.msra.mxu1 %v9225_v5  ;;  %7132 = vmatprep.subr.bf16.mxu0 %v9230_v6  ;;  %v9297_v5 = vld [vmem:[%s13071_s2 + $0x768] ss:$16 sps:$4 sm:$0xff]   ;;  %v9302_v6 = vld [vmem:[%s13071_s2 + $0x784] ss:$16 sps:$4 sm:$0xff]  }
 0x2d0   : > { %7460 = vmatprep.subr.bf16.mxu1 %v9233_v7  ;;  %v9305_v7 = vld [vmem:[%s13071_s2 + $0x78c] ss:$16 sps:$4 sm:$0xff]  }
 0x2d1   : > { %7124 = vmatmul.mubr.bf16.vlgmr.msra.gmra.mrb[16].mxu0 %v3925_v17 }
 0x2d2   : > { %7452 = vmatmul.mubr.bf16.vlgmr.msra.gmra.mrb[16].mxu1 %v3925_v17  ;;  %7133 = vmatpush1.bf16.msra.mxu0 %v9228_v4  ;;  %v9303_v4 = vld [vmem:[%s13071_s2 + $0x788] ss:$16 sps:$4 sm:$0xff]   ;;  %v9308_v17 = vld [vmem:[%s13071_s2 + $0x7a4] ss:$16 sps:$4 sm:$0xff]  }
 0x2d3   : > { %7164 = vmatprep.mubr.bf16.mxu0 %v3928_v20  ;;  %7461 = vmatpush1.bf16.msra.mxu1 %v9231_v18  ;;  %v9311_v18 = vld [vmem:[%s13071_s2 + $0x7ac] ss:$16 sps:$4 sm:$0xff]  }
 0x2d4   : > { %7492 = vmatprep.mubr.bf16.mxu1 %v3928_v20  ;;  %7134 = vmatprep.subr.bf16.mxu0 %v9236_v19  ;;  %v9306_v19 = vld [vmem:[%s13071_s2 + $0x7a0] ss:$16 sps:$4 sm:$0xff]   ;;  %v9309_v20 = vld [vmem:[%s13071_s2 + $0x7a8] ss:$16 sps:$4 sm:$0xff]  }
 0x2d5   : > { %7462 = vmatprep.subr.bf16.mxu1 %v9239_v13  ;;  %v9314_v13 = vld [vmem:[%s13071_s2 + $0x7c4] ss:$16 sps:$4 sm:$0xff]  }
 0x2d6   : > { %7135 = vmatpush1.bf16.msra.mxu0 %v9234_v21  ;;  %v9317_v21 = vld [vmem:[%s13071_s2 + $0x7cc] ss:$16 sps:$4 sm:$0xff]  }
 0x2d7   : > { %7463 = vmatpush1.bf16.msra.mxu1 %v9237_v22  ;;  %7136 = vmatprep.subr.bf16.mxu0 %v9242_v25  ;;  %v9312_v22 = vld [vmem:[%s13071_s2 + $0x7c0] ss:$16 sps:$4 sm:$0xff]   ;;  %v9315_v25 = vld [vmem:[%s13071_s2 + $0x7c8] ss:$16 sps:$4 sm:$0xff]  }
 0x2d8   : > { %7464 = vmatprep.subr.bf16.mxu1 %v9245_v26  ;;  %v9320_v26 = vld [vmem:[%s13071_s2 + $0x7e4] ss:$16 sps:$4 sm:$0xff]  }
 0x2da   : > { %7137 = vmatpush1.bf16.msra.mxu0 %v9240_v27  ;;  %v9323_v27 = vld [vmem:[%s13071_s2 + $0x7ec] ss:$16 sps:$4 sm:$0xff]  }
 0x2db   : > { %7465 = vmatpush1.bf16.msra.mxu1 %v9243_v28  ;;  %7138 = vmatprep.subr.bf16.mxu0 %v9248_v29  ;;  %v9318_v28 = vld [vmem:[%s13071_s2 + $0x7e0] ss:$16 sps:$4 sm:$0xff]   ;;  %v3911_v29 = vmax.f32 %v11340_v8, 0.0 }
 0x2dc   : > { %7466 = vmatprep.subr.bf16.mxu1 %v9251_v30  ;;  %v9321_v30 = vld [vmem:[%s13071_s2 + $0x7e8] ss:$16 sps:$4 sm:$0xff]   ;;  %v9324_v8 = vld [vmem:[%s13071_s2 + $0x800] ss:$16 sps:$4 sm:$0xff]  }
 0x2de   : > { %7139 = vmatpush1.bf16.msra.mxu0 %v9246_v57  ;;  %v9326_v57 = vld [vmem:[%s13071_s2 + $0x804] ss:$16 sps:$4 sm:$0xff]  }
 0x2df   : > { %7467 = vmatpush1.bf16.msra.mxu1 %v9249_v31  ;;  %7140 = vmatprep.subr.bf16.mxu0 %v9254_v33  ;;  %v9329_v31 = vld [vmem:[%s13071_s2 + $0x80c] ss:$16 sps:$4 sm:$0xff]   ;;  %v3914_v33 = vmax.f32 %v11727_v15, 0.0 }
 0x2e0   : > { %7468 = vmatprep.subr.bf16.mxu1 %v9257_v34  ;;  %v3927_v34 = vpack.c.bf16 %v3911_v29, %v3911_v29  ;;  %v9335_v15 = vld [vmem:[%s13071_s2 + $0x82c] ss:$16 sps:$4 sm:$0xff]   ;;  %v9404_v29 = vld [vmem:[%s13071_s2 + $0x9a4] ss:$16 sps:$4 sm:$0xff]  }
 0x2e2   : > { %7141 = vmatpush1.bf16.msra.mxu0 %v9252_v35  ;;  %v9327_v35 = vld [vmem:[%s13071_s2 + $0x808] ss:$16 sps:$4 sm:$0xff]  }
 0x2e3   : > { %7469 = vmatpush1.bf16.msra.mxu1 %v9255_v38  ;;  %7142 = vmatprep.subr.bf16.mxu0 %v9260_v12  ;;  %v9332_v38 = vld [vmem:[%s13071_s2 + $0x824] ss:$16 sps:$4 sm:$0xff]   ;;  %v3930_v12 = vpack.c.bf16 %v3914_v33, %v3914_v33 }
 0x2e4   : > { %v12116_v37 = vpop.f32.mrb[12].mxu0  ;;  %7470 = vmatprep.subr.bf16.mxu1 %v9263_v39  ;;  %v12121_v45 = vpop.f32.mrb[12].mxu1  ;;  %v9330_v39 = vld [vmem:[%s13071_s2 + $0x820] ss:$16 sps:$4 sm:$0xff]   ;;  %v9410_v33 = vld [vmem:[%s13071_s2 + $0x9c4] ss:$16 sps:$4 sm:$0xff]  }
 0x2e5   : > { %v12123_v46 = vpop.f32.mrb[13].mxu0  ;;  %v12125_v23 = vpop.f32.mrb[13].mxu1 }
 0x2e6   : > { %v3820_v24 = vpop.f32.mrb[14].mxu0  ;;  %7143 = vmatpush1.bf16.msra.mxu0 %v9258_v41  ;;  %v3902_v47 = vpop.f32.mrb[14].mxu1  ;;  %v9333_v41 = vld [vmem:[%s13071_s2 + $0x828] ss:$16 sps:$4 sm:$0xff]  }
 0x2e7   : > { %7471 = vmatpush1.bf16.msra.mxu1 %v9261_v42  ;;  %v3821_v48 = vpop.f32.mrb[15].mxu0  ;;  %7144 = vmatprep.subr.bf16.mxu0 %v9266_v43  ;;  %v3903_v40 = vpop.f32.mrb[15].mxu1  ;;  %v9338_v42 = vld [vmem:[%s13071_s2 + $0x844] ss:$16 sps:$4 sm:$0xff]   ;;  %v9341_v43 = vld [vmem:[%s13071_s2 + $0x84c] ss:$16 sps:$4 sm:$0xff]  }
 0x2e8   : > { %7472 = vmatprep.subr.bf16.mxu1 %v9269_v44  ;;  %v9336_v44 = vld [vmem:[%s13071_s2 + $0x840] ss:$16 sps:$4 sm:$0xff]   ;;  %v9339_v24 = vld [vmem:[%s13071_s2 + $0x848] ss:$16 sps:$4 sm:$0xff]   ;;  %v9347_v47 = vld [vmem:[%s13071_s2 + $0x86c] ss:$16 sps:$4 sm:$0xff]  }
 0x2e9   : > { %v9342_v48 = vld [vmem:[%s13071_s2 + $0x860] ss:$16 sps:$4 sm:$0xff]   ;;  %v9353_v40 = vld [vmem:[%s13071_s2 + $0x88c] ss:$16 sps:$4 sm:$0xff]  }
 0x2ea   : > { %7145 = vmatpush1.bf16.msra.mxu0 %v9264_v32  ;;  %v9344_v32 = vld [vmem:[%s13071_s2 + $0x864] ss:$16 sps:$4 sm:$0xff]  }
 0x2eb   : > { %7473 = vmatpush1.bf16.msra.mxu1 %v9267_v49  ;;  %7146 = vmatprep.subr.bf16.mxu0 %v9272_v50  ;;  %v9345_v49 = vld [vmem:[%s13071_s2 + $0x868] ss:$16 sps:$4 sm:$0xff]   ;;  %v9350_v50 = vld [vmem:[%s13071_s2 + $0x884] ss:$16 sps:$4 sm:$0xff]  }
 0x2ec   : > { %7474 = vmatprep.subr.bf16.mxu1 %v9275_v51  ;;  %v9348_v51 = vld [vmem:[%s13071_s2 + $0x880] ss:$16 sps:$4 sm:$0xff]  }
 0x2ee   : > { %7147 = vmatpush1.bf16.msra.mxu0 %v9270_v52  ;;  %v9351_v52 = vld [vmem:[%s13071_s2 + $0x888] ss:$16 sps:$4 sm:$0xff]  }
 0x2ef   : > { %7475 = vmatpush1.bf16.msra.mxu1 %v9273_v53  ;;  %7148 = vmatprep.subr.bf16.mxu0 %v9278_v54  ;;  %v9356_v53 = vld [vmem:[%s13071_s2 + $0x8a4] ss:$16 sps:$4 sm:$0xff]   ;;  %v9359_v54 = vld [vmem:[%s13071_s2 + $0x8ac] ss:$16 sps:$4 sm:$0xff]  }
 0x2f0   : > { %7476 = vmatprep.subr.bf16.mxu1 %v9281_v55  ;;  %v9354_v55 = vld [vmem:[%s13071_s2 + $0x8a0] ss:$16 sps:$4 sm:$0xff]  }
 0x2f2   : > { %7149 = vmatpush1.bf16.msra.mxu0 %v9276_v56  ;;  %v9357_v56 = vld [vmem:[%s13071_s2 + $0x8a8] ss:$16 sps:$4 sm:$0xff]  }
 0x2f3   : > { %7477 = vmatpush1.bf16.msra.mxu1 %v9279_v58  ;;  %7150 = vmatprep.subr.bf16.mxu0 %v9284_v59  ;;  %v9362_v58 = vld [vmem:[%s13071_s2 + $0x8c4] ss:$16 sps:$4 sm:$0xff]   ;;  %v9365_v59 = vld [vmem:[%s13071_s2 + $0x8cc] ss:$16 sps:$4 sm:$0xff]  }
 0x2f4   : > { %7478 = vmatprep.subr.bf16.mxu1 %v9287_v60  ;;  %v9360_v60 = vld [vmem:[%s13071_s2 + $0x8c0] ss:$16 sps:$4 sm:$0xff]  }
 0x2f6   : > { %7151 = vmatpush1.bf16.msra.mxu0 %v9282_v61  ;;  %v9363_v61 = vld [vmem:[%s13071_s2 + $0x8c8] ss:$16 sps:$4 sm:$0xff]  }
 0x2f7   : > { %7479 = vmatpush1.bf16.msra.mxu1 %v9285_v62  ;;  %7152 = vmatprep.subr.bf16.mxu0 %v9290_v36  ;;  %v9368_v62 = vld [vmem:[%s13071_s2 + $0x8e4] ss:$16 sps:$4 sm:$0xff]   ;;  %v9371_v36 = vld [vmem:[%s13071_s2 + $0x8ec] ss:$16 sps:$4 sm:$0xff]  }
 0x2f8   : > { %7480 = vmatprep.subr.bf16.mxu1 %v9293_v63  ;;  %v9366_v63 = vld [vmem:[%s13071_s2 + $0x8e0] ss:$16 sps:$4 sm:$0xff]  }
 0x2fa   : > { %7153 = vmatpush1.bf16.msra.mxu0 %v9288_v0  ;;  %v9369_v0 = vld [vmem:[%s13071_s2 + $0x8e8] ss:$16 sps:$4 sm:$0xff]  }
 0x2fb   : > { %7481 = vmatpush1.bf16.msra.mxu1 %v9291_v1  ;;  %7154 = vmatprep.subr.bf16.mxu0 %v9296_v2  ;;  %v9374_v1 = vld [vmem:[%s13071_s2 + $0x904] ss:$16 sps:$4 sm:$0xff]   ;;  %v9377_v2 = vld [vmem:[%s13071_s2 + $0x90c] ss:$16 sps:$4 sm:$0xff]  }
 0x2fc   : > { %7482 = vmatprep.subr.bf16.mxu1 %v9299_v9  ;;  %v9372_v9 = vld [vmem:[%s13071_s2 + $0x900] ss:$16 sps:$4 sm:$0xff]  }
 0x2fe   : > { %7155 = vmatpush1.bf16.msra.mxu0 %v9294_v3  ;;  %v9375_v3 = vld [vmem:[%s13071_s2 + $0x908] ss:$16 sps:$4 sm:$0xff]  }
 0x2ff   : > { %7483 = vmatpush1.bf16.msra.mxu1 %v9297_v5  ;;  %7156 = vmatprep.subr.bf16.mxu0 %v9302_v6  ;;  %v9380_v5 = vld [vmem:[%s13071_s2 + $0x924] ss:$16 sps:$4 sm:$0xff]   ;;  %v9383_v6 = vld [vmem:[%s13071_s2 + $0x92c] ss:$16 sps:$4 sm:$0xff]  }
 0x300   : > { %7484 = vmatprep.subr.bf16.mxu1 %v9305_v7  ;;  %v9378_v7 = vld [vmem:[%s13071_s2 + $0x920] ss:$16 sps:$4 sm:$0xff]  }
 0x302   : > { %7157 = vmatpush1.bf16.msra.mxu0 %v9300_v11  ;;  %v9381_v11 = vld [vmem:[%s13071_s2 + $0x928] ss:$16 sps:$4 sm:$0xff]  }
 0x303   : > { %7485 = vmatpush1.bf16.msra.mxu1 %v9303_v4  ;;  %7158 = vmatprep.subr.bf16.mxu0 %v9308_v17  ;;  %v9386_v4 = vld [vmem:[%s13071_s2 + $0x944] ss:$16 sps:$4 sm:$0xff]   ;;  %v9389_v17 = vld [vmem:[%s13071_s2 + $0x94c] ss:$16 sps:$4 sm:$0xff]  }
 0x304   : > { %7486 = vmatprep.subr.bf16.mxu1 %v9311_v18  ;;  %v9384_v18 = vld [vmem:[%s13071_s2 + $0x940] ss:$16 sps:$4 sm:$0xff]  }
 0x306   : > { %7159 = vmatpush1.bf16.msra.mxu0 %v9306_v19  ;;  %v9387_v19 = vld [vmem:[%s13071_s2 + $0x948] ss:$16 sps:$4 sm:$0xff]  }
 0x307   : > { %7487 = vmatpush1.bf16.msra.mxu1 %v9309_v20  ;;  %7160 = vmatprep.subr.bf16.mxu0 %v9314_v13  ;;  %v9392_v20 = vld [vmem:[%s13071_s2 + $0x964] ss:$16 sps:$4 sm:$0xff]   ;;  %v9395_v13 = vld [vmem:[%s13071_s2 + $0x96c] ss:$16 sps:$4 sm:$0xff]  }
 0x308   : > { %7488 = vmatprep.subr.bf16.mxu1 %v9317_v21  ;;  %v9390_v21 = vld [vmem:[%s13071_s2 + $0x960] ss:$16 sps:$4 sm:$0xff]  }
 0x30a   : > { %7161 = vmatpush1.bf16.msra.mxu0 %v9312_v22  ;;  %v9393_v22 = vld [vmem:[%s13071_s2 + $0x968] ss:$16 sps:$4 sm:$0xff]  }
 0x30b   : > { %7489 = vmatpush1.bf16.msra.mxu1 %v9315_v25  ;;  %7162 = vmatprep.subr.bf16.mxu0 %v9320_v26  ;;  %v9398_v25 = vld [vmem:[%s13071_s2 + $0x984] ss:$16 sps:$4 sm:$0xff]   ;;  %v9401_v26 = vld [vmem:[%s13071_s2 + $0x98c] ss:$16 sps:$4 sm:$0xff]  }
 0x30c   : > { %7490 = vmatprep.subr.bf16.mxu1 %v9323_v27  ;;  %v9396_v27 = vld [vmem:[%s13071_s2 + $0x980] ss:$16 sps:$4 sm:$0xff]  }
 0x30e   : > { %7163 = vmatpush1.bf16.msra.mxu0 %v9318_v28  ;;  %v9399_v28 = vld [vmem:[%s13071_s2 + $0x988] ss:$16 sps:$4 sm:$0xff]  }
 0x30f   : > { %7491 = vmatpush1.bf16.msra.mxu1 %v9321_v30  ;;  %7173 = vmatprep.subr.bf16.mxu0 %v9326_v57  ;;  %v9407_v30 = vld [vmem:[%s13071_s2 + $0x9ac] ss:$16 sps:$4 sm:$0xff]   ;;  %v9402_v57 = vld [vmem:[%s13071_s2 + $0x9a0] ss:$16 sps:$4 sm:$0xff]  }
 0x310   : > { %7501 = vmatprep.subr.bf16.mxu1 %v9329_v31  ;;  %v9405_v31 = vld [vmem:[%s13071_s2 + $0x9a8] ss:$16 sps:$4 sm:$0xff]  }
 0x311   : > { %7165 = vmatmul.mubr.bf16.vlgmr.msra.gmra.mrb[16].mxu0 %v3927_v34 }
 0x312   : > { %7493 = vmatmul.mubr.bf16.vlgmr.msra.gmra.mrb[16].mxu1 %v3927_v34  ;;  %7174 = vmatpush1.bf16.msra.mxu0 %v9324_v8  ;;  %v9413_v8 = vld [vmem:[%s13071_s2 + $0x9cc] ss:$16 sps:$4 sm:$0xff]   ;;  %v9408_v34 = vld [vmem:[%s13071_s2 + $0x9c0] ss:$16 sps:$4 sm:$0xff]  }
 0x313   : > { %7205 = vmatprep.mubr.bf16.mxu0 %v3930_v12  ;;  %7502 = vmatpush1.bf16.msra.mxu1 %v9327_v35  ;;  %v9411_v35 = vld [vmem:[%s13071_s2 + $0x9c8] ss:$16 sps:$4 sm:$0xff]  }
 0x314   : > { %7533 = vmatprep.mubr.bf16.mxu1 %v3930_v12  ;;  %7175 = vmatprep.subr.bf16.mxu0 %v9332_v38  ;;  %v9416_v38 = vld [vmem:[%s13071_s2 + $0x9e4] ss:$16 sps:$4 sm:$0xff]   ;;  %v9419_v12 = vld [vmem:[%s13071_s2 + $0x9ec] ss:$16 sps:$4 sm:$0xff]  }
 0x315   : > { %7503 = vmatprep.subr.bf16.mxu1 %v9335_v15  ;;  %v9414_v15 = vld [vmem:[%s13071_s2 + $0x9e0] ss:$16 sps:$4 sm:$0xff]  }
 0x316   : > { %7176 = vmatpush1.bf16.msra.mxu0 %v9330_v39  ;;  %v3913_v39 = vmax.f32 %v11720_v10, 0.0  ;;  %v9420_v10 = vld [vmem:[%s13071_s2 + $0xa00] ss:$16 sps:$4 sm:$0xff]  }
 0x317   : > { %7504 = vmatpush1.bf16.msra.mxu1 %v9333_v41  ;;  %7177 = vmatprep.subr.bf16.mxu0 %v9338_v42  ;;  %v9417_v41 = vld [vmem:[%s13071_s2 + $0x9e8] ss:$16 sps:$4 sm:$0xff]   ;;  %v9422_v42 = vld [vmem:[%s13071_s2 + $0xa04] ss:$16 sps:$4 sm:$0xff]  }
 0x318   : > { %7505 = vmatprep.subr.bf16.mxu1 %v9341_v43  ;;  %v9425_v43 = vld [vmem:[%s13071_s2 + $0xa0c] ss:$16 sps:$4 sm:$0xff]  }
 0x31a   : > { %7178 = vmatpush1.bf16.msra.mxu0 %v9336_v44  ;;  %v3916_v44 = vmax.f32 %v11729_v16, 0.0  ;;  %v9431_v16 = vld [vmem:[%s13071_s2 + $0xa2c] ss:$16 sps:$4 sm:$0xff]  }
 0x31b   : > { %7506 = vmatpush1.bf16.msra.mxu1 %v9339_v24  ;;  %7179 = vmatprep.subr.bf16.mxu0 %v9344_v32  ;;  %v3929_v24 = vpack.c.bf16 %v3913_v39, %v3913_v39  ;;  %v9423_v32 = vld [vmem:[%s13071_s2 + $0xa08] ss:$16 sps:$4 sm:$0xff]   ;;  %v9498_v39 = vld [vmem:[%s13071_s2 + $0xba0] ss:$16 sps:$4 sm:$0xff]  }
 0x31c   : > { %7507 = vmatprep.subr.bf16.mxu1 %v9347_v47  ;;  %v9428_v47 = vld [vmem:[%s13071_s2 + $0xa24] ss:$16 sps:$4 sm:$0xff]  }
 0x31e   : > { %7180 = vmatpush1.bf16.msra.mxu0 %v9342_v48  ;;  %v3932_v48 = vpack.c.bf16 %v3916_v44, %v3916_v44  ;;  %v9504_v44 = vld [vmem:[%s13071_s2 + $0xbc0] ss:$16 sps:$4 sm:$0xff]  }
 0x31f   : > { %7508 = vmatpush1.bf16.msra.mxu1 %v9345_v49  ;;  %7181 = vmatprep.subr.bf16.mxu0 %v9350_v50  ;;  %v9426_v49 = vld [vmem:[%s13071_s2 + $0xa20] ss:$16 sps:$4 sm:$0xff]   ;;  %v9429_v50 = vld [vmem:[%s13071_s2 + $0xa28] ss:$16 sps:$4 sm:$0xff]  }
 0x320   : > { %7509 = vmatprep.subr.bf16.mxu1 %v9353_v40  ;;  %v9434_v40 = vld [vmem:[%s13071_s2 + $0xa44] ss:$16 sps:$4 sm:$0xff]  }
 0x322   : > { %7182 = vmatpush1.bf16.msra.mxu0 %v9348_v51  ;;  %v9437_v51 = vld [vmem:[%s13071_s2 + $0xa4c] ss:$16 sps:$4 sm:$0xff]  }
 0x323   : > { %7510 = vmatpush1.bf16.msra.mxu1 %v9351_v52  ;;  %7183 = vmatprep.subr.bf16.mxu0 %v9356_v53  ;;  %v9432_v52 = vld [vmem:[%s13071_s2 + $0xa40] ss:$16 sps:$4 sm:$0xff]   ;;  %v9435_v53 = vld [vmem:[%s13071_s2 + $0xa48] ss:$16 sps:$4 sm:$0xff]  }
 0x324   : > { %7511 = vmatprep.subr.bf16.mxu1 %v9359_v54  ;;  %v9440_v54 = vld [vmem:[%s13071_s2 + $0xa64] ss:$16 sps:$4 sm:$0xff]  }
 0x326   : > { %7184 = vmatpush1.bf16.msra.mxu0 %v9354_v55  ;;  %v9443_v55 = vld [vmem:[%s13071_s2 + $0xa6c] ss:$16 sps:$4 sm:$0xff]  }
 0x327   : > { %7512 = vmatpush1.bf16.msra.mxu1 %v9357_v56  ;;  %7185 = vmatprep.subr.bf16.mxu0 %v9362_v58  ;;  %v9438_v56 = vld [vmem:[%s13071_s2 + $0xa60] ss:$16 sps:$4 sm:$0xff]   ;;  %v9441_v58 = vld [vmem:[%s13071_s2 + $0xa68] ss:$16 sps:$4 sm:$0xff]  }
 0x328   : > { %7513 = vmatprep.subr.bf16.mxu1 %v9365_v59  ;;  %v9446_v59 = vld [vmem:[%s13071_s2 + $0xa84] ss:$16 sps:$4 sm:$0xff]  }
 0x32a   : > { %7186 = vmatpush1.bf16.msra.mxu0 %v9360_v60  ;;  %v9449_v60 = vld [vmem:[%s13071_s2 + $0xa8c] ss:$16 sps:$4 sm:$0xff]  }
 0x32b   : > { %7514 = vmatpush1.bf16.msra.mxu1 %v9363_v61  ;;  %7187 = vmatprep.subr.bf16.mxu0 %v9368_v62  ;;  %v9444_v61 = vld [vmem:[%s13071_s2 + $0xa80] ss:$16 sps:$4 sm:$0xff]   ;;  %v9447_v62 = vld [vmem:[%s13071_s2 + $0xa88] ss:$16 sps:$4 sm:$0xff]  }
 0x32c   : > { %7515 = vmatprep.subr.bf16.mxu1 %v9371_v36  ;;  %v9452_v36 = vld [vmem:[%s13071_s2 + $0xaa4] ss:$16 sps:$4 sm:$0xff]  }
 0x32e   : > { %7188 = vmatpush1.bf16.msra.mxu0 %v9366_v63  ;;  %v9455_v63 = vld [vmem:[%s13071_s2 + $0xaac] ss:$16 sps:$4 sm:$0xff]  }
 0x32f   : > { %7516 = vmatpush1.bf16.msra.mxu1 %v9369_v0  ;;  %7189 = vmatprep.subr.bf16.mxu0 %v9374_v1  ;;  %v9450_v0 = vld [vmem:[%s13071_s2 + $0xaa0] ss:$16 sps:$4 sm:$0xff]   ;;  %v9453_v1 = vld [vmem:[%s13071_s2 + $0xaa8] ss:$16 sps:$4 sm:$0xff]  }
 0x330   : > { %7517 = vmatprep.subr.bf16.mxu1 %v9377_v2  ;;  %v9458_v2 = vld [vmem:[%s13071_s2 + $0xac4] ss:$16 sps:$4 sm:$0xff]  }
 0x332   : > { %7190 = vmatpush1.bf16.msra.mxu0 %v9372_v9  ;;  %v9461_v9 = vld [vmem:[%s13071_s2 + $0xacc] ss:$16 sps:$4 sm:$0xff]  }
 0x333   : > { %7518 = vmatpush1.bf16.msra.mxu1 %v9375_v3  ;;  %7191 = vmatprep.subr.bf16.mxu0 %v9380_v5  ;;  %v9456_v3 = vld [vmem:[%s13071_s2 + $0xac0] ss:$16 sps:$4 sm:$0xff]   ;;  %v9459_v5 = vld [vmem:[%s13071_s2 + $0xac8] ss:$16 sps:$4 sm:$0xff]  }
 0x334   : > { %7519 = vmatprep.subr.bf16.mxu1 %v9383_v6  ;;  %v9464_v6 = vld [vmem:[%s13071_s2 + $0xae4] ss:$16 sps:$4 sm:$0xff]  }
 0x336   : > { %7192 = vmatpush1.bf16.msra.mxu0 %v9378_v7  ;;  %v9467_v7 = vld [vmem:[%s13071_s2 + $0xaec] ss:$16 sps:$4 sm:$0xff]  }
 0x337   : > { %7520 = vmatpush1.bf16.msra.mxu1 %v9381_v11  ;;  %7193 = vmatprep.subr.bf16.mxu0 %v9386_v4  ;;  %v9462_v11 = vld [vmem:[%s13071_s2 + $0xae0] ss:$16 sps:$4 sm:$0xff]   ;;  %v9465_v4 = vld [vmem:[%s13071_s2 + $0xae8] ss:$16 sps:$4 sm:$0xff]  }
 0x338   : > { %7521 = vmatprep.subr.bf16.mxu1 %v9389_v17  ;;  %v9470_v17 = vld [vmem:[%s13071_s2 + $0xb04] ss:$16 sps:$4 sm:$0xff]  }
 0x33a   : > { %7194 = vmatpush1.bf16.msra.mxu0 %v9384_v18  ;;  %v9473_v18 = vld [vmem:[%s13071_s2 + $0xb0c] ss:$16 sps:$4 sm:$0xff]  }
 0x33b   : > { %7522 = vmatpush1.bf16.msra.mxu1 %v9387_v19  ;;  %7195 = vmatprep.subr.bf16.mxu0 %v9392_v20  ;;  %v9468_v19 = vld [vmem:[%s13071_s2 + $0xb00] ss:$16 sps:$4 sm:$0xff]   ;;  %v9471_v20 = vld [vmem:[%s13071_s2 + $0xb08] ss:$16 sps:$4 sm:$0xff]  }
 0x33c   : > { %7523 = vmatprep.subr.bf16.mxu1 %v9395_v13  ;;  %v9476_v13 = vld [vmem:[%s13071_s2 + $0xb24] ss:$16 sps:$4 sm:$0xff]  }
 0x33e   : > { %7196 = vmatpush1.bf16.msra.mxu0 %v9390_v21  ;;  %v9479_v21 = vld [vmem:[%s13071_s2 + $0xb2c] ss:$16 sps:$4 sm:$0xff]  }
 0x33f   : > { %7524 = vmatpush1.bf16.msra.mxu1 %v9393_v22  ;;  %7197 = vmatprep.subr.bf16.mxu0 %v9398_v25  ;;  %v9474_v22 = vld [vmem:[%s13071_s2 + $0xb20] ss:$16 sps:$4 sm:$0xff]   ;;  %v9477_v25 = vld [vmem:[%s13071_s2 + $0xb28] ss:$16 sps:$4 sm:$0xff]  }
 0x340   : > { %7525 = vmatprep.subr.bf16.mxu1 %v9401_v26  ;;  %v9482_v26 = vld [vmem:[%s13071_s2 + $0xb44] ss:$16 sps:$4 sm:$0xff]  }
 0x342   : > { %7198 = vmatpush1.bf16.msra.mxu0 %v9396_v27  ;;  %v9485_v27 = vld [vmem:[%s13071_s2 + $0xb4c] ss:$16 sps:$4 sm:$0xff]  }
 0x343   : > { %7526 = vmatpush1.bf16.msra.mxu1 %v9399_v28  ;;  %7199 = vmatprep.subr.bf16.mxu0 %v9404_v29  ;;  %v9480_v28 = vld [vmem:[%s13071_s2 + $0xb40] ss:$16 sps:$4 sm:$0xff]   ;;  %v9483_v29 = vld [vmem:[%s13071_s2 + $0xb48] ss:$16 sps:$4 sm:$0xff]  }
 0x344   : > { %7527 = vmatprep.subr.bf16.mxu1 %v9407_v30  ;;  %v9488_v30 = vld [vmem:[%s13071_s2 + $0xb64] ss:$16 sps:$4 sm:$0xff]  }
 0x346   : > { %7200 = vmatpush1.bf16.msra.mxu0 %v9402_v57  ;;  %v9491_v57 = vld [vmem:[%s13071_s2 + $0xb6c] ss:$16 sps:$4 sm:$0xff]  }
 0x347   : > { %7528 = vmatpush1.bf16.msra.mxu1 %v9405_v31  ;;  %7201 = vmatprep.subr.bf16.mxu0 %v9410_v33  ;;  %v9486_v31 = vld [vmem:[%s13071_s2 + $0xb60] ss:$16 sps:$4 sm:$0xff]   ;;  %v9489_v33 = vld [vmem:[%s13071_s2 + $0xb68] ss:$16 sps:$4 sm:$0xff]  }
 0x348   : > { %7529 = vmatprep.subr.bf16.mxu1 %v9413_v8  ;;  %v9494_v8 = vld [vmem:[%s13071_s2 + $0xb84] ss:$16 sps:$4 sm:$0xff]  }
 0x34a   : > { %7202 = vmatpush1.bf16.msra.mxu0 %v9408_v34  ;;  %v9497_v34 = vld [vmem:[%s13071_s2 + $0xb8c] ss:$16 sps:$4 sm:$0xff]  }
 0x34b   : > { %7530 = vmatpush1.bf16.msra.mxu1 %v9411_v35  ;;  %7203 = vmatprep.subr.bf16.mxu0 %v9416_v38  ;;  %v9492_v35 = vld [vmem:[%s13071_s2 + $0xb80] ss:$16 sps:$4 sm:$0xff]   ;;  %v9495_v38 = vld [vmem:[%s13071_s2 + $0xb88] ss:$16 sps:$4 sm:$0xff]  }
 0x34c   : > { %7531 = vmatprep.subr.bf16.mxu1 %v9419_v12  ;;  %v9500_v12 = vld [vmem:[%s13071_s2 + $0xba4] ss:$16 sps:$4 sm:$0xff]  }
 0x34e   : > { %7204 = vmatpush1.bf16.msra.mxu0 %v9414_v15  ;;  %v9503_v15 = vld [vmem:[%s13071_s2 + $0xbac] ss:$16 sps:$4 sm:$0xff]  }
 0x34f   : > { %7532 = vmatpush1.bf16.msra.mxu1 %v9417_v41  ;;  %7214 = vmatprep.subr.bf16.mxu0 %v9422_v42  ;;  %v9501_v41 = vld [vmem:[%s13071_s2 + $0xba8] ss:$16 sps:$4 sm:$0xff]   ;;  %v9506_v42 = vld [vmem:[%s13071_s2 + $0xbc4] ss:$16 sps:$4 sm:$0xff]  }
 0x350   : > { %7542 = vmatprep.subr.bf16.mxu1 %v9425_v43  ;;  %v9509_v43 = vld [vmem:[%s13071_s2 + $0xbcc] ss:$16 sps:$4 sm:$0xff]  }
 0x351   : > { %7206 = vmatmul.mubr.bf16.vlgmr.msra.gmra.mrb[16].mxu0 %v3929_v24 }
 0x352   : > { %7534 = vmatmul.mubr.bf16.vlgmr.msra.gmra.mrb[16].mxu1 %v3929_v24  ;;  %7215 = vmatpush1.bf16.msra.mxu0 %v9420_v10  ;;  %v9507_v10 = vld [vmem:[%s13071_s2 + $0xbc8] ss:$16 sps:$4 sm:$0xff]   ;;  %v9512_v24 = vld [vmem:[%s13071_s2 + $0xbe4] ss:$16 sps:$4 sm:$0xff]  }
 0x353   : > { %7246 = vmatprep.mubr.bf16.mxu0 %v3932_v48  ;;  %7543 = vmatpush1.bf16.msra.mxu1 %v9423_v32  ;;  %v9515_v32 = vld [vmem:[%s13071_s2 + $0xbec] ss:$16 sps:$4 sm:$0xff]  }
 0x354   : > { %7574 = vmatprep.mubr.bf16.mxu1 %v3932_v48  ;;  %7216 = vmatprep.subr.bf16.mxu0 %v9428_v47  ;;  %v9510_v47 = vld [vmem:[%s13071_s2 + $0xbe0] ss:$16 sps:$4 sm:$0xff]   ;;  %v3915_v48 = vmax.f32 %v11725_v14, 0.0 }
 0x355   : > { %7544 = vmatprep.subr.bf16.mxu1 %v9431_v16  ;;  %v9513_v16 = vld [vmem:[%s13071_s2 + $0xbe8] ss:$16 sps:$4 sm:$0xff]   ;;  %v9516_v14 = vld [vmem:[%s13071_s2 + $0xc00] ss:$16 sps:$4 sm:$0xff]  }
 0x356   : > { %7217 = vmatpush1.bf16.msra.mxu0 %v9426_v49  ;;  %v9518_v49 = vld [vmem:[%s13071_s2 + $0xc04] ss:$16 sps:$4 sm:$0xff]  }
 0x357   : > { %7545 = vmatpush1.bf16.msra.mxu1 %v9429_v50  ;;  %7218 = vmatprep.subr.bf16.mxu0 %v9434_v40  ;;  %v9521_v50 = vld [vmem:[%s13071_s2 + $0xc0c] ss:$16 sps:$4 sm:$0xff]   ;;  %v3918_v40 = vmax.f32 %v12123_v46, 0.0 }
 0x358   : > { %7546 = vmatprep.subr.bf16.mxu1 %v9437_v51  ;;  %v3931_v51 = vpack.c.bf16 %v3915_v48, %v3915_v48  ;;  %v9527_v46 = vld [vmem:[%s13071_s2 + $0xc2c] ss:$16 sps:$4 sm:$0xff]   ;;  %v9602_v48 = vld [vmem:[%s13071_s2 + $0xdc4] ss:$16 sps:$4 sm:$0xff]  }
 0x35a   : > { %7219 = vmatpush1.bf16.msra.mxu0 %v9432_v52  ;;  %v9519_v52 = vld [vmem:[%s13071_s2 + $0xc08] ss:$16 sps:$4 sm:$0xff]  }
 0x35b   : > { %7547 = vmatpush1.bf16.msra.mxu1 %v9435_v53  ;;  %7220 = vmatprep.subr.bf16.mxu0 %v9440_v54  ;;  %v9524_v53 = vld [vmem:[%s13071_s2 + $0xc24] ss:$16 sps:$4 sm:$0xff]   ;;  %v3934_v54 = vpack.c.bf16 %v3918_v40, %v3918_v40 }
 0x35c   : > { %7548 = vmatprep.subr.bf16.mxu1 %v9443_v55  ;;  %v9522_v55 = vld [vmem:[%s13071_s2 + $0xc20] ss:$16 sps:$4 sm:$0xff]   ;;  %v9608_v40 = vld [vmem:[%s13071_s2 + $0xde4] ss:$16 sps:$4 sm:$0xff]  }
 0x35e   : > { %7221 = vmatpush1.bf16.msra.mxu0 %v9438_v56  ;;  %v9525_v56 = vld [vmem:[%s13071_s2 + $0xc28] ss:$16 sps:$4 sm:$0xff]  }
 0x35f   : > { %7549 = vmatpush1.bf16.msra.mxu1 %v9441_v58  ;;  %7222 = vmatprep.subr.bf16.mxu0 %v9446_v59  ;;  %v9530_v58 = vld [vmem:[%s13071_s2 + $0xc44] ss:$16 sps:$4 sm:$0xff]   ;;  %v9533_v59 = vld [vmem:[%s13071_s2 + $0xc4c] ss:$16 sps:$4 sm:$0xff]  }
 0x360   : > { %7550 = vmatprep.subr.bf16.mxu1 %v9449_v60  ;;  %v9528_v60 = vld [vmem:[%s13071_s2 + $0xc40] ss:$16 sps:$4 sm:$0xff]  }
 0x362   : > { %7223 = vmatpush1.bf16.msra.mxu0 %v9444_v61  ;;  %v9531_v61 = vld [vmem:[%s13071_s2 + $0xc48] ss:$16 sps:$4 sm:$0xff]  }
 0x363   : > { %7551 = vmatpush1.bf16.msra.mxu1 %v9447_v62  ;;  %7224 = vmatprep.subr.bf16.mxu0 %v9452_v36  ;;  %v9536_v62 = vld [vmem:[%s13071_s2 + $0xc64] ss:$16 sps:$4 sm:$0xff]   ;;  %v9539_v36 = vld [vmem:[%s13071_s2 + $0xc6c] ss:$16 sps:$4 sm:$0xff]  }
 0x364   : > { %7552 = vmatprep.subr.bf16.mxu1 %v9455_v63  ;;  %v9534_v63 = vld [vmem:[%s13071_s2 + $0xc60] ss:$16 sps:$4 sm:$0xff]  }
 0x366   : > { %7225 = vmatpush1.bf16.msra.mxu0 %v9450_v0  ;;  %v9537_v0 = vld [vmem:[%s13071_s2 + $0xc68] ss:$16 sps:$4 sm:$0xff]  }
 0x367   : > { %7553 = vmatpush1.bf16.msra.mxu1 %v9453_v1  ;;  %7226 = vmatprep.subr.bf16.mxu0 %v9458_v2  ;;  %v9542_v1 = vld [vmem:[%s13071_s2 + $0xc84] ss:$16 sps:$4 sm:$0xff]   ;;  %v9545_v2 = vld [vmem:[%s13071_s2 + $0xc8c] ss:$16 sps:$4 sm:$0xff]  }
 0x368   : > { %7554 = vmatprep.subr.bf16.mxu1 %v9461_v9  ;;  %v9540_v9 = vld [vmem:[%s13071_s2 + $0xc80] ss:$16 sps:$4 sm:$0xff]  }
 0x36a   : > { %7227 = vmatpush1.bf16.msra.mxu0 %v9456_v3  ;;  %v9543_v3 = vld [vmem:[%s13071_s2 + $0xc88] ss:$16 sps:$4 sm:$0xff]  }
 0x36b   : > { %7555 = vmatpush1.bf16.msra.mxu1 %v9459_v5  ;;  %7228 = vmatprep.subr.bf16.mxu0 %v9464_v6  ;;  %v9548_v5 = vld [vmem:[%s13071_s2 + $0xca4] ss:$16 sps:$4 sm:$0xff]   ;;  %v9551_v6 = vld [vmem:[%s13071_s2 + $0xcac] ss:$16 sps:$4 sm:$0xff]  }
 0x36c   : > { %7556 = vmatprep.subr.bf16.mxu1 %v9467_v7  ;;  %v9546_v7 = vld [vmem:[%s13071_s2 + $0xca0] ss:$16 sps:$4 sm:$0xff]  }
 0x36e   : > { %7229 = vmatpush1.bf16.msra.mxu0 %v9462_v11  ;;  %v9549_v11 = vld [vmem:[%s13071_s2 + $0xca8] ss:$16 sps:$4 sm:$0xff]  }
 0x36f   : > { %7557 = vmatpush1.bf16.msra.mxu1 %v9465_v4  ;;  %7230 = vmatprep.subr.bf16.mxu0 %v9470_v17  ;;  %v9554_v4 = vld [vmem:[%s13071_s2 + $0xcc4] ss:$16 sps:$4 sm:$0xff]   ;;  %v9557_v17 = vld [vmem:[%s13071_s2 + $0xccc] ss:$16 sps:$4 sm:$0xff]  }
 0x370   : > { %7558 = vmatprep.subr.bf16.mxu1 %v9473_v18  ;;  %v9552_v18 = vld [vmem:[%s13071_s2 + $0xcc0] ss:$16 sps:$4 sm:$0xff]  }
 0x372   : > { %7231 = vmatpush1.bf16.msra.mxu0 %v9468_v19  ;;  %v9555_v19 = vld [vmem:[%s13071_s2 + $0xcc8] ss:$16 sps:$4 sm:$0xff]  }
 0x373   : > { %7559 = vmatpush1.bf16.msra.mxu1 %v9471_v20  ;;  %7232 = vmatprep.subr.bf16.mxu0 %v9476_v13  ;;  %v9560_v20 = vld [vmem:[%s13071_s2 + $0xce4] ss:$16 sps:$4 sm:$0xff]   ;;  %v9563_v13 = vld [vmem:[%s13071_s2 + $0xcec] ss:$16 sps:$4 sm:$0xff]  }
 0x374   : > { %7560 = vmatprep.subr.bf16.mxu1 %v9479_v21  ;;  %v9558_v21 = vld [vmem:[%s13071_s2 + $0xce0] ss:$16 sps:$4 sm:$0xff]  }
 0x376   : > { %7233 = vmatpush1.bf16.msra.mxu0 %v9474_v22  ;;  %v9561_v22 = vld [vmem:[%s13071_s2 + $0xce8] ss:$16 sps:$4 sm:$0xff]  }
 0x377   : > { %7561 = vmatpush1.bf16.msra.mxu1 %v9477_v25  ;;  %7234 = vmatprep.subr.bf16.mxu0 %v9482_v26  ;;  %v9566_v25 = vld [vmem:[%s13071_s2 + $0xd04] ss:$16 sps:$4 sm:$0xff]   ;;  %v9569_v26 = vld [vmem:[%s13071_s2 + $0xd0c] ss:$16 sps:$4 sm:$0xff]  }
 0x378   : > { %7562 = vmatprep.subr.bf16.mxu1 %v9485_v27  ;;  %v9564_v27 = vld [vmem:[%s13071_s2 + $0xd00] ss:$16 sps:$4 sm:$0xff]  }
 0x37a   : > { %7235 = vmatpush1.bf16.msra.mxu0 %v9480_v28  ;;  %v9567_v28 = vld [vmem:[%s13071_s2 + $0xd08] ss:$16 sps:$4 sm:$0xff]  }
 0x37b   : > { %7563 = vmatpush1.bf16.msra.mxu1 %v9483_v29  ;;  %7236 = vmatprep.subr.bf16.mxu0 %v9488_v30  ;;  %v9572_v29 = vld [vmem:[%s13071_s2 + $0xd24] ss:$16 sps:$4 sm:$0xff]   ;;  %v9575_v30 = vld [vmem:[%s13071_s2 + $0xd2c] ss:$16 sps:$4 sm:$0xff]  }
 0x37c   : > { %7564 = vmatprep.subr.bf16.mxu1 %v9491_v57  ;;  %v9570_v57 = vld [vmem:[%s13071_s2 + $0xd20] ss:$16 sps:$4 sm:$0xff]  }
 0x37e   : > { %7237 = vmatpush1.bf16.msra.mxu0 %v9486_v31  ;;  %v9573_v31 = vld [vmem:[%s13071_s2 + $0xd28] ss:$16 sps:$4 sm:$0xff]  }
 0x37f   : > { %7565 = vmatpush1.bf16.msra.mxu1 %v9489_v33  ;;  %7238 = vmatprep.subr.bf16.mxu0 %v9494_v8  ;;  %v9578_v33 = vld [vmem:[%s13071_s2 + $0xd44] ss:$16 sps:$4 sm:$0xff]   ;;  %v9581_v8 = vld [vmem:[%s13071_s2 + $0xd4c] ss:$16 sps:$4 sm:$0xff]  }
 0x380   : > { %7566 = vmatprep.subr.bf16.mxu1 %v9497_v34  ;;  %v9576_v34 = vld [vmem:[%s13071_s2 + $0xd40] ss:$16 sps:$4 sm:$0xff]  }
 0x382   : > { %7239 = vmatpush1.bf16.msra.mxu0 %v9492_v35  ;;  %v9579_v35 = vld [vmem:[%s13071_s2 + $0xd48] ss:$16 sps:$4 sm:$0xff]  }
 0x383   : > { %7567 = vmatpush1.bf16.msra.mxu1 %v9495_v38  ;;  %7240 = vmatprep.subr.bf16.mxu0 %v9500_v12  ;;  %v9584_v38 = vld [vmem:[%s13071_s2 + $0xd64] ss:$16 sps:$4 sm:$0xff]   ;;  %v9587_v12 = vld [vmem:[%s13071_s2 + $0xd6c] ss:$16 sps:$4 sm:$0xff]  }
 0x384   : > { %7568 = vmatprep.subr.bf16.mxu1 %v9503_v15  ;;  %v9582_v15 = vld [vmem:[%s13071_s2 + $0xd60] ss:$16 sps:$4 sm:$0xff]  }
 0x386   : > { %7241 = vmatpush1.bf16.msra.mxu0 %v9498_v39  ;;  %v9585_v39 = vld [vmem:[%s13071_s2 + $0xd68] ss:$16 sps:$4 sm:$0xff]  }
 0x387   : > { %7569 = vmatpush1.bf16.msra.mxu1 %v9501_v41  ;;  %7242 = vmatprep.subr.bf16.mxu0 %v9506_v42  ;;  %v9590_v41 = vld [vmem:[%s13071_s2 + $0xd84] ss:$16 sps:$4 sm:$0xff]   ;;  %v9593_v42 = vld [vmem:[%s13071_s2 + $0xd8c] ss:$16 sps:$4 sm:$0xff]  }
 0x388   : > { %7570 = vmatprep.subr.bf16.mxu1 %v9509_v43  ;;  %v9588_v43 = vld [vmem:[%s13071_s2 + $0xd80] ss:$16 sps:$4 sm:$0xff]  }
 0x38a   : > { %7243 = vmatpush1.bf16.msra.mxu0 %v9504_v44  ;;  %v9591_v44 = vld [vmem:[%s13071_s2 + $0xd88] ss:$16 sps:$4 sm:$0xff]  }
 0x38b   : > { %7571 = vmatpush1.bf16.msra.mxu1 %v9507_v10  ;;  %7244 = vmatprep.subr.bf16.mxu0 %v9512_v24  ;;  %v9596_v10 = vld [vmem:[%s13071_s2 + $0xda4] ss:$16 sps:$4 sm:$0xff]   ;;  %v9599_v24 = vld [vmem:[%s13071_s2 + $0xdac] ss:$16 sps:$4 sm:$0xff]  }
 0x38c   : > { %7572 = vmatprep.subr.bf16.mxu1 %v9515_v32  ;;  %v9594_v32 = vld [vmem:[%s13071_s2 + $0xda0] ss:$16 sps:$4 sm:$0xff]  }
 0x38e   : > { %7245 = vmatpush1.bf16.msra.mxu0 %v9510_v47  ;;  %v9597_v47 = vld [vmem:[%s13071_s2 + $0xda8] ss:$16 sps:$4 sm:$0xff]  }
 0x38f   : > { %7573 = vmatpush1.bf16.msra.mxu1 %v9513_v16  ;;  %7255 = vmatprep.subr.bf16.mxu0 %v9518_v49  ;;  %v9605_v16 = vld [vmem:[%s13071_s2 + $0xdcc] ss:$16 sps:$4 sm:$0xff]   ;;  %v9600_v49 = vld [vmem:[%s13071_s2 + $0xdc0] ss:$16 sps:$4 sm:$0xff]  }
 0x390   : > { %7583 = vmatprep.subr.bf16.mxu1 %v9521_v50  ;;  %v9603_v50 = vld [vmem:[%s13071_s2 + $0xdc8] ss:$16 sps:$4 sm:$0xff]  }
 0x391   : > { %7247 = vmatmul.mubr.bf16.vlgmr.msra.gmra.mrb[16].mxu0 %v3931_v51 }
 0x392   : > { %7575 = vmatmul.mubr.bf16.vlgmr.msra.gmra.mrb[16].mxu1 %v3931_v51  ;;  %7256 = vmatpush1.bf16.msra.mxu0 %v9516_v14  ;;  %v9611_v14 = vld [vmem:[%s13071_s2 + $0xdec] ss:$16 sps:$4 sm:$0xff]   ;;  %v9606_v51 = vld [vmem:[%s13071_s2 + $0xde0] ss:$16 sps:$4 sm:$0xff]  }
 0x393   : > { %7287 = vmatprep.mubr.bf16.mxu0 %v3934_v54  ;;  %7584 = vmatpush1.bf16.msra.mxu1 %v9519_v52  ;;  %v3917_v52 = vmax.f32 %v12116_v37, 0.0  ;;  %v9612_v37 = vld [vmem:[%s13071_s2 + $0xe00] ss:$16 sps:$4 sm:$0xff]  }
 0x394   : > { %7615 = vmatprep.mubr.bf16.mxu1 %v3934_v54  ;;  %7257 = vmatprep.subr.bf16.mxu0 %v9524_v53  ;;  %v9609_v53 = vld [vmem:[%s13071_s2 + $0xde8] ss:$16 sps:$4 sm:$0xff]   ;;  %v9614_v54 = vld [vmem:[%s13071_s2 + $0xe04] ss:$16 sps:$4 sm:$0xff]  }
 0x395   : > { %7585 = vmatprep.subr.bf16.mxu1 %v9527_v46  ;;  %v9617_v46 = vld [vmem:[%s13071_s2 + $0xe0c] ss:$16 sps:$4 sm:$0xff]  }
 0x396   : > { %7258 = vmatpush1.bf16.msra.mxu0 %v9522_v55  ;;  %v3920_v55 = vmax.f32 %v12125_v23, 0.0  ;;  %v9623_v23 = vld [vmem:[%s13071_s2 + $0xe2c] ss:$16 sps:$4 sm:$0xff]  }
 0x397   : > { %7586 = vmatpush1.bf16.msra.mxu1 %v9525_v56  ;;  %7259 = vmatprep.subr.bf16.mxu0 %v9530_v58  ;;  %v3933_v56 = vpack.c.bf16 %v3917_v52, %v3917_v52  ;;  %v9615_v58 = vld [vmem:[%s13071_s2 + $0xe08] ss:$16 sps:$4 sm:$0xff]   ;;  %v9696_v52 = vld [vmem:[%s13071_s2 + $0xfc0] ss:$16 sps:$4 sm:$0xff]  }
 0x398   : > { %7587 = vmatprep.subr.bf16.mxu1 %v9533_v59  ;;  %v9620_v59 = vld [vmem:[%s13071_s2 + $0xe24] ss:$16 sps:$4 sm:$0xff]  }
 0x39a   : > { %7260 = vmatpush1.bf16.msra.mxu0 %v9528_v60  ;;  %v3936_v60 = vpack.c.bf16 %v3920_v55, %v3920_v55  ;;  %v9702_v55 = vld [vmem:[%s13071_s2 + $0xfe0] ss:$16 sps:$4 sm:$0xff]  }
 0x39b   : > { %7588 = vmatpush1.bf16.msra.mxu1 %v9531_v61  ;;  %7261 = vmatprep.subr.bf16.mxu0 %v9536_v62  ;;  %v9618_v61 = vld [vmem:[%s13071_s2 + $0xe20] ss:$16 sps:$4 sm:$0xff]   ;;  %v9621_v62 = vld [vmem:[%s13071_s2 + $0xe28] ss:$16 sps:$4 sm:$0xff]  }
 0x39c   : > { %7589 = vmatprep.subr.bf16.mxu1 %v9539_v36  ;;  %v9626_v36 = vld [vmem:[%s13071_s2 + $0xe44] ss:$16 sps:$4 sm:$0xff]  }
 0x39e   : > { %7262 = vmatpush1.bf16.msra.mxu0 %v9534_v63  ;;  %v9629_v63 = vld [vmem:[%s13071_s2 + $0xe4c] ss:$16 sps:$4 sm:$0xff]  }
 0x39f   : > { %7590 = vmatpush1.bf16.msra.mxu1 %v9537_v0  ;;  %7263 = vmatprep.subr.bf16.mxu0 %v9542_v1  ;;  %v9624_v0 = vld [vmem:[%s13071_s2 + $0xe40] ss:$16 sps:$4 sm:$0xff]   ;;  %v9627_v1 = vld [vmem:[%s13071_s2 + $0xe48] ss:$16 sps:$4 sm:$0xff]  }
 0x3a0   : > { %7591 = vmatprep.subr.bf16.mxu1 %v9545_v2  ;;  %v9632_v2 = vld [vmem:[%s13071_s2 + $0xe64] ss:$16 sps:$4 sm:$0xff]  }
 0x3a2   : > { %7264 = vmatpush1.bf16.msra.mxu0 %v9540_v9  ;;  %v9635_v9 = vld [vmem:[%s13071_s2 + $0xe6c] ss:$16 sps:$4 sm:$0xff]  }
 0x3a3   : > { %7592 = vmatpush1.bf16.msra.mxu1 %v9543_v3  ;;  %7265 = vmatprep.subr.bf16.mxu0 %v9548_v5  ;;  %v9630_v3 = vld [vmem:[%s13071_s2 + $0xe60] ss:$16 sps:$4 sm:$0xff]   ;;  %v9633_v5 = vld [vmem:[%s13071_s2 + $0xe68] ss:$16 sps:$4 sm:$0xff]  }
 0x3a4   : > { %7593 = vmatprep.subr.bf16.mxu1 %v9551_v6  ;;  %v9638_v6 = vld [vmem:[%s13071_s2 + $0xe84] ss:$16 sps:$4 sm:$0xff]  }
 0x3a6   : > { %7266 = vmatpush1.bf16.msra.mxu0 %v9546_v7  ;;  %v9641_v7 = vld [vmem:[%s13071_s2 + $0xe8c] ss:$16 sps:$4 sm:$0xff]  }
 0x3a7   : > { %7594 = vmatpush1.bf16.msra.mxu1 %v9549_v11  ;;  %7267 = vmatprep.subr.bf16.mxu0 %v9554_v4  ;;  %v9636_v11 = vld [vmem:[%s13071_s2 + $0xe80] ss:$16 sps:$4 sm:$0xff]   ;;  %v9639_v4 = vld [vmem:[%s13071_s2 + $0xe88] ss:$16 sps:$4 sm:$0xff]  }
 0x3a8   : > { %7595 = vmatprep.subr.bf16.mxu1 %v9557_v17  ;;  %v9644_v17 = vld [vmem:[%s13071_s2 + $0xea4] ss:$16 sps:$4 sm:$0xff]  }
 0x3aa   : > { %7268 = vmatpush1.bf16.msra.mxu0 %v9552_v18  ;;  %v9647_v18 = vld [vmem:[%s13071_s2 + $0xeac] ss:$16 sps:$4 sm:$0xff]  }
 0x3ab   : > { %7596 = vmatpush1.bf16.msra.mxu1 %v9555_v19  ;;  %7269 = vmatprep.subr.bf16.mxu0 %v9560_v20  ;;  %v9642_v19 = vld [vmem:[%s13071_s2 + $0xea0] ss:$16 sps:$4 sm:$0xff]   ;;  %v9645_v20 = vld [vmem:[%s13071_s2 + $0xea8] ss:$16 sps:$4 sm:$0xff]  }
 0x3ac   : > { %7597 = vmatprep.subr.bf16.mxu1 %v9563_v13  ;;  %v9650_v13 = vld [vmem:[%s13071_s2 + $0xec4] ss:$16 sps:$4 sm:$0xff]  }
 0x3ae   : > { %7270 = vmatpush1.bf16.msra.mxu0 %v9558_v21  ;;  %v9653_v21 = vld [vmem:[%s13071_s2 + $0xecc] ss:$16 sps:$4 sm:$0xff]  }
 0x3af   : > { %7598 = vmatpush1.bf16.msra.mxu1 %v9561_v22  ;;  %7271 = vmatprep.subr.bf16.mxu0 %v9566_v25  ;;  %v9648_v22 = vld [vmem:[%s13071_s2 + $0xec0] ss:$16 sps:$4 sm:$0xff]   ;;  %v9651_v25 = vld [vmem:[%s13071_s2 + $0xec8] ss:$16 sps:$4 sm:$0xff]  }
 0x3b0   : > { %7599 = vmatprep.subr.bf16.mxu1 %v9569_v26  ;;  %v9656_v26 = vld [vmem:[%s13071_s2 + $0xee4] ss:$16 sps:$4 sm:$0xff]  }
 0x3b2   : > { %7272 = vmatpush1.bf16.msra.mxu0 %v9564_v27  ;;  %v9659_v27 = vld [vmem:[%s13071_s2 + $0xeec] ss:$16 sps:$4 sm:$0xff]  }
 0x3b3   : > { %7600 = vmatpush1.bf16.msra.mxu1 %v9567_v28  ;;  %7273 = vmatprep.subr.bf16.mxu0 %v9572_v29  ;;  %v9654_v28 = vld [vmem:[%s13071_s2 + $0xee0] ss:$16 sps:$4 sm:$0xff]   ;;  %v9657_v29 = vld [vmem:[%s13071_s2 + $0xee8] ss:$16 sps:$4 sm:$0xff]  }
 0x3b4   : > { %7601 = vmatprep.subr.bf16.mxu1 %v9575_v30  ;;  %v9662_v30 = vld [vmem:[%s13071_s2 + $0xf04] ss:$16 sps:$4 sm:$0xff]  }
 0x3b6   : > { %7274 = vmatpush1.bf16.msra.mxu0 %v9570_v57  ;;  %v9665_v57 = vld [vmem:[%s13071_s2 + $0xf0c] ss:$16 sps:$4 sm:$0xff]  }
 0x3b7   : > { %7602 = vmatpush1.bf16.msra.mxu1 %v9573_v31  ;;  %7275 = vmatprep.subr.bf16.mxu0 %v9578_v33  ;;  %v9660_v31 = vld [vmem:[%s13071_s2 + $0xf00] ss:$16 sps:$4 sm:$0xff]   ;;  %v9663_v33 = vld [vmem:[%s13071_s2 + $0xf08] ss:$16 sps:$4 sm:$0xff]  }
 0x3b8   : > { %7603 = vmatprep.subr.bf16.mxu1 %v9581_v8  ;;  %v9668_v8 = vld [vmem:[%s13071_s2 + $0xf24] ss:$16 sps:$4 sm:$0xff]  }
 0x3ba   : > { %7276 = vmatpush1.bf16.msra.mxu0 %v9576_v34  ;;  %v9671_v34 = vld [vmem:[%s13071_s2 + $0xf2c] ss:$16 sps:$4 sm:$0xff]  }
 0x3bb   : > { %7604 = vmatpush1.bf16.msra.mxu1 %v9579_v35  ;;  %7277 = vmatprep.subr.bf16.mxu0 %v9584_v38  ;;  %v9666_v35 = vld [vmem:[%s13071_s2 + $0xf20] ss:$16 sps:$4 sm:$0xff]   ;;  %v9669_v38 = vld [vmem:[%s13071_s2 + $0xf28] ss:$16 sps:$4 sm:$0xff]  }
 0x3bc   : > { %7605 = vmatprep.subr.bf16.mxu1 %v9587_v12  ;;  %v9674_v12 = vld [vmem:[%s13071_s2 + $0xf44] ss:$16 sps:$4 sm:$0xff]  }
 0x3be   : > { %7278 = vmatpush1.bf16.msra.mxu0 %v9582_v15  ;;  %v9677_v15 = vld [vmem:[%s13071_s2 + $0xf4c] ss:$16 sps:$4 sm:$0xff]  }
 0x3bf   : > { %7606 = vmatpush1.bf16.msra.mxu1 %v9585_v39  ;;  %7279 = vmatprep.subr.bf16.mxu0 %v9590_v41  ;;  %v9672_v39 = vld [vmem:[%s13071_s2 + $0xf40] ss:$16 sps:$4 sm:$0xff]   ;;  %v9675_v41 = vld [vmem:[%s13071_s2 + $0xf48] ss:$16 sps:$4 sm:$0xff]  }
 0x3c0   : > { %7607 = vmatprep.subr.bf16.mxu1 %v9593_v42  ;;  %v9680_v42 = vld [vmem:[%s13071_s2 + $0xf64] ss:$16 sps:$4 sm:$0xff]  }
 0x3c2   : > { %7280 = vmatpush1.bf16.msra.mxu0 %v9588_v43  ;;  %v9683_v43 = vld [vmem:[%s13071_s2 + $0xf6c] ss:$16 sps:$4 sm:$0xff]  }
 0x3c3   : > { %7608 = vmatpush1.bf16.msra.mxu1 %v9591_v44  ;;  %7281 = vmatprep.subr.bf16.mxu0 %v9596_v10  ;;  %v9678_v44 = vld [vmem:[%s13071_s2 + $0xf60] ss:$16 sps:$4 sm:$0xff]   ;;  %v9681_v10 = vld [vmem:[%s13071_s2 + $0xf68] ss:$16 sps:$4 sm:$0xff]  }
 0x3c4   : > { %7609 = vmatprep.subr.bf16.mxu1 %v9599_v24  ;;  %v9686_v24 = vld [vmem:[%s13071_s2 + $0xf84] ss:$16 sps:$4 sm:$0xff]  }
 0x3c6   : > { %7282 = vmatpush1.bf16.msra.mxu0 %v9594_v32  ;;  %v9689_v32 = vld [vmem:[%s13071_s2 + $0xf8c] ss:$16 sps:$4 sm:$0xff]  }
 0x3c7   : > { %7610 = vmatpush1.bf16.msra.mxu1 %v9597_v47  ;;  %7283 = vmatprep.subr.bf16.mxu0 %v9602_v48  ;;  %v9684_v47 = vld [vmem:[%s13071_s2 + $0xf80] ss:$16 sps:$4 sm:$0xff]   ;;  %v9687_v48 = vld [vmem:[%s13071_s2 + $0xf88] ss:$16 sps:$4 sm:$0xff]  }
 0x3c8   : > { %7611 = vmatprep.subr.bf16.mxu1 %v9605_v16  ;;  %v9692_v16 = vld [vmem:[%s13071_s2 + $0xfa4] ss:$16 sps:$4 sm:$0xff]  }
 0x3ca   : > { %7284 = vmatpush1.bf16.msra.mxu0 %v9600_v49  ;;  %v9695_v49 = vld [vmem:[%s13071_s2 + $0xfac] ss:$16 sps:$4 sm:$0xff]  }
 0x3cb   : > { %7612 = vmatpush1.bf16.msra.mxu1 %v9603_v50  ;;  %7285 = vmatprep.subr.bf16.mxu0 %v9608_v40  ;;  %v9690_v50 = vld [vmem:[%s13071_s2 + $0xfa0] ss:$16 sps:$4 sm:$0xff]   ;;  %v9693_v40 = vld [vmem:[%s13071_s2 + $0xfa8] ss:$16 sps:$4 sm:$0xff]  }
 0x3cc   : > { %7613 = vmatprep.subr.bf16.mxu1 %v9611_v14  ;;  %v9698_v14 = vld [vmem:[%s13071_s2 + $0xfc4] ss:$16 sps:$4 sm:$0xff]  }
 0x3ce   : > { %7286 = vmatpush1.bf16.msra.mxu0 %v9606_v51  ;;  %v9701_v51 = vld [vmem:[%s13071_s2 + $0xfcc] ss:$16 sps:$4 sm:$0xff]  }
 0x3cf   : > { %7614 = vmatpush1.bf16.msra.mxu1 %v9609_v53  ;;  %7296 = vmatprep.subr.bf16.mxu0 %v9614_v54  ;;  %v9699_v53 = vld [vmem:[%s13071_s2 + $0xfc8] ss:$16 sps:$4 sm:$0xff]   ;;  %v9704_v54 = vld [vmem:[%s13071_s2 + $0xfe4] ss:$16 sps:$4 sm:$0xff]  }
 0x3d0   : > { %7624 = vmatprep.subr.bf16.mxu1 %v9617_v46  ;;  %v9707_v46 = vld [vmem:[%s13071_s2 + $0xfec] ss:$16 sps:$4 sm:$0xff]  }
 0x3d1   : > { %7288 = vmatmul.mubr.bf16.vlgmr.msra.gmra.mrb[16].mxu0 %v3933_v56 }
 0x3d2   : > { %7616 = vmatmul.mubr.bf16.vlgmr.msra.gmra.mrb[16].mxu1 %v3933_v56  ;;  %7297 = vmatpush1.bf16.msra.mxu0 %v9612_v37  ;;  %v3919_v37 = vmax.f32 %v12121_v45, 0.0  ;;  %v9705_v56 = vld [vmem:[%s13071_s2 + $0xfe8] ss:$16 sps:$4 sm:$0xff]   ;;  %v9711_v45 = vld [vmem:[%s9930_s26 + $0x10] sm:$0xff] }
 0x3d3   : > { %7328 = vmatprep.mubr.bf16.mxu0 %v3936_v60  ;;  %7625 = vmatpush1.bf16.msra.mxu1 %v9615_v58 }
 0x3d4   : > { %7656 = vmatprep.mubr.bf16.mxu1 %v3936_v60  ;;  %7298 = vmatprep.subr.bf16.mxu0 %v9620_v59  ;;  %v3935_v58 = vpack.c.bf16 %v3919_v37, %v3919_v37  ;;  %v9710_v60 = vld [vmem:[%s9930_s26] sm:$0xff] }
 0x3d5   : > { %7626 = vmatprep.subr.bf16.mxu1 %v9623_v23 }
 0x3d6   : > { %7299 = vmatpush1.bf16.msra.mxu0 %v9618_v61 }
 0x3d7   : > { %7627 = vmatpush1.bf16.msra.mxu1 %v9621_v62  ;;  %7300 = vmatprep.subr.bf16.mxu0 %v9626_v36 }
 0x3d8   : > { %7628 = vmatprep.subr.bf16.mxu1 %v9629_v63  ;;  %v9712_v63 = vld [vmem:[%s9930_s26 + $0x8] sm:$0xff] }
 0x3da   : > { %7301 = vmatpush1.bf16.msra.mxu0 %v9624_v0 }
 0x3db   : > { %7629 = vmatpush1.bf16.msra.mxu1 %v9627_v1  ;;  %7302 = vmatprep.subr.bf16.mxu0 %v9632_v2 }
 0x3dc   : > { %7630 = vmatprep.subr.bf16.mxu1 %v9635_v9 }
 0x3de   : > { %7303 = vmatpush1.bf16.msra.mxu0 %v9630_v3 }
 0x3df   : > { %7631 = vmatpush1.bf16.msra.mxu1 %v9633_v5  ;;  %7304 = vmatprep.subr.bf16.mxu0 %v9638_v6 }
 0x3e0   : > { %7632 = vmatprep.subr.bf16.mxu1 %v9641_v7 }
 0x3e2   : > { %7305 = vmatpush1.bf16.msra.mxu0 %v9636_v11 }
 0x3e3   : > { %7633 = vmatpush1.bf16.msra.mxu1 %v9639_v4  ;;  %7306 = vmatprep.subr.bf16.mxu0 %v9644_v17  ;;  %v9713_v17 = vld [vmem:[%s9930_s26 + $0x18] sm:$0xff]  ;;  %s7775_s26 = sshll.u32 %s161_s7, 5 }
 0x3e4   : > { %7634 = vmatprep.subr.bf16.mxu1 %v9647_v18  ;;  %s163_s9 = scalar_lea.vmem [#allocation2], %s7775_s26 }
 0x3e5   : > { %s7712_s10 = sshll.u32 %s163_s9, 4  ;;  %s13029_s10 = int_to_ptr.vmem [resolvable:$true] %s7712_s10 }
 0x3e6   : > { %7307 = vmatpush1.bf16.msra.mxu0 %v9642_v19  ;;  %s9714_s20 = scalar_lea.vmem %s13029_s10, 512  ;;  %p9721_p0 = scmp.lt.s32.totalorder %s13029_s10, %s9719_s25 }
 0x3e7   : > { %7635 = vmatpush1.bf16.msra.mxu1 %v9645_v20  ;;  %7308 = vmatprep.subr.bf16.mxu0 %v9650_v13  ;;  %p9715_p11 = scmp.ne.s32.totalorder %s13029_s10, %s9714_s20  ;;  %p9722_p1 = scmp.lt.s32.totalorder %s9720_s27, %s9714_s20 }
 0x3e8   : > { %7636 = vmatprep.subr.bf16.mxu1 %v9653_v21 }
 0x3e9   : > { %p9716_p12 = pnand %p9715_p11, %p9837_p5  ;;  %p9723_p2 = por %p9722_p1, %p9721_p0 }
 0x3ea   : > { %7309 = vmatpush1.bf16.msra.mxu0 %v9648_v22 }
 0x3eb   : > { %7637 = vmatpush1.bf16.msra.mxu1 %v9651_v25  ;;  %7310 = vmatprep.subr.bf16.mxu0 %v9656_v26  ;;  %p9717_p13 = pneg %p9716_p12 }
 0x3ec   : > { %7638 = vmatprep.subr.bf16.mxu1 %v9659_v27 }
 0x3ed   : > { %p9724_p3 = pnand %p9723_p2, %p9717_p13 }
 0x3ee   : > { %7311 = vmatpush1.bf16.msra.mxu0 %v9654_v28 }
 0x3ef   : > { %7639 = vmatpush1.bf16.msra.mxu1 %v9657_v29  ;;  %7312 = vmatprep.subr.bf16.mxu0 %v9662_v30 }
 0x3f0   : > { %7640 = vmatprep.subr.bf16.mxu1 %v9665_v57 }
 0x3f2   : > { %7313 = vmatpush1.bf16.msra.mxu0 %v9660_v31 }
 0x3f3   : > { %7641 = vmatpush1.bf16.msra.mxu1 %v9663_v33  ;;  %7314 = vmatprep.subr.bf16.mxu0 %v9668_v8 }
 0x3f4   : > { %7642 = vmatprep.subr.bf16.mxu1 %v9671_v34 }
 0x3f6   : > { %7315 = vmatpush1.bf16.msra.mxu0 %v9666_v35 }
 0x3f7   : > { %7643 = vmatpush1.bf16.msra.mxu1 %v9669_v38  ;;  %7316 = vmatprep.subr.bf16.mxu0 %v9674_v12 }
 0x3f8   : > { %7644 = vmatprep.subr.bf16.mxu1 %v9677_v15 }
 0x3fa   : > { %7317 = vmatpush1.bf16.msra.mxu0 %v9672_v39 }
 0x3fb   : > { %7645 = vmatpush1.bf16.msra.mxu1 %v9675_v41  ;;  %7318 = vmatprep.subr.bf16.mxu0 %v9680_v42 }
 0x3fc   : > { %7646 = vmatprep.subr.bf16.mxu1 %v9683_v43 }
 0x3fe   : > { %7319 = vmatpush1.bf16.msra.mxu0 %v9678_v44 }
 0x3ff   : > { %7647 = vmatpush1.bf16.msra.mxu1 %v9681_v10  ;;  %7320 = vmatprep.subr.bf16.mxu0 %v9686_v24 }
 0x400   : > { %7648 = vmatprep.subr.bf16.mxu1 %v9689_v32 }
 0x402   : > { %7321 = vmatpush1.bf16.msra.mxu0 %v9684_v47 }
 0x403   : > { %7649 = vmatpush1.bf16.msra.mxu1 %v9687_v48  ;;  %7322 = vmatprep.subr.bf16.mxu0 %v9692_v16 }
 0x404   : > { %7650 = vmatprep.subr.bf16.mxu1 %v9695_v49 }
 0x406   : > { %7323 = vmatpush1.bf16.msra.mxu0 %v9690_v50 }
 0x407   : > { %7651 = vmatpush1.bf16.msra.mxu1 %v9693_v40  ;;  %7324 = vmatprep.subr.bf16.mxu0 %v9698_v14 }
 0x408   : > { %7652 = vmatprep.subr.bf16.mxu1 %v9701_v51 }
 0x40a   : > { %7325 = vmatpush1.bf16.msra.mxu0 %v9696_v52 }
 0x40b   : > { %7653 = vmatpush1.bf16.msra.mxu1 %v9699_v53  ;;  %7326 = vmatprep.subr.bf16.mxu0 %v9704_v54 }
 0x40c   : > { %7654 = vmatprep.subr.bf16.mxu1 %v9707_v46 }
 0x40e   : > { %7327 = vmatpush1.bf16.msra.mxu0 %v9702_v55 }
 0x40f   : > { %7655 = vmatpush1.bf16.msra.mxu1 %v9705_v56 }
 0x411   : > { %7329 = vmatmul.mubr.bf16.vlgmr.msra.gmra.mrb[16].mxu0 %v3935_v58 }
 0x412   : > { %7657 = vmatmul.mubr.bf16.vlgmr.msra.gmra.mrb[16].mxu1 %v3935_v58 }
 0x4e4   : > { %v7330_v59 = vpop.f32.mrb[16].mxu0 }
 0x4e5   : > { %v8809_v23 = vadd.f32 %v9710_v60, %v7330_v59  ;;  %v7658_v61 = vpop.f32.mrb[16].mxu1  ;;  %v7332_v62 = vpop.f32.mrb[17].mxu0 }
 0x4e6   : > { %v8811_v36 = vadd.f32 %v9711_v45, %v7658_v61  ;;  %v8810_v0 = vadd.f32 %v9712_v63, %v7332_v62  ;;  %v7660_v1 = vpop.f32.mrb[17].mxu1  ;;  %v7334_v2 = vpop.f32.mrb[18].mxu0 }
 0x4e7   : > { %v7671_v9 = vmul.f32 %v8809_v23, %v8809_v23  ;;  %v7662_v3 = vpop.f32.mrb[18].mxu1  ;;  %v7335_v5 = vpop.f32.mrb[19].mxu0  ;;  %v8812_v18 = vadd.f32 %v9713_v17, %v7660_v1 }
 0x4e8   : > { %v7672_v6 = vmul.f32 %v8810_v0, %v8810_v0  ;;  %v7663_v7 = vpop.f32.mrb[19].mxu1  ;;  %v7665_v11 = vadd.f32 %v8810_v0, %v8809_v23  ;;  %v7673_v4 = vmul.f32 %v8811_v36, %v8811_v36 }
 0x4e9   : > { %v7674_v22 = vmul.f32 %v8812_v18, %v8812_v18 }
 0x4ea   : > { %v7666_v19 = vadd.f32 %v8811_v36, %v7665_v11  ;;  %v7675_v20 = vadd.f32 %v7672_v6, %v7671_v9 }
 0x4ec   : > { %v7667_v13 = vadd.f32 %v8812_v18, %v7666_v19  ;;  %v7676_v21 = vadd.f32 %v7675_v20, %v7673_v4 }
 0x4ee   : > { %7668 = vadd.xlane.f32.xlu0 %v7667_v13  ;;  %v7677_v25 = vadd.f32 %v7676_v21, %v7674_v22 }
 0x4f2   : > { %7678 = vadd.xlane.f32.xlu0 %v7677_v25 }
 0x57b   : > { %v7669_v26 = vpop.xlane.xlu0 %7668 }
 0x57c   : > { %v7670_v27 = vmul.f32 0.001953125, %v7669_v26 }
 0x57e   : > { %v7681_v29 = vmul.f32 %v7670_v27, %v7670_v27  ;;  %v7683_v33 = vsub.f32 %v8809_v23, %v7670_v27  ;;  %v7684_v8 = vsub.f32 %v8810_v0, %v7670_v27  ;;  %v7685_v34 = vsub.f32 %v8811_v36, %v7670_v27 }
 0x57f   : > { %v7679_v28 = vpop.xlane.xlu0 %7678  ;;  %v7686_v35 = vsub.f32 %v8812_v18, %v7670_v27 }
 0x580   : > { %v7680_v30 = vmul.f32 0.001953125, %v7679_v28 }
 0x582   : > { %v7682_v57 = vsub.f32 %v7680_v30, %v7681_v29 }
 0x584   : > { %v7687_v31 = vadd.f32 1e-05, %v7682_v57 }
 0x586   : > { %9708 = vrsqrt.f32 %v7687_v31 }
 0x590   : > { %v9709_v38 = vpop.eup %9708 }
 0x591   : > { %v7689_v12 = vmul.f32 %v9709_v38, %v7683_v33  ;;  %v7690_v15 = vmul.f32 %v9709_v38, %v7684_v8  ;;  %v7691_v39 = vmul.f32 %v9709_v38, %v7685_v34  ;;  %v7692_v41 = vmul.f32 %v9709_v38, %v7686_v35 }
 0x593   : > { %7693 = vst [vmem:[%s163_s9] sm:$0xff] %v7689_v12  ;;  %7694 = vst [vmem:[%s163_s9 + $0x8] sm:$0xff] %v7690_v15 }
 0x594   : > { %7695 = vst [vmem:[%s163_s9 + $0x10] sm:$0xff] %v7691_v39  ;;  %7696 = vst [vmem:[%s163_s9 + $0x18] sm:$0xff] %v7692_v41 }
 0x595   : > { %9727 = shalt.err (!%p9724_p3)
}
 0x596   : > { %s9728_s28 = scalar_lea.hbm %s13027_s19, 512  ;;  %s9732_s4 = scalar_lea.hbm %s13072_s3, 1024 }
 0x597   : > { %p9729_p4 = scmp.ne.s32.totalorder %s13027_s19, %s9728_s28  ;;  %p9733_p9 = scmp.lt.u32.totalorder %s13027_s19, %s13072_s3 }
 0x598   : > { %p9734_p10 = scmp.lt.u32.totalorder %s9732_s4, %s9728_s28  ;;  %p9736_p12 = scmp.lt.u32.totalorder %s9728_s28, %s13027_s19 }
 0x599   : > { %p9730_p7 = pnand %p9729_p4, %p9837_p5 }
 0x59a   : > { %p9735_p11 = por %p9734_p10, %p9733_p9 }
 0x59b   : > { %p9731_p8 = pneg %p9730_p7 }
 0x59c   : > { %p9737_p13 = por %p9736_p12, %p9735_p11 }
 0x59e   : > { %p9738_p0 = pnand %p9737_p13, %p9731_p8 }
 0x5a0   : > { %9741 = shalt.err (!%p9738_p0)
}
 0x5a1   : > { %8901 = dma.vmem_to_hbm [thread:$0]  (%p9837_p5), %s13029_s10, 512, %s13027_s19, %s7698_s16  }
 0x5a2 PF: > { %p8907_p1 = scmp.ge.s32.totalorder %s9776_s15, 2  ;;  %s7724_s7 = sand.u32 1, %s9764_s12  }
 0x5a3   : > { %s7725_s26 = scalar_lea.sflag [#allocation3], %s7724_s7 }
 0x5a4   : > { %p8904_p2 = pnand %p8907_p1, %p9841_p6 }
 0x5a6   : > { %9759 = dma.done.wait (!%p8904_p2), %s7725_s26, 512  }
 0x5a7   : > { %9761 = vsyncadd (!%p8904_p2), %s7725_s26, 4294966784  ;;  %p13_p3 = scmp.ge.s32.totalorder %s9824_s18, 4   ;;  %s13075_s12 = smov %s9768_s13 }
 0x5a8   : > { %s13076_s13 = smov %s9772_s14  ;;  %s13077_s14 = smov %s9835_s21 }
 0x5a9   : > { %s13078_s15 = smov %s9824_s18  ;;  %15 = sbr.rel (!%p13_p3) target bundleno = 3 (0x3), region = 67 }
 0x5b0   :  { %7730 = vsyncpa [#allocation3], 1 }
 0x5b1   :  { %7732 = vsyncpa [#allocation3 + $0x1], 1 }

</bundles_post_ra>
